<compile_context>
chip_gen: v7x
topology: tpu7x:2x2x1
jax: 0.10.0
libtpu: 0.0.40
codegen_flags: <defaults>
</compile_context>

<pallas_src>
import numpy as np

import jax
import jax.numpy as jnp
from jax.experimental import pallas as pl
from jax.experimental.pallas import tpu as pltpu

NC = 3
NDF = 8
BATCH = 2
IMG = 64
KSIZE = 4
BN_EPS = 1e-5
LRELU_SLOPE = 0.2

# (Hin, Win, Cin, Cout, stride, pad, use_bn, use_act) per layer (cv0..cv4).
LAYERS = [
    (64, 64, NC,      NDF,     2, 1, False, True),
    (32, 32, NDF,     NDF * 2, 2, 1, True,  True),
    (16, 16, NDF * 2, NDF * 4, 2, 1, True,  True),
    (8,  8,  NDF * 4, NDF * 8, 2, 1, True,  True),
    (4,  4,  NDF * 8, 1,       1, 0, False, False),
]


def _out_size(hin, k, s, p):
    return (hin + 2 * p - k) // s + 1


# ---------------------------------------------------------------------------
# The fused Pallas kernel: entire Discriminator forward in one invocation.
# ---------------------------------------------------------------------------
def make_kernel(n_batch, layers):
    def kernel(*refs):
        o_ref = refs[-1]
        consts = refs[1:-1]
        a = refs[0][...]                                   # (N*H0, W0*C0) f32

        idx = 0
        for (hin, win, cin, cout, s, p, use_bn, use_act) in layers:
            ho = _out_size(hin, KSIZE, s, p)
            wo = _out_size(win, KSIZE, s, p)
            r_ref, u_ref = consts[idx], consts[idx + 1]
            idx += 2

            # conv: 4 row-tap selections + 4 banded-weight matmuls (MXU, bf16
            # operands, f32 accumulation).
            x = jnp.zeros((n_batch * ho, wo * cout), jnp.float32)
            for i in range(KSIZE):
                a_i = jnp.dot(r_ref[i], a, preferred_element_type=jnp.float32)
                x = x + jnp.dot(a_i.astype(jnp.bfloat16), u_ref[i],
                                preferred_element_type=jnp.float32)

            if use_bn:
                q_ref, qt_ref, g_ref, b_ref = consts[idx:idx + 4]
                idx += 4
                m_tot = float(n_batch * ho * wo)
                # single pass: per-(wo, c) column sums, gathered per channel
                # with the tiny 0/1 matrix Q, then folded scale/shift.
                s1 = jnp.sum(x, axis=0, keepdims=True)             # (1, Wo*C)
                s2 = jnp.sum(x * x, axis=0, keepdims=True)
                mean = jnp.dot(s1, q_ref[...],
                               preferred_element_type=jnp.float32) / m_tot
                ex2 = jnp.dot(s2, q_ref[...],
                              preferred_element_type=jnp.float32) / m_tot
                var = ex2 - mean * mean                            # biased (PyTorch)
                scale = g_ref[...] * jax.lax.rsqrt(var + BN_EPS)   # (1, C)
                shift = b_ref[...] - mean * scale
                scale_b = jnp.dot(scale, qt_ref[...],
                                  preferred_element_type=jnp.float32)
                shift_b = jnp.dot(shift, qt_ref[...],
                                  preferred_element_type=jnp.float32)
                x = x * scale_b + shift_b

            if use_act:
                x = jnp.where(x >= 0.0, x, LRELU_SLOPE * x)
            a = x

        assert idx == len(consts)
        o_ref[...] = a                                     # (N, 1)
    return kernel


def discriminator_forward(consts, x):
    n, c, h, w = x.shape
    # NCHW -> channel-last flattened (N*H, W*C): the only layout plumbing.
    a0 = jnp.transpose(x, (0, 2, 3, 1)).reshape(n * h, w * c)
    args = (a0,) + tuple(consts)
    vmem = pl.BlockSpec(memory_space=pltpu.MemorySpace.VMEM)
    out = pl.pallas_call(
        make_kernel(n, LAYERS),
        out_shape=jax.ShapeDtypeStruct((n, 1), jnp.float32),
        in_specs=[vmem] * len(args),
        out_specs=vmem,
    )(*args)
    # output.view(-1, 1).squeeze(1)
    return out.reshape(-1)


# ---------------------------------------------------------------------------
# Offline constant preparation (pure weight/layout preprocessing, numpy).
#   R : (4, N*Ho, N*Hin)        0/1 selection of input row  s*ho + i - p
#   U : (4, Win*Cin, Wo*Cout)   U[i][(w,c),(wo,co)] = W[co,c,i, w - s*wo + p]
#   Q : (Wo*Cout, Cout) , QT = Q.T    per-channel BN stat gather / broadcast
# ---------------------------------------------------------------------------
def preprocess(params, n_batch=BATCH):
    wnames = ["cv0_w", "cv1_w", "cv2_w", "cv3_w", "cv4_w"]
    bnames = [None, ("bn1_g", "bn1_b"), ("bn2_g", "bn2_b"),
              ("bn3_g", "bn3_b"), None]
    consts = []
    for li, (hin, win, cin, cout, s, p, use_bn, _) in enumerate(LAYERS):
        ho = _out_size(hin, KSIZE, s, p)
        wo = _out_size(win, KSIZE, s, p)
        wgt = np.asarray(params[wnames[li]], dtype=np.float32)  # (Cout,Cin,4,4)

        R = np.zeros((KSIZE, n_batch * ho, n_batch * hin), np.float32)
        for i in range(KSIZE):
            for n in range(n_batch):
                for oh in range(ho):
                    ih = s * oh + i - p
                    if 0 <= ih < hin:
                        R[i, n * ho + oh, n * hin + ih] = 1.0

        U = np.zeros((KSIZE, win * cin, wo * cout), np.float32)
        for i in range(KSIZE):
            for ow in range(wo):
                for j in range(KSIZE):
                    iw = s * ow + j - p
                    if 0 <= iw < win:
                        U[i, iw * cin:(iw + 1) * cin,
                          ow * cout:(ow + 1) * cout] = wgt[:, :, i, j].T

        consts.append(jnp.asarray(R, jnp.float32))
        consts.append(jnp.asarray(U, jnp.bfloat16))

        if use_bn:
            gname, bname = bnames[li]
            Q = np.tile(np.eye(cout, dtype=np.float32), (wo, 1))
            consts.append(jnp.asarray(Q, jnp.float32))
            consts.append(jnp.asarray(np.ascontiguousarray(Q.T), jnp.float32))
            consts.append(jnp.asarray(params[gname], jnp.float32).reshape(1, cout))
            consts.append(jnp.asarray(params[bname], jnp.float32).reshape(1, cout))
    return tuple(consts)


# ---------------------------------------------------------------------------
# Parameter init (PyTorch Discriminator.initialization(): kaiming_normal a=0.2
# for convs, N(1, 0.02) for BN gamma, 0 for BN beta).
# ---------------------------------------------------------------------------
def kaiming_normal(key, shape, a=0.2):
    cout, cin, kh, kw = shape
    fan_in = cin * kh * kw
    gain = (2.0 / (1.0 + a * a)) ** 0.5
    std = gain / (fan_in ** 0.5)
    return std * jax.random.normal(key, shape, dtype=jnp.float32)


def init_params(key, ndf=NDF, nc=NC):
    ks = jax.random.split(key, 8)
    return {
        "cv0_w": kaiming_normal(ks[0], (ndf, nc, 4, 4)),
        "cv1_w": kaiming_normal(ks[1], (ndf * 2, ndf, 4, 4)),
        "bn1_g": 1.0 + 0.02 * jax.random.normal(ks[2], (ndf * 2,), dtype=jnp.float32),
        "bn1_b": jnp.zeros((ndf * 2,), jnp.float32),
        "cv2_w": kaiming_normal(ks[3], (ndf * 4, ndf * 2, 4, 4)),
        "bn2_g": 1.0 + 0.02 * jax.random.normal(ks[4], (ndf * 4,), dtype=jnp.float32),
        "bn2_b": jnp.zeros((ndf * 4,), jnp.float32),
        "cv3_w": kaiming_normal(ks[5], (ndf * 8, ndf * 4, 4, 4)),
        "bn3_g": 1.0 + 0.02 * jax.random.normal(ks[6], (ndf * 8,), dtype=jnp.float32),
        "bn3_b": jnp.zeros((ndf * 8,), jnp.float32),
        "cv4_w": kaiming_normal(ks[7], (1, ndf * 8, 4, 4)),
    }


# ---------------------------------------------------------------------------
# Pure-JAX (XLA) reference of the same forward pass (training-mode BN).
# ---------------------------------------------------------------------------
def reference_forward(params, x):
    def conv(h, w, stride, pad):
        return jax.lax.conv_general_dilated(
            h, w, window_strides=(stride, stride),
            padding=((pad, pad), (pad, pad)),
            dimension_numbers=("NCHW", "OIHW", "NCHW"))

    def bn(h, g, b):
        mean = jnp.mean(h, axis=(0, 2, 3), keepdims=True)
        var = jnp.mean((h - mean) ** 2, axis=(0, 2, 3), keepdims=True)
        hn = (h - mean) * jax.lax.rsqrt(var + BN_EPS)
        return hn * g.reshape(1, -1, 1, 1) + b.reshape(1, -1, 1, 1)

    def lrelu(h):
        return jnp.where(h >= 0.0, h, LRELU_SLOPE * h)

    h = lrelu(conv(x, params["cv0_w"], 2, 1))
    h = lrelu(bn(conv(h, params["cv1_w"], 2, 1), params["bn1_g"], params["bn1_b"]))
    h = lrelu(bn(conv(h, params["cv2_w"], 2, 1), params["bn2_g"], params["bn2_b"]))
    h = lrelu(bn(conv(h, params["cv3_w"], 2, 1), params["bn3_g"], params["bn3_b"]))
    out = conv(h, params["cv4_w"], 1, 0)
    return out.reshape(-1)


if __name__ == "__main__":
    key = jax.random.PRNGKey(0)
    pkey, xkey = jax.random.split(key)
    params = init_params(pkey)
    # DCGAN discriminator expects 64x64 images so cv4 (4x4 valid) -> 1x1.
    x = jax.random.normal(xkey, (BATCH, NC, IMG, IMG), dtype=jnp.float32)

    consts = preprocess(params, BATCH)
    fwd = jax.jit(discriminator_forward)
    y = jax.block_until_ready(fwd(consts, x))

    assert y.shape == (BATCH,), y.shape
    assert bool(jnp.all(jnp.isfinite(y)))

    # sanity check vs. the XLA reference (loose tolerance: conv matmuls use
    # bf16 operands on the MXU, everything else is f32).
    y_ref = jax.block_until_ready(jax.jit(reference_forward)(params, x))
    assert bool(jnp.allclose(y, y_ref, rtol=1e-1, atol=1e-1)), (y, y_ref)

    print("KERNEL_OK")
</pallas_src>

<mosaic_0001>
module attributes {stable_mosaic.version = 11 : i64} {
  func.func @kernel(%arg0: memref<128x192xf32, #tpu.memory_space<vmem>>, %arg1: memref<4x64x128xf32, #tpu.memory_space<vmem>>, %arg2: memref<4x192x256xbf16, #tpu.memory_space<vmem>>, %arg3: memref<4x32x64xf32, #tpu.memory_space<vmem>>, %arg4: memref<4x256x256xbf16, #tpu.memory_space<vmem>>, %arg5: memref<256x16xf32, #tpu.memory_space<vmem>>, %arg6: memref<16x256xf32, #tpu.memory_space<vmem>>, %arg7: memref<1x16xf32, #tpu.memory_space<vmem>>, %arg8: memref<1x16xf32, #tpu.memory_space<vmem>>, %arg9: memref<4x16x32xf32, #tpu.memory_space<vmem>>, %arg10: memref<4x256x256xbf16, #tpu.memory_space<vmem>>, %arg11: memref<256x32xf32, #tpu.memory_space<vmem>>, %arg12: memref<32x256xf32, #tpu.memory_space<vmem>>, %arg13: memref<1x32xf32, #tpu.memory_space<vmem>>, %arg14: memref<1x32xf32, #tpu.memory_space<vmem>>, %arg15: memref<4x8x16xf32, #tpu.memory_space<vmem>>, %arg16: memref<4x256x256xbf16, #tpu.memory_space<vmem>>, %arg17: memref<256x64xf32, #tpu.memory_space<vmem>>, %arg18: memref<64x256xf32, #tpu.memory_space<vmem>>, %arg19: memref<1x64xf32, #tpu.memory_space<vmem>>, %arg20: memref<1x64xf32, #tpu.memory_space<vmem>>, %arg21: memref<4x2x8xf32, #tpu.memory_space<vmem>>, %arg22: memref<4x256x1xbf16, #tpu.memory_space<vmem>>, %arg23: memref<2x1xf32, #tpu.memory_space<vmem>>) attributes {dimension_semantics = [], scalar_prefetch = 0 : i64, scratch_operands = 0 : i64, tpu.core_type = #tpu.core_type<tc>} {
    %c0 = arith.constant 0 : index
    %c0_0 = arith.constant 0 : index
    %0 = vector.load %arg0[%c0, %c0_0] : memref<128x192xf32, #tpu.memory_space<vmem>>, vector<128x192xf32>
    %cst = arith.constant 0.000000e+00 : f32
    %1 = vector.broadcast %cst : f32 to vector<64x256xf32>
    %c0_1 = arith.constant 0 : index
    %c0_2 = arith.constant 0 : index
    %c0_3 = arith.constant 0 : index
    %2 = vector.load %arg1[%c0_1, %c0_2, %c0_3] : memref<4x64x128xf32, #tpu.memory_space<vmem>>, vector<1x64x128xf32>
    %3 = vector.shape_cast %2 : vector<1x64x128xf32> to vector<64x128xf32>
    %cst_4 = arith.constant dense<0.000000e+00> : vector<64x192xf32>
    %4 = tpu.matmul %3, %0, %cst_4 {dimension_numbers = #tpu.dot_dimension_numbers<[1], [0], [0], [1], [0, 0, 1, 1], [], []>} : vector<64x128xf32>, vector<128x192xf32>, vector<64x192xf32> -> vector<64x192xf32>
    %5 = arith.truncf %4 : vector<64x192xf32> to vector<64x192xbf16>
    %c0_5 = arith.constant 0 : index
    %c0_6 = arith.constant 0 : index
    %c0_7 = arith.constant 0 : index
    %6 = vector.load %arg2[%c0_5, %c0_6, %c0_7] : memref<4x192x256xbf16, #tpu.memory_space<vmem>>, vector<1x192x256xbf16>
    %7 = vector.shape_cast %6 : vector<1x192x256xbf16> to vector<192x256xbf16>
    %cst_8 = arith.constant dense<0.000000e+00> : vector<64x256xf32>
    %8 = tpu.matmul %5, %7, %cst_8 {dimension_numbers = #tpu.dot_dimension_numbers<[1], [0], [0], [1], [0, 0, 1, 1], [], []>} : vector<64x192xbf16>, vector<192x256xbf16>, vector<64x256xf32> -> vector<64x256xf32>
    %9 = arith.addf %1, %8 : vector<64x256xf32>
    %c1 = arith.constant 1 : index
    %c0_9 = arith.constant 0 : index
    %c0_10 = arith.constant 0 : index
    %10 = vector.load %arg1[%c1, %c0_9, %c0_10] : memref<4x64x128xf32, #tpu.memory_space<vmem>>, vector<1x64x128xf32>
    %11 = vector.shape_cast %10 : vector<1x64x128xf32> to vector<64x128xf32>
    %cst_11 = arith.constant dense<0.000000e+00> : vector<64x192xf32>
    %12 = tpu.matmul %11, %0, %cst_11 {dimension_numbers = #tpu.dot_dimension_numbers<[1], [0], [0], [1], [0, 0, 1, 1], [], []>} : vector<64x128xf32>, vector<128x192xf32>, vector<64x192xf32> -> vector<64x192xf32>
    %13 = arith.truncf %12 : vector<64x192xf32> to vector<64x192xbf16>
    %c1_12 = arith.constant 1 : index
    %c0_13 = arith.constant 0 : index
    %c0_14 = arith.constant 0 : index
    %14 = vector.load %arg2[%c1_12, %c0_13, %c0_14] : memref<4x192x256xbf16, #tpu.memory_space<vmem>>, vector<1x192x256xbf16>
    %15 = vector.shape_cast %14 : vector<1x192x256xbf16> to vector<192x256xbf16>
    %cst_15 = arith.constant dense<0.000000e+00> : vector<64x256xf32>
    %16 = tpu.matmul %13, %15, %cst_15 {dimension_numbers = #tpu.dot_dimension_numbers<[1], [0], [0], [1], [0, 0, 1, 1], [], []>} : vector<64x192xbf16>, vector<192x256xbf16>, vector<64x256xf32> -> vector<64x256xf32>
    %17 = arith.addf %9, %16 : vector<64x256xf32>
    %c2 = arith.constant 2 : index
    %c0_16 = arith.constant 0 : index
    %c0_17 = arith.constant 0 : index
    %18 = vector.load %arg1[%c2, %c0_16, %c0_17] : memref<4x64x128xf32, #tpu.memory_space<vmem>>, vector<1x64x128xf32>
    %19 = vector.shape_cast %18 : vector<1x64x128xf32> to vector<64x128xf32>
    %cst_18 = arith.constant dense<0.000000e+00> : vector<64x192xf32>
    %20 = tpu.matmul %19, %0, %cst_18 {dimension_numbers = #tpu.dot_dimension_numbers<[1], [0], [0], [1], [0, 0, 1, 1], [], []>} : vector<64x128xf32>, vector<128x192xf32>, vector<64x192xf32> -> vector<64x192xf32>
    %21 = arith.truncf %20 : vector<64x192xf32> to vector<64x192xbf16>
    %c2_19 = arith.constant 2 : index
    %c0_20 = arith.constant 0 : index
    %c0_21 = arith.constant 0 : index
    %22 = vector.load %arg2[%c2_19, %c0_20, %c0_21] : memref<4x192x256xbf16, #tpu.memory_space<vmem>>, vector<1x192x256xbf16>
    %23 = vector.shape_cast %22 : vector<1x192x256xbf16> to vector<192x256xbf16>
    %cst_22 = arith.constant dense<0.000000e+00> : vector<64x256xf32>
    %24 = tpu.matmul %21, %23, %cst_22 {dimension_numbers = #tpu.dot_dimension_numbers<[1], [0], [0], [1], [0, 0, 1, 1], [], []>} : vector<64x192xbf16>, vector<192x256xbf16>, vector<64x256xf32> -> vector<64x256xf32>
    %25 = arith.addf %17, %24 : vector<64x256xf32>
    %c3 = arith.constant 3 : index
    %c0_23 = arith.constant 0 : index
    %c0_24 = arith.constant 0 : index
    %26 = vector.load %arg1[%c3, %c0_23, %c0_24] : memref<4x64x128xf32, #tpu.memory_space<vmem>>, vector<1x64x128xf32>
    %27 = vector.shape_cast %26 : vector<1x64x128xf32> to vector<64x128xf32>
    %cst_25 = arith.constant dense<0.000000e+00> : vector<64x192xf32>
    %28 = tpu.matmul %27, %0, %cst_25 {dimension_numbers = #tpu.dot_dimension_numbers<[1], [0], [0], [1], [0, 0, 1, 1], [], []>} : vector<64x128xf32>, vector<128x192xf32>, vector<64x192xf32> -> vector<64x192xf32>
    %29 = arith.truncf %28 : vector<64x192xf32> to vector<64x192xbf16>
    %c3_26 = arith.constant 3 : index
    %c0_27 = arith.constant 0 : index
    %c0_28 = arith.constant 0 : index
    %30 = vector.load %arg2[%c3_26, %c0_27, %c0_28] : memref<4x192x256xbf16, #tpu.memory_space<vmem>>, vector<1x192x256xbf16>
    %31 = vector.shape_cast %30 : vector<1x192x256xbf16> to vector<192x256xbf16>
    %cst_29 = arith.constant dense<0.000000e+00> : vector<64x256xf32>
    %32 = tpu.matmul %29, %31, %cst_29 {dimension_numbers = #tpu.dot_dimension_numbers<[1], [0], [0], [1], [0, 0, 1, 1], [], []>} : vector<64x192xbf16>, vector<192x256xbf16>, vector<64x256xf32> -> vector<64x256xf32>
    %33 = arith.addf %25, %32 : vector<64x256xf32>
    %cst_30 = arith.constant 0.000000e+00 : f32
    %34 = vector.broadcast %cst_30 : f32 to vector<64x256xf32>
    %35 = arith.cmpf oge, %33, %34 : vector<64x256xf32>
    %cst_31 = arith.constant 2.000000e-01 : f32
    %36 = vector.broadcast %cst_31 : f32 to vector<64x256xf32>
    %37 = arith.mulf %36, %33 : vector<64x256xf32>
    %38 = arith.select %35, %33, %37 : vector<64x256xi1>, vector<64x256xf32>
    %cst_32 = arith.constant 0.000000e+00 : f32
    %39 = vector.broadcast %cst_32 : f32 to vector<32x256xf32>
    %c0_33 = arith.constant 0 : index
    %c0_34 = arith.constant 0 : index
    %c0_35 = arith.constant 0 : index
    %40 = vector.load %arg3[%c0_33, %c0_34, %c0_35] : memref<4x32x64xf32, #tpu.memory_space<vmem>>, vector<1x32x64xf32>
    %41 = vector.shape_cast %40 : vector<1x32x64xf32> to vector<32x64xf32>
    %cst_36 = arith.constant dense<0.000000e+00> : vector<32x256xf32>
    %42 = tpu.matmul %41, %38, %cst_36 {dimension_numbers = #tpu.dot_dimension_numbers<[1], [0], [0], [1], [0, 0, 1, 1], [], []>} : vector<32x64xf32>, vector<64x256xf32>, vector<32x256xf32> -> vector<32x256xf32>
    %43 = arith.truncf %42 : vector<32x256xf32> to vector<32x256xbf16>
    %c0_37 = arith.constant 0 : index
    %c0_38 = arith.constant 0 : index
    %c0_39 = arith.constant 0 : index
    %44 = vector.load %arg4[%c0_37, %c0_38, %c0_39] : memref<4x256x256xbf16, #tpu.memory_space<vmem>>, vector<1x256x256xbf16>
    %45 = vector.shape_cast %44 : vector<1x256x256xbf16> to vector<256x256xbf16>
    %cst_40 = arith.constant dense<0.000000e+00> : vector<32x256xf32>
    %46 = tpu.matmul %43, %45, %cst_40 {dimension_numbers = #tpu.dot_dimension_numbers<[1], [0], [0], [1], [0, 0, 1, 1], [], []>} : vector<32x256xbf16>, vector<256x256xbf16>, vector<32x256xf32> -> vector<32x256xf32>
    %47 = arith.addf %39, %46 : vector<32x256xf32>
    %c1_41 = arith.constant 1 : index
    %c0_42 = arith.constant 0 : index
    %c0_43 = arith.constant 0 : index
    %48 = vector.load %arg3[%c1_41, %c0_42, %c0_43] : memref<4x32x64xf32, #tpu.memory_space<vmem>>, vector<1x32x64xf32>
    %49 = vector.shape_cast %48 : vector<1x32x64xf32> to vector<32x64xf32>
    %cst_44 = arith.constant dense<0.000000e+00> : vector<32x256xf32>
    %50 = tpu.matmul %49, %38, %cst_44 {dimension_numbers = #tpu.dot_dimension_numbers<[1], [0], [0], [1], [0, 0, 1, 1], [], []>} : vector<32x64xf32>, vector<64x256xf32>, vector<32x256xf32> -> vector<32x256xf32>
    %51 = arith.truncf %50 : vector<32x256xf32> to vector<32x256xbf16>
    %c1_45 = arith.constant 1 : index
    %c0_46 = arith.constant 0 : index
    %c0_47 = arith.constant 0 : index
    %52 = vector.load %arg4[%c1_45, %c0_46, %c0_47] : memref<4x256x256xbf16, #tpu.memory_space<vmem>>, vector<1x256x256xbf16>
    %53 = vector.shape_cast %52 : vector<1x256x256xbf16> to vector<256x256xbf16>
    %cst_48 = arith.constant dense<0.000000e+00> : vector<32x256xf32>
    %54 = tpu.matmul %51, %53, %cst_48 {dimension_numbers = #tpu.dot_dimension_numbers<[1], [0], [0], [1], [0, 0, 1, 1], [], []>} : vector<32x256xbf16>, vector<256x256xbf16>, vector<32x256xf32> -> vector<32x256xf32>
    %55 = arith.addf %47, %54 : vector<32x256xf32>
    %c2_49 = arith.constant 2 : index
    %c0_50 = arith.constant 0 : index
    %c0_51 = arith.constant 0 : index
    %56 = vector.load %arg3[%c2_49, %c0_50, %c0_51] : memref<4x32x64xf32, #tpu.memory_space<vmem>>, vector<1x32x64xf32>
    %57 = vector.shape_cast %56 : vector<1x32x64xf32> to vector<32x64xf32>
    %cst_52 = arith.constant dense<0.000000e+00> : vector<32x256xf32>
    %58 = tpu.matmul %57, %38, %cst_52 {dimension_numbers = #tpu.dot_dimension_numbers<[1], [0], [0], [1], [0, 0, 1, 1], [], []>} : vector<32x64xf32>, vector<64x256xf32>, vector<32x256xf32> -> vector<32x256xf32>
    %59 = arith.truncf %58 : vector<32x256xf32> to vector<32x256xbf16>
    %c2_53 = arith.constant 2 : index
    %c0_54 = arith.constant 0 : index
    %c0_55 = arith.constant 0 : index
    %60 = vector.load %arg4[%c2_53, %c0_54, %c0_55] : memref<4x256x256xbf16, #tpu.memory_space<vmem>>, vector<1x256x256xbf16>
    %61 = vector.shape_cast %60 : vector<1x256x256xbf16> to vector<256x256xbf16>
    %cst_56 = arith.constant dense<0.000000e+00> : vector<32x256xf32>
    %62 = tpu.matmul %59, %61, %cst_56 {dimension_numbers = #tpu.dot_dimension_numbers<[1], [0], [0], [1], [0, 0, 1, 1], [], []>} : vector<32x256xbf16>, vector<256x256xbf16>, vector<32x256xf32> -> vector<32x256xf32>
    %63 = arith.addf %55, %62 : vector<32x256xf32>
    %c3_57 = arith.constant 3 : index
    %c0_58 = arith.constant 0 : index
    %c0_59 = arith.constant 0 : index
    %64 = vector.load %arg3[%c3_57, %c0_58, %c0_59] : memref<4x32x64xf32, #tpu.memory_space<vmem>>, vector<1x32x64xf32>
    %65 = vector.shape_cast %64 : vector<1x32x64xf32> to vector<32x64xf32>
    %cst_60 = arith.constant dense<0.000000e+00> : vector<32x256xf32>
    %66 = tpu.matmul %65, %38, %cst_60 {dimension_numbers = #tpu.dot_dimension_numbers<[1], [0], [0], [1], [0, 0, 1, 1], [], []>} : vector<32x64xf32>, vector<64x256xf32>, vector<32x256xf32> -> vector<32x256xf32>
    %67 = arith.truncf %66 : vector<32x256xf32> to vector<32x256xbf16>
    %c3_61 = arith.constant 3 : index
    %c0_62 = arith.constant 0 : index
    %c0_63 = arith.constant 0 : index
    %68 = vector.load %arg4[%c3_61, %c0_62, %c0_63] : memref<4x256x256xbf16, #tpu.memory_space<vmem>>, vector<1x256x256xbf16>
    %69 = vector.shape_cast %68 : vector<1x256x256xbf16> to vector<256x256xbf16>
    %cst_64 = arith.constant dense<0.000000e+00> : vector<32x256xf32>
    %70 = tpu.matmul %67, %69, %cst_64 {dimension_numbers = #tpu.dot_dimension_numbers<[1], [0], [0], [1], [0, 0, 1, 1], [], []>} : vector<32x256xbf16>, vector<256x256xbf16>, vector<32x256xf32> -> vector<32x256xf32>
    %71 = arith.addf %63, %70 : vector<32x256xf32>
    %cst_65 = arith.constant dense<0.000000e+00> : vector<256xf32>
    %72 = vector.multi_reduction <add>, %71, %cst_65 [0] : vector<32x256xf32> to vector<256xf32>
    %73 = vector.shape_cast %72 : vector<256xf32> to vector<1x256xf32>
    %74 = arith.mulf %71, %71 : vector<32x256xf32>
    %cst_66 = arith.constant dense<0.000000e+00> : vector<256xf32>
    %75 = vector.multi_reduction <add>, %74, %cst_66 [0] : vector<32x256xf32> to vector<256xf32>
    %76 = vector.shape_cast %75 : vector<256xf32> to vector<1x256xf32>
    %c0_67 = arith.constant 0 : index
    %c0_68 = arith.constant 0 : index
    %77 = vector.load %arg5[%c0_67, %c0_68] : memref<256x16xf32, #tpu.memory_space<vmem>>, vector<256x16xf32>
    %cst_69 = arith.constant dense<0.000000e+00> : vector<1x16xf32>
    %78 = tpu.matmul %73, %77, %cst_69 {dimension_numbers = #tpu.dot_dimension_numbers<[1], [0], [0], [1], [0, 0, 1, 1], [], []>} : vector<1x256xf32>, vector<256x16xf32>, vector<1x16xf32> -> vector<1x16xf32>
    %cst_70 = arith.constant 5.120000e+02 : f32
    %79 = vector.broadcast %cst_70 : f32 to vector<1x16xf32>
    %80 = arith.divf %78, %79 : vector<1x16xf32>
    %c0_71 = arith.constant 0 : index
    %c0_72 = arith.constant 0 : index
    %81 = vector.load %arg5[%c0_71, %c0_72] : memref<256x16xf32, #tpu.memory_space<vmem>>, vector<256x16xf32>
    %cst_73 = arith.constant dense<0.000000e+00> : vector<1x16xf32>
    %82 = tpu.matmul %76, %81, %cst_73 {dimension_numbers = #tpu.dot_dimension_numbers<[1], [0], [0], [1], [0, 0, 1, 1], [], []>} : vector<1x256xf32>, vector<256x16xf32>, vector<1x16xf32> -> vector<1x16xf32>
    %cst_74 = arith.constant 5.120000e+02 : f32
    %83 = vector.broadcast %cst_74 : f32 to vector<1x16xf32>
    %84 = arith.divf %82, %83 : vector<1x16xf32>
    %85 = arith.mulf %80, %80 : vector<1x16xf32>
    %86 = arith.subf %84, %85 : vector<1x16xf32>
    %c0_75 = arith.constant 0 : index
    %c0_76 = arith.constant 0 : index
    %87 = vector.load %arg7[%c0_75, %c0_76] : memref<1x16xf32, #tpu.memory_space<vmem>>, vector<1x16xf32>
    %cst_77 = arith.constant 9.99999974E-6 : f32
    %88 = vector.broadcast %cst_77 : f32 to vector<1x16xf32>
    %89 = arith.addf %86, %88 : vector<1x16xf32>
    %90 = math.rsqrt %89 : vector<1x16xf32>
    %91 = arith.mulf %87, %90 : vector<1x16xf32>
    %c0_78 = arith.constant 0 : index
    %c0_79 = arith.constant 0 : index
    %92 = vector.load %arg8[%c0_78, %c0_79] : memref<1x16xf32, #tpu.memory_space<vmem>>, vector<1x16xf32>
    %93 = arith.mulf %80, %91 : vector<1x16xf32>
    %94 = arith.subf %92, %93 : vector<1x16xf32>
    %c0_80 = arith.constant 0 : index
    %c0_81 = arith.constant 0 : index
    %95 = vector.load %arg6[%c0_80, %c0_81] : memref<16x256xf32, #tpu.memory_space<vmem>>, vector<16x256xf32>
    %cst_82 = arith.constant dense<0.000000e+00> : vector<1x256xf32>
    %96 = tpu.matmul %91, %95, %cst_82 {dimension_numbers = #tpu.dot_dimension_numbers<[1], [0], [0], [1], [0, 0, 1, 1], [], []>} : vector<1x16xf32>, vector<16x256xf32>, vector<1x256xf32> -> vector<1x256xf32>
    %c0_83 = arith.constant 0 : index
    %c0_84 = arith.constant 0 : index
    %97 = vector.load %arg6[%c0_83, %c0_84] : memref<16x256xf32, #tpu.memory_space<vmem>>, vector<16x256xf32>
    %cst_85 = arith.constant dense<0.000000e+00> : vector<1x256xf32>
    %98 = tpu.matmul %94, %97, %cst_85 {dimension_numbers = #tpu.dot_dimension_numbers<[1], [0], [0], [1], [0, 0, 1, 1], [], []>} : vector<1x16xf32>, vector<16x256xf32>, vector<1x256xf32> -> vector<1x256xf32>
    %99 = vector.broadcast %96 : vector<1x256xf32> to vector<32x256xf32>
    %100 = arith.mulf %71, %99 : vector<32x256xf32>
    %101 = vector.broadcast %98 : vector<1x256xf32> to vector<32x256xf32>
    %102 = arith.addf %100, %101 : vector<32x256xf32>
    %cst_86 = arith.constant 0.000000e+00 : f32
    %103 = vector.broadcast %cst_86 : f32 to vector<32x256xf32>
    %104 = arith.cmpf oge, %102, %103 : vector<32x256xf32>
    %cst_87 = arith.constant 2.000000e-01 : f32
    %105 = vector.broadcast %cst_87 : f32 to vector<32x256xf32>
    %106 = arith.mulf %105, %102 : vector<32x256xf32>
    %107 = arith.select %104, %102, %106 : vector<32x256xi1>, vector<32x256xf32>
    %cst_88 = arith.constant 0.000000e+00 : f32
    %108 = vector.broadcast %cst_88 : f32 to vector<16x256xf32>
    %c0_89 = arith.constant 0 : index
    %c0_90 = arith.constant 0 : index
    %c0_91 = arith.constant 0 : index
    %109 = vector.load %arg9[%c0_89, %c0_90, %c0_91] : memref<4x16x32xf32, #tpu.memory_space<vmem>>, vector<1x16x32xf32>
    %110 = vector.shape_cast %109 : vector<1x16x32xf32> to vector<16x32xf32>
    %cst_92 = arith.constant dense<0.000000e+00> : vector<16x256xf32>
    %111 = tpu.matmul %110, %107, %cst_92 {dimension_numbers = #tpu.dot_dimension_numbers<[1], [0], [0], [1], [0, 0, 1, 1], [], []>} : vector<16x32xf32>, vector<32x256xf32>, vector<16x256xf32> -> vector<16x256xf32>
    %112 = arith.truncf %111 : vector<16x256xf32> to vector<16x256xbf16>
    %c0_93 = arith.constant 0 : index
    %c0_94 = arith.constant 0 : index
    %c0_95 = arith.constant 0 : index
    %113 = vector.load %arg10[%c0_93, %c0_94, %c0_95] : memref<4x256x256xbf16, #tpu.memory_space<vmem>>, vector<1x256x256xbf16>
    %114 = vector.shape_cast %113 : vector<1x256x256xbf16> to vector<256x256xbf16>
    %cst_96 = arith.constant dense<0.000000e+00> : vector<16x256xf32>
    %115 = tpu.matmul %112, %114, %cst_96 {dimension_numbers = #tpu.dot_dimension_numbers<[1], [0], [0], [1], [0, 0, 1, 1], [], []>} : vector<16x256xbf16>, vector<256x256xbf16>, vector<16x256xf32> -> vector<16x256xf32>
    %116 = arith.addf %108, %115 : vector<16x256xf32>
    %c1_97 = arith.constant 1 : index
    %c0_98 = arith.constant 0 : index
    %c0_99 = arith.constant 0 : index
    %117 = vector.load %arg9[%c1_97, %c0_98, %c0_99] : memref<4x16x32xf32, #tpu.memory_space<vmem>>, vector<1x16x32xf32>
    %118 = vector.shape_cast %117 : vector<1x16x32xf32> to vector<16x32xf32>
    %cst_100 = arith.constant dense<0.000000e+00> : vector<16x256xf32>
    %119 = tpu.matmul %118, %107, %cst_100 {dimension_numbers = #tpu.dot_dimension_numbers<[1], [0], [0], [1], [0, 0, 1, 1], [], []>} : vector<16x32xf32>, vector<32x256xf32>, vector<16x256xf32> -> vector<16x256xf32>
    %120 = arith.truncf %119 : vector<16x256xf32> to vector<16x256xbf16>
    %c1_101 = arith.constant 1 : index
    %c0_102 = arith.constant 0 : index
    %c0_103 = arith.constant 0 : index
    %121 = vector.load %arg10[%c1_101, %c0_102, %c0_103] : memref<4x256x256xbf16, #tpu.memory_space<vmem>>, vector<1x256x256xbf16>
    %122 = vector.shape_cast %121 : vector<1x256x256xbf16> to vector<256x256xbf16>
    %cst_104 = arith.constant dense<0.000000e+00> : vector<16x256xf32>
    %123 = tpu.matmul %120, %122, %cst_104 {dimension_numbers = #tpu.dot_dimension_numbers<[1], [0], [0], [1], [0, 0, 1, 1], [], []>} : vector<16x256xbf16>, vector<256x256xbf16>, vector<16x256xf32> -> vector<16x256xf32>
    %124 = arith.addf %116, %123 : vector<16x256xf32>
    %c2_105 = arith.constant 2 : index
    %c0_106 = arith.constant 0 : index
    %c0_107 = arith.constant 0 : index
    %125 = vector.load %arg9[%c2_105, %c0_106, %c0_107] : memref<4x16x32xf32, #tpu.memory_space<vmem>>, vector<1x16x32xf32>
    %126 = vector.shape_cast %125 : vector<1x16x32xf32> to vector<16x32xf32>
    %cst_108 = arith.constant dense<0.000000e+00> : vector<16x256xf32>
    %127 = tpu.matmul %126, %107, %cst_108 {dimension_numbers = #tpu.dot_dimension_numbers<[1], [0], [0], [1], [0, 0, 1, 1], [], []>} : vector<16x32xf32>, vector<32x256xf32>, vector<16x256xf32> -> vector<16x256xf32>
    %128 = arith.truncf %127 : vector<16x256xf32> to vector<16x256xbf16>
    %c2_109 = arith.constant 2 : index
    %c0_110 = arith.constant 0 : index
    %c0_111 = arith.constant 0 : index
    %129 = vector.load %arg10[%c2_109, %c0_110, %c0_111] : memref<4x256x256xbf16, #tpu.memory_space<vmem>>, vector<1x256x256xbf16>
    %130 = vector.shape_cast %129 : vector<1x256x256xbf16> to vector<256x256xbf16>
    %cst_112 = arith.constant dense<0.000000e+00> : vector<16x256xf32>
    %131 = tpu.matmul %128, %130, %cst_112 {dimension_numbers = #tpu.dot_dimension_numbers<[1], [0], [0], [1], [0, 0, 1, 1], [], []>} : vector<16x256xbf16>, vector<256x256xbf16>, vector<16x256xf32> -> vector<16x256xf32>
    %132 = arith.addf %124, %131 : vector<16x256xf32>
    %c3_113 = arith.constant 3 : index
    %c0_114 = arith.constant 0 : index
    %c0_115 = arith.constant 0 : index
    %133 = vector.load %arg9[%c3_113, %c0_114, %c0_115] : memref<4x16x32xf32, #tpu.memory_space<vmem>>, vector<1x16x32xf32>
    %134 = vector.shape_cast %133 : vector<1x16x32xf32> to vector<16x32xf32>
    %cst_116 = arith.constant dense<0.000000e+00> : vector<16x256xf32>
    %135 = tpu.matmul %134, %107, %cst_116 {dimension_numbers = #tpu.dot_dimension_numbers<[1], [0], [0], [1], [0, 0, 1, 1], [], []>} : vector<16x32xf32>, vector<32x256xf32>, vector<16x256xf32> -> vector<16x256xf32>
    %136 = arith.truncf %135 : vector<16x256xf32> to vector<16x256xbf16>
    %c3_117 = arith.constant 3 : index
    %c0_118 = arith.constant 0 : index
    %c0_119 = arith.constant 0 : index
    %137 = vector.load %arg10[%c3_117, %c0_118, %c0_119] : memref<4x256x256xbf16, #tpu.memory_space<vmem>>, vector<1x256x256xbf16>
    %138 = vector.shape_cast %137 : vector<1x256x256xbf16> to vector<256x256xbf16>
    %cst_120 = arith.constant dense<0.000000e+00> : vector<16x256xf32>
    %139 = tpu.matmul %136, %138, %cst_120 {dimension_numbers = #tpu.dot_dimension_numbers<[1], [0], [0], [1], [0, 0, 1, 1], [], []>} : vector<16x256xbf16>, vector<256x256xbf16>, vector<16x256xf32> -> vector<16x256xf32>
    %140 = arith.addf %132, %139 : vector<16x256xf32>
    %cst_121 = arith.constant dense<0.000000e+00> : vector<256xf32>
    %141 = vector.multi_reduction <add>, %140, %cst_121 [0] : vector<16x256xf32> to vector<256xf32>
    %142 = vector.shape_cast %141 : vector<256xf32> to vector<1x256xf32>
    %143 = arith.mulf %140, %140 : vector<16x256xf32>
    %cst_122 = arith.constant dense<0.000000e+00> : vector<256xf32>
    %144 = vector.multi_reduction <add>, %143, %cst_122 [0] : vector<16x256xf32> to vector<256xf32>
    %145 = vector.shape_cast %144 : vector<256xf32> to vector<1x256xf32>
    %c0_123 = arith.constant 0 : index
    %c0_124 = arith.constant 0 : index
    %146 = vector.load %arg11[%c0_123, %c0_124] : memref<256x32xf32, #tpu.memory_space<vmem>>, vector<256x32xf32>
    %cst_125 = arith.constant dense<0.000000e+00> : vector<1x32xf32>
    %147 = tpu.matmul %142, %146, %cst_125 {dimension_numbers = #tpu.dot_dimension_numbers<[1], [0], [0], [1], [0, 0, 1, 1], [], []>} : vector<1x256xf32>, vector<256x32xf32>, vector<1x32xf32> -> vector<1x32xf32>
    %cst_126 = arith.constant 1.280000e+02 : f32
    %148 = vector.broadcast %cst_126 : f32 to vector<1x32xf32>
    %149 = arith.divf %147, %148 : vector<1x32xf32>
    %c0_127 = arith.constant 0 : index
    %c0_128 = arith.constant 0 : index
    %150 = vector.load %arg11[%c0_127, %c0_128] : memref<256x32xf32, #tpu.memory_space<vmem>>, vector<256x32xf32>
    %cst_129 = arith.constant dense<0.000000e+00> : vector<1x32xf32>
    %151 = tpu.matmul %145, %150, %cst_129 {dimension_numbers = #tpu.dot_dimension_numbers<[1], [0], [0], [1], [0, 0, 1, 1], [], []>} : vector<1x256xf32>, vector<256x32xf32>, vector<1x32xf32> -> vector<1x32xf32>
    %cst_130 = arith.constant 1.280000e+02 : f32
    %152 = vector.broadcast %cst_130 : f32 to vector<1x32xf32>
    %153 = arith.divf %151, %152 : vector<1x32xf32>
    %154 = arith.mulf %149, %149 : vector<1x32xf32>
    %155 = arith.subf %153, %154 : vector<1x32xf32>
    %c0_131 = arith.constant 0 : index
    %c0_132 = arith.constant 0 : index
    %156 = vector.load %arg13[%c0_131, %c0_132] : memref<1x32xf32, #tpu.memory_space<vmem>>, vector<1x32xf32>
    %cst_133 = arith.constant 9.99999974E-6 : f32
    %157 = vector.broadcast %cst_133 : f32 to vector<1x32xf32>
    %158 = arith.addf %155, %157 : vector<1x32xf32>
    %159 = math.rsqrt %158 : vector<1x32xf32>
    %160 = arith.mulf %156, %159 : vector<1x32xf32>
    %c0_134 = arith.constant 0 : index
    %c0_135 = arith.constant 0 : index
    %161 = vector.load %arg14[%c0_134, %c0_135] : memref<1x32xf32, #tpu.memory_space<vmem>>, vector<1x32xf32>
    %162 = arith.mulf %149, %160 : vector<1x32xf32>
    %163 = arith.subf %161, %162 : vector<1x32xf32>
    %c0_136 = arith.constant 0 : index
    %c0_137 = arith.constant 0 : index
    %164 = vector.load %arg12[%c0_136, %c0_137] : memref<32x256xf32, #tpu.memory_space<vmem>>, vector<32x256xf32>
    %cst_138 = arith.constant dense<0.000000e+00> : vector<1x256xf32>
    %165 = tpu.matmul %160, %164, %cst_138 {dimension_numbers = #tpu.dot_dimension_numbers<[1], [0], [0], [1], [0, 0, 1, 1], [], []>} : vector<1x32xf32>, vector<32x256xf32>, vector<1x256xf32> -> vector<1x256xf32>
    %c0_139 = arith.constant 0 : index
    %c0_140 = arith.constant 0 : index
    %166 = vector.load %arg12[%c0_139, %c0_140] : memref<32x256xf32, #tpu.memory_space<vmem>>, vector<32x256xf32>
    %cst_141 = arith.constant dense<0.000000e+00> : vector<1x256xf32>
    %167 = tpu.matmul %163, %166, %cst_141 {dimension_numbers = #tpu.dot_dimension_numbers<[1], [0], [0], [1], [0, 0, 1, 1], [], []>} : vector<1x32xf32>, vector<32x256xf32>, vector<1x256xf32> -> vector<1x256xf32>
    %168 = vector.broadcast %165 : vector<1x256xf32> to vector<16x256xf32>
    %169 = arith.mulf %140, %168 : vector<16x256xf32>
    %170 = vector.broadcast %167 : vector<1x256xf32> to vector<16x256xf32>
    %171 = arith.addf %169, %170 : vector<16x256xf32>
    %cst_142 = arith.constant 0.000000e+00 : f32
    %172 = vector.broadcast %cst_142 : f32 to vector<16x256xf32>
    %173 = arith.cmpf oge, %171, %172 : vector<16x256xf32>
    %cst_143 = arith.constant 2.000000e-01 : f32
    %174 = vector.broadcast %cst_143 : f32 to vector<16x256xf32>
    %175 = arith.mulf %174, %171 : vector<16x256xf32>
    %176 = arith.select %173, %171, %175 : vector<16x256xi1>, vector<16x256xf32>
    %cst_144 = arith.constant 0.000000e+00 : f32
    %177 = vector.broadcast %cst_144 : f32 to vector<8x256xf32>
    %c0_145 = arith.constant 0 : index
    %c0_146 = arith.constant 0 : index
    %c0_147 = arith.constant 0 : index
    %178 = vector.load %arg15[%c0_145, %c0_146, %c0_147] : memref<4x8x16xf32, #tpu.memory_space<vmem>>, vector<1x8x16xf32>
    %179 = vector.shape_cast %178 : vector<1x8x16xf32> to vector<8x16xf32>
    %cst_148 = arith.constant dense<0.000000e+00> : vector<8x256xf32>
    %180 = tpu.matmul %179, %176, %cst_148 {dimension_numbers = #tpu.dot_dimension_numbers<[1], [0], [0], [1], [0, 0, 1, 1], [], []>} : vector<8x16xf32>, vector<16x256xf32>, vector<8x256xf32> -> vector<8x256xf32>
    %181 = arith.truncf %180 : vector<8x256xf32> to vector<8x256xbf16>
    %c0_149 = arith.constant 0 : index
    %c0_150 = arith.constant 0 : index
    %c0_151 = arith.constant 0 : index
    %182 = vector.load %arg16[%c0_149, %c0_150, %c0_151] : memref<4x256x256xbf16, #tpu.memory_space<vmem>>, vector<1x256x256xbf16>
    %183 = vector.shape_cast %182 : vector<1x256x256xbf16> to vector<256x256xbf16>
    %cst_152 = arith.constant dense<0.000000e+00> : vector<8x256xf32>
    %184 = tpu.matmul %181, %183, %cst_152 {dimension_numbers = #tpu.dot_dimension_numbers<[1], [0], [0], [1], [0, 0, 1, 1], [], []>} : vector<8x256xbf16>, vector<256x256xbf16>, vector<8x256xf32> -> vector<8x256xf32>
    %185 = arith.addf %177, %184 : vector<8x256xf32>
    %c1_153 = arith.constant 1 : index
    %c0_154 = arith.constant 0 : index
    %c0_155 = arith.constant 0 : index
    %186 = vector.load %arg15[%c1_153, %c0_154, %c0_155] : memref<4x8x16xf32, #tpu.memory_space<vmem>>, vector<1x8x16xf32>
    %187 = vector.shape_cast %186 : vector<1x8x16xf32> to vector<8x16xf32>
    %cst_156 = arith.constant dense<0.000000e+00> : vector<8x256xf32>
    %188 = tpu.matmul %187, %176, %cst_156 {dimension_numbers = #tpu.dot_dimension_numbers<[1], [0], [0], [1], [0, 0, 1, 1], [], []>} : vector<8x16xf32>, vector<16x256xf32>, vector<8x256xf32> -> vector<8x256xf32>
    %189 = arith.truncf %188 : vector<8x256xf32> to vector<8x256xbf16>
    %c1_157 = arith.constant 1 : index
    %c0_158 = arith.constant 0 : index
    %c0_159 = arith.constant 0 : index
    %190 = vector.load %arg16[%c1_157, %c0_158, %c0_159] : memref<4x256x256xbf16, #tpu.memory_space<vmem>>, vector<1x256x256xbf16>
    %191 = vector.shape_cast %190 : vector<1x256x256xbf16> to vector<256x256xbf16>
    %cst_160 = arith.constant dense<0.000000e+00> : vector<8x256xf32>
    %192 = tpu.matmul %189, %191, %cst_160 {dimension_numbers = #tpu.dot_dimension_numbers<[1], [0], [0], [1], [0, 0, 1, 1], [], []>} : vector<8x256xbf16>, vector<256x256xbf16>, vector<8x256xf32> -> vector<8x256xf32>
    %193 = arith.addf %185, %192 : vector<8x256xf32>
    %c2_161 = arith.constant 2 : index
    %c0_162 = arith.constant 0 : index
    %c0_163 = arith.constant 0 : index
    %194 = vector.load %arg15[%c2_161, %c0_162, %c0_163] : memref<4x8x16xf32, #tpu.memory_space<vmem>>, vector<1x8x16xf32>
    %195 = vector.shape_cast %194 : vector<1x8x16xf32> to vector<8x16xf32>
    %cst_164 = arith.constant dense<0.000000e+00> : vector<8x256xf32>
    %196 = tpu.matmul %195, %176, %cst_164 {dimension_numbers = #tpu.dot_dimension_numbers<[1], [0], [0], [1], [0, 0, 1, 1], [], []>} : vector<8x16xf32>, vector<16x256xf32>, vector<8x256xf32> -> vector<8x256xf32>
    %197 = arith.truncf %196 : vector<8x256xf32> to vector<8x256xbf16>
    %c2_165 = arith.constant 2 : index
    %c0_166 = arith.constant 0 : index
    %c0_167 = arith.constant 0 : index
    %198 = vector.load %arg16[%c2_165, %c0_166, %c0_167] : memref<4x256x256xbf16, #tpu.memory_space<vmem>>, vector<1x256x256xbf16>
    %199 = vector.shape_cast %198 : vector<1x256x256xbf16> to vector<256x256xbf16>
    %cst_168 = arith.constant dense<0.000000e+00> : vector<8x256xf32>
    %200 = tpu.matmul %197, %199, %cst_168 {dimension_numbers = #tpu.dot_dimension_numbers<[1], [0], [0], [1], [0, 0, 1, 1], [], []>} : vector<8x256xbf16>, vector<256x256xbf16>, vector<8x256xf32> -> vector<8x256xf32>
    %201 = arith.addf %193, %200 : vector<8x256xf32>
    %c3_169 = arith.constant 3 : index
    %c0_170 = arith.constant 0 : index
    %c0_171 = arith.constant 0 : index
    %202 = vector.load %arg15[%c3_169, %c0_170, %c0_171] : memref<4x8x16xf32, #tpu.memory_space<vmem>>, vector<1x8x16xf32>
    %203 = vector.shape_cast %202 : vector<1x8x16xf32> to vector<8x16xf32>
    %cst_172 = arith.constant dense<0.000000e+00> : vector<8x256xf32>
    %204 = tpu.matmul %203, %176, %cst_172 {dimension_numbers = #tpu.dot_dimension_numbers<[1], [0], [0], [1], [0, 0, 1, 1], [], []>} : vector<8x16xf32>, vector<16x256xf32>, vector<8x256xf32> -> vector<8x256xf32>
    %205 = arith.truncf %204 : vector<8x256xf32> to vector<8x256xbf16>
    %c3_173 = arith.constant 3 : index
    %c0_174 = arith.constant 0 : index
    %c0_175 = arith.constant 0 : index
    %206 = vector.load %arg16[%c3_173, %c0_174, %c0_175] : memref<4x256x256xbf16, #tpu.memory_space<vmem>>, vector<1x256x256xbf16>
    %207 = vector.shape_cast %206 : vector<1x256x256xbf16> to vector<256x256xbf16>
    %cst_176 = arith.constant dense<0.000000e+00> : vector<8x256xf32>
    %208 = tpu.matmul %205, %207, %cst_176 {dimension_numbers = #tpu.dot_dimension_numbers<[1], [0], [0], [1], [0, 0, 1, 1], [], []>} : vector<8x256xbf16>, vector<256x256xbf16>, vector<8x256xf32> -> vector<8x256xf32>
    %209 = arith.addf %201, %208 : vector<8x256xf32>
    %cst_177 = arith.constant dense<0.000000e+00> : vector<256xf32>
    %210 = vector.multi_reduction <add>, %209, %cst_177 [0] : vector<8x256xf32> to vector<256xf32>
    %211 = vector.shape_cast %210 : vector<256xf32> to vector<1x256xf32>
    %212 = arith.mulf %209, %209 : vector<8x256xf32>
    %cst_178 = arith.constant dense<0.000000e+00> : vector<256xf32>
    %213 = vector.multi_reduction <add>, %212, %cst_178 [0] : vector<8x256xf32> to vector<256xf32>
    %214 = vector.shape_cast %213 : vector<256xf32> to vector<1x256xf32>
    %c0_179 = arith.constant 0 : index
    %c0_180 = arith.constant 0 : index
    %215 = vector.load %arg17[%c0_179, %c0_180] : memref<256x64xf32, #tpu.memory_space<vmem>>, vector<256x64xf32>
    %cst_181 = arith.constant dense<0.000000e+00> : vector<1x64xf32>
    %216 = tpu.matmul %211, %215, %cst_181 {dimension_numbers = #tpu.dot_dimension_numbers<[1], [0], [0], [1], [0, 0, 1, 1], [], []>} : vector<1x256xf32>, vector<256x64xf32>, vector<1x64xf32> -> vector<1x64xf32>
    %cst_182 = arith.constant 3.200000e+01 : f32
    %217 = vector.broadcast %cst_182 : f32 to vector<1x64xf32>
    %218 = arith.divf %216, %217 : vector<1x64xf32>
    %c0_183 = arith.constant 0 : index
    %c0_184 = arith.constant 0 : index
    %219 = vector.load %arg17[%c0_183, %c0_184] : memref<256x64xf32, #tpu.memory_space<vmem>>, vector<256x64xf32>
    %cst_185 = arith.constant dense<0.000000e+00> : vector<1x64xf32>
    %220 = tpu.matmul %214, %219, %cst_185 {dimension_numbers = #tpu.dot_dimension_numbers<[1], [0], [0], [1], [0, 0, 1, 1], [], []>} : vector<1x256xf32>, vector<256x64xf32>, vector<1x64xf32> -> vector<1x64xf32>
    %cst_186 = arith.constant 3.200000e+01 : f32
    %221 = vector.broadcast %cst_186 : f32 to vector<1x64xf32>
    %222 = arith.divf %220, %221 : vector<1x64xf32>
    %223 = arith.mulf %218, %218 : vector<1x64xf32>
    %224 = arith.subf %222, %223 : vector<1x64xf32>
    %c0_187 = arith.constant 0 : index
    %c0_188 = arith.constant 0 : index
    %225 = vector.load %arg19[%c0_187, %c0_188] : memref<1x64xf32, #tpu.memory_space<vmem>>, vector<1x64xf32>
    %cst_189 = arith.constant 9.99999974E-6 : f32
    %226 = vector.broadcast %cst_189 : f32 to vector<1x64xf32>
    %227 = arith.addf %224, %226 : vector<1x64xf32>
    %228 = math.rsqrt %227 : vector<1x64xf32>
    %229 = arith.mulf %225, %228 : vector<1x64xf32>
    %c0_190 = arith.constant 0 : index
    %c0_191 = arith.constant 0 : index
    %230 = vector.load %arg20[%c0_190, %c0_191] : memref<1x64xf32, #tpu.memory_space<vmem>>, vector<1x64xf32>
    %231 = arith.mulf %218, %229 : vector<1x64xf32>
    %232 = arith.subf %230, %231 : vector<1x64xf32>
    %c0_192 = arith.constant 0 : index
    %c0_193 = arith.constant 0 : index
    %233 = vector.load %arg18[%c0_192, %c0_193] : memref<64x256xf32, #tpu.memory_space<vmem>>, vector<64x256xf32>
    %cst_194 = arith.constant dense<0.000000e+00> : vector<1x256xf32>
    %234 = tpu.matmul %229, %233, %cst_194 {dimension_numbers = #tpu.dot_dimension_numbers<[1], [0], [0], [1], [0, 0, 1, 1], [], []>} : vector<1x64xf32>, vector<64x256xf32>, vector<1x256xf32> -> vector<1x256xf32>
    %c0_195 = arith.constant 0 : index
    %c0_196 = arith.constant 0 : index
    %235 = vector.load %arg18[%c0_195, %c0_196] : memref<64x256xf32, #tpu.memory_space<vmem>>, vector<64x256xf32>
    %cst_197 = arith.constant dense<0.000000e+00> : vector<1x256xf32>
    %236 = tpu.matmul %232, %235, %cst_197 {dimension_numbers = #tpu.dot_dimension_numbers<[1], [0], [0], [1], [0, 0, 1, 1], [], []>} : vector<1x64xf32>, vector<64x256xf32>, vector<1x256xf32> -> vector<1x256xf32>
    %237 = vector.broadcast %234 : vector<1x256xf32> to vector<8x256xf32>
    %238 = arith.mulf %209, %237 : vector<8x256xf32>
    %239 = vector.broadcast %236 : vector<1x256xf32> to vector<8x256xf32>
    %240 = arith.addf %238, %239 : vector<8x256xf32>
    %cst_198 = arith.constant 0.000000e+00 : f32
    %241 = vector.broadcast %cst_198 : f32 to vector<8x256xf32>
    %242 = arith.cmpf oge, %240, %241 : vector<8x256xf32>
    %cst_199 = arith.constant 2.000000e-01 : f32
    %243 = vector.broadcast %cst_199 : f32 to vector<8x256xf32>
    %244 = arith.mulf %243, %240 : vector<8x256xf32>
    %245 = arith.select %242, %240, %244 : vector<8x256xi1>, vector<8x256xf32>
    %cst_200 = arith.constant 0.000000e+00 : f32
    %246 = vector.broadcast %cst_200 : f32 to vector<2x1xf32>
    %c0_201 = arith.constant 0 : index
    %c0_202 = arith.constant 0 : index
    %c0_203 = arith.constant 0 : index
    %247 = vector.load %arg21[%c0_201, %c0_202, %c0_203] : memref<4x2x8xf32, #tpu.memory_space<vmem>>, vector<1x2x8xf32>
    %248 = vector.shape_cast %247 : vector<1x2x8xf32> to vector<2x8xf32>
    %cst_204 = arith.constant dense<0.000000e+00> : vector<2x256xf32>
    %249 = tpu.matmul %248, %245, %cst_204 {dimension_numbers = #tpu.dot_dimension_numbers<[1], [0], [0], [1], [0, 0, 1, 1], [], []>} : vector<2x8xf32>, vector<8x256xf32>, vector<2x256xf32> -> vector<2x256xf32>
    %250 = arith.truncf %249 : vector<2x256xf32> to vector<2x256xbf16>
    %c0_205 = arith.constant 0 : index
    %c0_206 = arith.constant 0 : index
    %c0_207 = arith.constant 0 : index
    %251 = vector.load %arg22[%c0_205, %c0_206, %c0_207] : memref<4x256x1xbf16, #tpu.memory_space<vmem>>, vector<1x256x1xbf16>
    %252 = vector.shape_cast %251 : vector<1x256x1xbf16> to vector<256x1xbf16>
    %cst_208 = arith.constant dense<0.000000e+00> : vector<2x1xf32>
    %253 = tpu.matmul %250, %252, %cst_208 {dimension_numbers = #tpu.dot_dimension_numbers<[1], [0], [0], [1], [0, 0, 1, 1], [], []>} : vector<2x256xbf16>, vector<256x1xbf16>, vector<2x1xf32> -> vector<2x1xf32>
    %254 = arith.addf %246, %253 : vector<2x1xf32>
    %c1_209 = arith.constant 1 : index
    %c0_210 = arith.constant 0 : index
    %c0_211 = arith.constant 0 : index
    %255 = vector.load %arg21[%c1_209, %c0_210, %c0_211] : memref<4x2x8xf32, #tpu.memory_space<vmem>>, vector<1x2x8xf32>
    %256 = vector.shape_cast %255 : vector<1x2x8xf32> to vector<2x8xf32>
    %cst_212 = arith.constant dense<0.000000e+00> : vector<2x256xf32>
    %257 = tpu.matmul %256, %245, %cst_212 {dimension_numbers = #tpu.dot_dimension_numbers<[1], [0], [0], [1], [0, 0, 1, 1], [], []>} : vector<2x8xf32>, vector<8x256xf32>, vector<2x256xf32> -> vector<2x256xf32>
    %258 = arith.truncf %257 : vector<2x256xf32> to vector<2x256xbf16>
    %c1_213 = arith.constant 1 : index
    %c0_214 = arith.constant 0 : index
    %c0_215 = arith.constant 0 : index
    %259 = vector.load %arg22[%c1_213, %c0_214, %c0_215] : memref<4x256x1xbf16, #tpu.memory_space<vmem>>, vector<1x256x1xbf16>
    %260 = vector.shape_cast %259 : vector<1x256x1xbf16> to vector<256x1xbf16>
    %cst_216 = arith.constant dense<0.000000e+00> : vector<2x1xf32>
    %261 = tpu.matmul %258, %260, %cst_216 {dimension_numbers = #tpu.dot_dimension_numbers<[1], [0], [0], [1], [0, 0, 1, 1], [], []>} : vector<2x256xbf16>, vector<256x1xbf16>, vector<2x1xf32> -> vector<2x1xf32>
    %262 = arith.addf %254, %261 : vector<2x1xf32>
    %c2_217 = arith.constant 2 : index
    %c0_218 = arith.constant 0 : index
    %c0_219 = arith.constant 0 : index
    %263 = vector.load %arg21[%c2_217, %c0_218, %c0_219] : memref<4x2x8xf32, #tpu.memory_space<vmem>>, vector<1x2x8xf32>
    %264 = vector.shape_cast %263 : vector<1x2x8xf32> to vector<2x8xf32>
    %cst_220 = arith.constant dense<0.000000e+00> : vector<2x256xf32>
    %265 = tpu.matmul %264, %245, %cst_220 {dimension_numbers = #tpu.dot_dimension_numbers<[1], [0], [0], [1], [0, 0, 1, 1], [], []>} : vector<2x8xf32>, vector<8x256xf32>, vector<2x256xf32> -> vector<2x256xf32>
    %266 = arith.truncf %265 : vector<2x256xf32> to vector<2x256xbf16>
    %c2_221 = arith.constant 2 : index
    %c0_222 = arith.constant 0 : index
    %c0_223 = arith.constant 0 : index
    %267 = vector.load %arg22[%c2_221, %c0_222, %c0_223] : memref<4x256x1xbf16, #tpu.memory_space<vmem>>, vector<1x256x1xbf16>
    %268 = vector.shape_cast %267 : vector<1x256x1xbf16> to vector<256x1xbf16>
    %cst_224 = arith.constant dense<0.000000e+00> : vector<2x1xf32>
    %269 = tpu.matmul %266, %268, %cst_224 {dimension_numbers = #tpu.dot_dimension_numbers<[1], [0], [0], [1], [0, 0, 1, 1], [], []>} : vector<2x256xbf16>, vector<256x1xbf16>, vector<2x1xf32> -> vector<2x1xf32>
    %270 = arith.addf %262, %269 : vector<2x1xf32>
    %c3_225 = arith.constant 3 : index
    %c0_226 = arith.constant 0 : index
    %c0_227 = arith.constant 0 : index
    %271 = vector.load %arg21[%c3_225, %c0_226, %c0_227] : memref<4x2x8xf32, #tpu.memory_space<vmem>>, vector<1x2x8xf32>
    %272 = vector.shape_cast %271 : vector<1x2x8xf32> to vector<2x8xf32>
    %cst_228 = arith.constant dense<0.000000e+00> : vector<2x256xf32>
    %273 = tpu.matmul %272, %245, %cst_228 {dimension_numbers = #tpu.dot_dimension_numbers<[1], [0], [0], [1], [0, 0, 1, 1], [], []>} : vector<2x8xf32>, vector<8x256xf32>, vector<2x256xf32> -> vector<2x256xf32>
    %274 = arith.truncf %273 : vector<2x256xf32> to vector<2x256xbf16>
    %c3_229 = arith.constant 3 : index
    %c0_230 = arith.constant 0 : index
    %c0_231 = arith.constant 0 : index
    %275 = vector.load %arg22[%c3_229, %c0_230, %c0_231] : memref<4x256x1xbf16, #tpu.memory_space<vmem>>, vector<1x256x1xbf16>
    %276 = vector.shape_cast %275 : vector<1x256x1xbf16> to vector<256x1xbf16>
    %cst_232 = arith.constant dense<0.000000e+00> : vector<2x1xf32>
    %277 = tpu.matmul %274, %276, %cst_232 {dimension_numbers = #tpu.dot_dimension_numbers<[1], [0], [0], [1], [0, 0, 1, 1], [], []>} : vector<2x256xbf16>, vector<256x1xbf16>, vector<2x1xf32> -> vector<2x1xf32>
    %278 = arith.addf %270, %277 : vector<2x1xf32>
    %c0_233 = arith.constant 0 : index
    %c0_234 = arith.constant 0 : index
    %279 = vector.load %arg23[%c0_233, %c0_234] : memref<2x1xf32, #tpu.memory_space<vmem>>, vector<2x1xf32>
    tpu.vector_store %arg23[%c0_233, %c0_234], %278 {strides = array<i32>} : memref<2x1xf32, #tpu.memory_space<vmem>>, vector<2x1xf32>,
    return
  }
}

</mosaic_0001>

<bundles_post_ra>
// kernel: discriminator_forward.1
= control target key start
LH: loop header
LB: loop body
LE: loop exit
PB: predicated region body
PF: predicated region fallthrough
CT: control target
= control target key end

     0   :  { %s13815_s0 = inlined_call_operand.vmem [shape: f32[128,192], index: 0, kind: input, shape index: {}]   ;;  %s13816_s1 = inlined_call_operand.hbm [shape: f32[4,64,128], index: 1, kind: input, shape index: {}]   ;;  %s13817_s2 = inlined_call_operand.hbm [shape: bf16[4,192,256], index: 2, kind: input, shape index: {}]   ;;  %s13818_s3 = inlined_call_operand.hbm [shape: f32[4,32,64], index: 3, kind: input, shape index: {}]   ;;  %s13819_s4 = inlined_call_operand.vmem [shape: bf16[4,256,256], index: 4, kind: input, shape index: {}]   ;;  %s13820_s5 = inlined_call_operand.vmem [shape: f32[256,16], index: 5, kind: input, shape index: {}]   ;;  %s13821_s6 = inlined_call_operand.hbm [shape: f32[16,256], index: 6, kind: input, shape index: {}]   ;;  %s13822_s7 = inlined_call_operand.vmem [shape: f32[1,16], index: 7, kind: input, shape index: {}]   ;;  %s13823_s8 = inlined_call_operand.vmem [shape: f32[1,16], index: 8, kind: input, shape index: {}]   ;;  %s13824_s9 = inlined_call_operand.hbm [shape: f32[4,16,32], index: 9, kind: input, shape index: {}]   ;;  %s13825_s10 = inlined_call_operand.vmem [shape: bf16[4,256,256], index: 10, kind: input, shape index: {}]   ;;  %s13826_s11 = inlined_call_operand.vmem [shape: f32[256,32], index: 11, kind: input, shape index: {}]   ;;  %s13827_s12 = inlined_call_operand.hbm [shape: f32[32,256], index: 12, kind: input, shape index: {}]   ;;  %s13828_s13 = inlined_call_operand.hbm [shape: f32[1,32], index: 13, kind: input, shape index: {}]   ;;  %s13829_s14 = inlined_call_operand.hbm [shape: f32[1,32], index: 14, kind: input, shape index: {}]   ;;  %s13830_s15 = inlined_call_operand.hbm [shape: f32[4,8,16], index: 15, kind: input, shape index: {}]   ;;  %s13831_s16 = inlined_call_operand.vmem [shape: bf16[4,256,256], index: 16, kind: input, shape index: {}]   ;;  %s13832_s17 = inlined_call_operand.vmem [shape: f32[256,64], index: 17, kind: input, shape index: {}]   ;;  %s13833_s18 = inlined_call_operand.vmem [shape: f32[64,256], index: 18, kind: input, shape index: {}]   ;;  %s13834_s19 = inlined_call_operand.vmem [shape: f32[1,64], index: 19, kind: input, shape index: {}]   ;;  %s13835_s20 = inlined_call_operand.vmem [shape: f32[1,64], index: 20, kind: input, shape index: {}]   ;;  %s13836_s21 = inlined_call_operand.vmem [shape: f32[4,2,8], index: 21, kind: input, shape index: {}]   ;;  %s13837_s22 = inlined_call_operand.vmem [shape: bf16[4,256,1], index: 22, kind: input, shape index: {}]   ;;  %s13838_s23 = inlined_call_operand.vmem [shape: f32[2,1], index: 23, kind: output, shape index: {}]  }
   0x1   :  { %13851 = sst [smem:[#allocation21_spill]] %s13815_s0 }
   0x2   :  { %13852 = sst [smem:[#allocation22_spill]] %s13816_s1 }
   0x3   :  { %13853 = sst [smem:[#allocation23_spill]] %s13817_s2 }
   0x4   :  { %13854 = sst [smem:[#allocation24_spill]] %s13818_s3 }
   0x5   :  { %13855 = sst [smem:[#allocation25_spill]] %s13819_s4 }
   0x6   :  { %13856 = sst [smem:[#allocation26_spill]] %s13820_s5 }
   0x7   :  { %13857 = sst [smem:[#allocation27_spill]] %s13821_s6 }
   0x8   :  { %13858 = sst [smem:[#allocation28_spill]] %s13822_s7 }
   0x9   :  { %13859 = sst [smem:[#allocation29_spill]] %s13837_s22 }
   0xa   :  { %13860 = sst [smem:[#allocation30_spill]] %s13838_s23 }
   0xb   :  { %28 = vsyncpa [#allocation3], 0 }
   0xc   :  { %29 = vsyncpa [#allocation5], 0 }
   0xd   :  { %30 = vsyncpa [#allocation8], 0 }
   0xe   :  { %31 = vsyncpa [#allocation11], 0 }
   0xf   :  { %32 = vsyncpa [#allocation14], 0  ;;  %s10859_s4 = smov [#allocation4]   ;;  %s10860_s24 = smov [#allocation7]  }
  0x10   :  { %s52_s30 = sshll.u32 %s10859_s4, 4  ;;  %s80_s25 = sshll.u32 %s10860_s24, 4  ;;  %s53_s30 = int_to_ptr.vmem [resolvable:$true] %s52_s30  ;;  %s10993_s25 = int_to_ptr.vmem [resolvable:$true] %s80_s25 }
  0x11   :  { %s13861_s26 = sld [smem:[#allocation23_spill]] }
  0x17   :  { %s10651_s2 = scalar_lea.hbm %s13861_s26, 12288 }
  0x18   :  { %p10652_p0 = scmp.ne.s32.totalorder %s13861_s26, %s10651_s2  ;;  %p10655_p1 = scmp.lt.u32.totalorder %s10651_s2, %s13861_s26 }
  0x1a   :  { %p10657_p2 = pnand %p10655_p1, %p10652_p0 }
  0x1c   :  { %10660 = shalt.err (!%p10657_p2)
}
  0x1d   :  { %s10661_s29 = scalar_lea.vmem %s53_s30, 12288  ;;  %p10666_p4 = scmp.lt.s32.totalorder %s53_s30, %s53_s30 }
  0x1e   :  { %p10662_p3 = scmp.ne.s32.totalorder %s53_s30, %s10661_s29  ;;  %p10667_p5 = scmp.lt.s32.totalorder %s10661_s29, %s10661_s29 }
  0x20   :  { %p10668_p6 = por %p10667_p5, %p10666_p4 }
  0x22   :  { %p10669_p7 = pnand %p10668_p6, %p10662_p3 }
  0x24   :  { %10672 = shalt.err (!%p10669_p7)
}
  0x25   :  { %s13846_s3 = smov 128   ;;  %s13848_s0 = smov 8  }
  0x26   :  { %58 = dma.hbm_to_vmem [thread:$0]  %s13861_s26, 12288, %s53_s30, [#allocation5], %s13846_s3, %s13846_s3, %s13848_s0  }
  0x27   :  { %s13862_s2 = sld [smem:[#allocation27_spill]] }
  0x2d   :  { %s10673_s6 = scalar_lea.hbm %s13862_s2, 512 }
  0x2e   :  { %p10674_p8 = scmp.ne.s32.totalorder %s13862_s2, %s10673_s6  ;;  %p10677_p9 = scmp.lt.u32.totalorder %s10673_s6, %s13862_s2 }
  0x30   :  { %p10679_p10 = pnand %p10677_p9, %p10674_p8 }
  0x32   :  { %10682 = shalt.err (!%p10679_p10)
}
  0x33   :  { %s10683_s23 = scalar_lea.vmem %s10993_s25, 512  ;;  %p10688_p12 = scmp.lt.s32.totalorder %s10993_s25, %s10993_s25 }
  0x34   :  { %p10684_p11 = scmp.ne.s32.totalorder %s10993_s25, %s10683_s23  ;;  %p10689_p13 = scmp.lt.s32.totalorder %s10683_s23, %s10683_s23 }
  0x36   :  { %p10690_p0 = por %p10689_p13, %p10688_p12 }
  0x38   :  { %p10691_p1 = pnand %p10690_p0, %p10684_p11 }
  0x3a   :  { %10694 = shalt.err (!%p10691_p1)
}
  0x3b   :  { %s10863_s30 = smov 256   ;;  %s10864_s26 = smov 16  }
  0x3c   :  { %86 = dma.hbm_to_vmem [thread:$0]  %s13862_s2, 512, %s10993_s25, [#allocation8], %s10863_s30, %s10863_s30, %s10864_s26  }
  0x3d   :  { %s10865_s5 = smov [#allocation10]   ;;  %s10866_s6 = smov [#allocation13]  }
  0x3e   :  { %s112_s1 = sshll.u32 %s10865_s5, 4  ;;  %s135_s27 = sshll.u32 %s10866_s6, 4  ;;  %s113_s1 = int_to_ptr.vmem [resolvable:$true] %s112_s1  ;;  %s136_s27 = int_to_ptr.vmem [resolvable:$true] %s135_s27 }
  0x3f   :  { %s10695_s23 = scalar_lea.hbm %s13827_s12, 1024 }
  0x40   :  { %p10696_p2 = scmp.ne.s32.totalorder %s13827_s12, %s10695_s23  ;;  %p10699_p3 = scmp.lt.u32.totalorder %s10695_s23, %s13827_s12 }
  0x42   :  { %p10701_p4 = pnand %p10699_p3, %p10696_p2 }
  0x44   :  { %10704 = shalt.err (!%p10701_p4)
}
  0x45   :  { %s10705_s25 = scalar_lea.vmem %s113_s1, 1024  ;;  %p10710_p6 = scmp.lt.s32.totalorder %s113_s1, %s113_s1 }
  0x46   :  { %p10706_p5 = scmp.ne.s32.totalorder %s113_s1, %s10705_s25  ;;  %p10711_p7 = scmp.lt.s32.totalorder %s10705_s25, %s10705_s25 }
  0x48   :  { %p10712_p8 = por %p10711_p7, %p10710_p6 }
  0x4a   :  { %p10713_p9 = pnand %p10712_p8, %p10706_p5 }
  0x4c   :  { %10716 = shalt.err (!%p10713_p9)
}
  0x4d   :  { %118 = dma.hbm_to_vmem [thread:$0]  %s13827_s12, 1024, %s113_s1, [#allocation11], %s10863_s30, %s10863_s30, %s10864_s26  }
  0x4e   :  { %s10717_s5 = scalar_lea.hbm %s13829_s14, 16 }
  0x4f   :  { %p10718_p10 = scmp.ne.s32.totalorder %s13829_s14, %s10717_s5  ;;  %p10721_p11 = scmp.lt.u32.totalorder %s10717_s5, %s13829_s14 }
  0x51   :  { %p10723_p12 = pnand %p10721_p11, %p10718_p10 }
  0x53   :  { %10726 = shalt.err (!%p10723_p12)
}
  0x54   :  { %s10727_s28 = scalar_lea.vmem %s136_s27, 16  ;;  %s10731_s23 = scalar_lea.vmem %s136_s27, 32 }
  0x55   :  { %p10728_p13 = scmp.ne.s32.totalorder %s136_s27, %s10727_s28  ;;  %p10732_p0 = scmp.lt.s32.totalorder %s136_s27, %s136_s27 }
  0x56   :  { %p10733_p1 = scmp.lt.s32.totalorder %s10731_s23, %s10727_s28 }
  0x58   :  { %p10734_p2 = por %p10733_p1, %p10732_p0 }
  0x5a   :  { %p10735_p3 = pnand %p10734_p2, %p10728_p13 }
  0x5c   :  { %10738 = shalt.err (!%p10735_p3)
}
  0x5d   :  { %138 = dma.hbm_to_vmem [thread:$0]  %s13829_s14, 16, %s136_s27, [#allocation14]  }
  0x5e   :  { %s10867_s26 = smov [#allocation2]   ;;  %s10868_s29 = smov [#allocation6]  }
  0x5f   :  { %s40_s1 = sshll.u32 %s10867_s26, 4  ;;  %s64_s25 = sshll.u32 %s10868_s29, 4  ;;  %s41_s1 = int_to_ptr.vmem [resolvable:$true] %s40_s1  ;;  %s11051_s25 = int_to_ptr.vmem [resolvable:$true] %s64_s25 }
  0x60   :  { %s13863_s24 = sld [smem:[#allocation22_spill]] }
  0x66   :  { %s10739_s3 = scalar_lea.hbm %s13863_s24, 4096 }
  0x67   :  { %p10740_p4 = scmp.ne.s32.totalorder %s13863_s24, %s10739_s3  ;;  %p10743_p5 = scmp.lt.u32.totalorder %s10739_s3, %s13863_s24 }
  0x69   :  { %p10745_p6 = pnand %p10743_p5, %p10740_p4 }
  0x6b   :  { %10748 = shalt.err (!%p10745_p6)
}
  0x6c   :  { %s10749_s14 = scalar_lea.vmem %s41_s1, 4096  ;;  %p10754_p8 = scmp.lt.s32.totalorder %s41_s1, %s41_s1 }
  0x6d   :  { %p10750_p7 = scmp.ne.s32.totalorder %s41_s1, %s10749_s14  ;;  %p10755_p9 = scmp.lt.s32.totalorder %s10749_s14, %s10749_s14 }
  0x6f   :  { %p10756_p10 = por %p10755_p9, %p10754_p8 }
  0x71   :  { %p10757_p11 = pnand %p10756_p10, %p10750_p7 }
  0x73   :  { %10760 = shalt.err (!%p10757_p11)
}
  0x74   :  { %s13864_s27 = smov 8   ;;  %s13865_s7 = smov 128  }
  0x75   :  { %46 = dma.hbm_to_vmem [thread:$0]  %s13863_s24, 4096, %s41_s1, [#allocation3], %s13865_s7, %s13865_s7, %s13864_s27  }
  0x76   :  { %s13866_s26 = sld [smem:[#allocation24_spill]] }
  0x7c   :  { %s10761_s29 = scalar_lea.hbm %s13866_s26, 2048 }
  0x7d   :  { %p10762_p12 = scmp.ne.s32.totalorder %s13866_s26, %s10761_s29  ;;  %p10765_p13 = scmp.lt.u32.totalorder %s10761_s29, %s13866_s26 }
  0x7f   :  { %p10767_p0 = pnand %p10765_p13, %p10762_p12 }
  0x81   :  { %10770 = shalt.err (!%p10767_p0)
}
  0x82   :  { %s10771_s6 = scalar_lea.vmem %s11051_s25, 2048  ;;  %p10776_p2 = scmp.lt.s32.totalorder %s11051_s25, %s11051_s25 }
  0x83   :  { %p10772_p1 = scmp.ne.s32.totalorder %s11051_s25, %s10771_s6  ;;  %p10777_p3 = scmp.lt.s32.totalorder %s10771_s6, %s10771_s6 }
  0x85   :  { %p10778_p4 = por %p10777_p3, %p10776_p2 }
  0x87   :  { %p10779_p5 = pnand %p10778_p4, %p10772_p1 }
  0x89   :  { %10782 = shalt.err (!%p10779_p5)
}
  0x8a   :  { %70 = dma.hbm_to_vmem [thread:$0]  %s13866_s26, 2048, %s11051_s25, [#allocation5], %s13865_s7, %s13865_s7, %s13864_s27  }
  0x8b   :  { %s10869_s22 = smov [#allocation9]   ;;  %s10870_s14 = smov [#allocation12]  }
  0x8c   :  { %s96_s0 = sshll.u32 %s10869_s22, 4  ;;  %s125_s28 = sshll.u32 %s10870_s14, 4  ;;  %s97_s0 = int_to_ptr.vmem [resolvable:$true] %s96_s0  ;;  %s126_s28 = int_to_ptr.vmem [resolvable:$true] %s125_s28 }
  0x8d   :  { %s10783_s30 = scalar_lea.hbm %s13824_s9, 1024 }
  0x8e   :  { %p10784_p6 = scmp.ne.s32.totalorder %s13824_s9, %s10783_s30  ;;  %p10787_p7 = scmp.lt.u32.totalorder %s10783_s30, %s13824_s9 }
  0x90   :  { %p10789_p8 = pnand %p10787_p7, %p10784_p6 }
  0x92   :  { %10792 = shalt.err (!%p10789_p8)
}
  0x93   :  { %s10793_s25 = scalar_lea.vmem %s97_s0, 1024  ;;  %p10798_p10 = scmp.lt.s32.totalorder %s97_s0, %s97_s0 }
  0x94   :  { %p10794_p9 = scmp.ne.s32.totalorder %s97_s0, %s10793_s25  ;;  %p10799_p11 = scmp.lt.s32.totalorder %s10793_s25, %s10793_s25 }
  0x96   :  { %p10800_p12 = por %p10799_p11, %p10798_p10 }
  0x98   :  { %p10801_p13 = pnand %p10800_p12, %p10794_p9 }
  0x9a   :  { %10804 = shalt.err (!%p10801_p13)
}
  0x9b   :  { %102 = dma.hbm_to_vmem [thread:$0]  %s13824_s9, 1024, %s97_s0, [#allocation8], %s13865_s7, %s13865_s7, %s13864_s27  }
  0x9c   :  { %s10805_s24 = scalar_lea.hbm %s13828_s13, 16 }
  0x9d   :  { %p10806_p0 = scmp.ne.s32.totalorder %s13828_s13, %s10805_s24  ;;  %p10809_p1 = scmp.lt.u32.totalorder %s10805_s24, %s13828_s13 }
  0x9f   :  { %p10811_p2 = pnand %p10809_p1, %p10806_p0 }
  0xa1   :  { %10814 = shalt.err (!%p10811_p2)
}
  0xa2   :  { %s10815_s30 = scalar_lea.vmem %s126_s28, 16  ;;  %s10819_s29 = scalar_lea.vmem %s126_s28, 32 }
  0xa3   :  { %p10816_p3 = scmp.ne.s32.totalorder %s126_s28, %s10815_s30  ;;  %p10820_p4 = scmp.lt.s32.totalorder %s126_s28, %s126_s28 }
  0xa4   :  { %p10821_p5 = scmp.lt.s32.totalorder %s10819_s29, %s10815_s30 }
  0xa6   :  { %p10822_p6 = por %p10821_p5, %p10820_p4 }
  0xa8   :  { %p10823_p7 = pnand %p10822_p6, %p10816_p3 }
  0xaa   :  { %10826 = shalt.err (!%p10823_p7)
}
  0xab   :  { %128 = dma.hbm_to_vmem [thread:$0]  %s13828_s13, 16, %s126_s28, [#allocation11]  }
  0xac   :  { %s10871_s2 = smov [#allocation15]   ;;  %s10827_s26 = scalar_lea.hbm %s13830_s15, 512 }
  0xad   :  { %s144_s4 = sshll.u32 %s10871_s2, 4  ;;  %p10828_p8 = scmp.ne.s32.totalorder %s13830_s15, %s10827_s26  ;;  %s145_s4 = int_to_ptr.vmem [resolvable:$true] %s144_s4 }
  0xae   :  { %p10831_p9 = scmp.lt.u32.totalorder %s10827_s26, %s13830_s15 }
  0xb0   :  { %p10833_p10 = pnand %p10831_p9, %p10828_p8 }
  0xb2   :  { %10836 = shalt.err (!%p10833_p10)
}
  0xb3   :  { %s10837_s22 = scalar_lea.vmem %s145_s4, 512  ;;  %p10842_p12 = scmp.lt.s32.totalorder %s145_s4, %s145_s4 }
  0xb4   :  { %p10838_p11 = scmp.ne.s32.totalorder %s145_s4, %s10837_s22  ;;  %p10843_p13 = scmp.lt.s32.totalorder %s10837_s22, %s10837_s22 }
  0xb6   :  { %p10844_p0 = por %p10843_p13, %p10842_p12 }
  0xb8   :  { %p10845_p1 = pnand %p10844_p0, %p10838_p11 }
  0xba   :  { %10848 = shalt.err (!%p10845_p1)
}
  0xbb   :  { %150 = dma.hbm_to_vmem [thread:$0]  %s13830_s15, 512, %s145_s4, [#allocation14], %s13865_s7, %s13865_s7, %s13864_s27  }
  0xbc   :  { %10849 = dma.done.wait [#allocation3], 4096  }
  0xbd   :  { %10850 = vsyncadd [#allocation3], 4294963200 }
  0xbe   :  { %10851 = dma.done.wait [#allocation5], 14336  }
  0xbf   :  { %10852 = vsyncadd [#allocation5], 4294952960 }
  0xc0   :  { %10853 = dma.done.wait [#allocation8], 1536  }
  0xc1   :  { %10854 = vsyncadd [#allocation8], 4294965760 }
  0xc2   :  { %10855 = dma.done.wait [#allocation11], 1040  }
  0xc3   :  { %10856 = vsyncadd [#allocation11], 4294966256 }
  0xc4   :  { %10857 = dma.done.wait [#allocation14], 528  }
  0xc5   :  { %10858 = vsyncadd [#allocation14], 4294966768  ;;  %v10872_v0 = vmov 0.0   ;;  %s13867_s12 = sld [smem:[#allocation21_spill]]  ;;  %v9863_v49 = vld [vmem:[#allocation4 + $0xc4] ss:$8 sps:$4 sm:$0xff]  }
  0xc6   :  { %451 = vmatprep.mubr.f32.mxu1 %v10872_v0  ;;  %297 = vmatprep.mubr.f32.mxu0 %v10872_v0  ;;  %v379_v50 = vld [vmem:[#allocation2 + $0x40] sm:$0xff]  ;;  %v380_v53 = vld [vmem:[#allocation2 + $0x48] sm:$0xff]  ;;  %v9866_v55 = vld [vmem:[#allocation4 + $0xd4] ss:$8 sps:$4 sm:$0xff]   ;;  %vm653_vm0 = vcmask 523264   ;;  %s13868_s15 = sld [smem:[#allocation25_spill]] }
  0xc7   :  { %v225_v51 = vld [vmem:[#allocation2] sm:$0xff]  ;;  %v226_v54 = vld [vmem:[#allocation2 + $0x8] sm:$0xff]  ;;  %v9864_v56 = vld [vmem:[#allocation4 + $0xd0] ss:$8 sps:$4 sm:$0xff]   ;;  %s13869_s14 = sld [smem:[#allocation26_spill]]  ;;  %s13870_s26 = sld [smem:[#allocation28_spill]] }
  0xc8   :  { %v9861_v52 = vld [vmem:[#allocation4 + $0xc0] ss:$8 sps:$4 sm:$0xff]   ;;  %v9869_v57 = vld [vmem:[#allocation4 + $0xe4] ss:$8 sps:$4 sm:$0xff]   ;;  %v381_v58 = vld [vmem:[#allocation2 + $0x50] sm:$0xff] }
  0xc9   :  { %v227_v59 = vld [vmem:[#allocation2 + $0x10] sm:$0xff]  ;;  %v9867_v60 = vld [vmem:[#allocation4 + $0xe0] ss:$8 sps:$4 sm:$0xff]   ;;  %v382_v62 = vld [vmem:[#allocation2 + $0x58] sm:$0xff] }
  0xca   :  { %v9872_v61 = vld [vmem:[#allocation4 + $0xf4] ss:$8 sps:$4 sm:$0xff]  }
  0xcb   :  { %v194_v1 = vld [vmem:[%s13867_s12 + $0x8] sm:$0xff]  ;;  %v196_v2 = vld [vmem:[%s13867_s12 + $0x18] sm:$0xff]  ;;  %v193_v3 = vld [vmem:[%s13867_s12] sm:$0xff] }
  0xcc   :  { %v11141_v4 = vpack.c.bf16 %v196_v2, %v194_v1  ;;  %v195_v5 = vld [vmem:[%s13867_s12 + $0x10] sm:$0xff]  ;;  %v198_v6 = vld [vmem:[%s13867_s12 + $0x28] sm:$0xff]  ;;  %v200_v7 = vld [vmem:[%s13867_s12 + $0x38] sm:$0xff] }
  0xcd   :  { %v11152_v8 = vpack.c.bf16 %v195_v5, %v193_v3  ;;  %v11154_v9 = vpack.c.bf16 %v200_v7, %v198_v6  ;;  %v197_v10 = vld [vmem:[%s13867_s12 + $0x20] sm:$0xff]  ;;  %v199_v11 = vld [vmem:[%s13867_s12 + $0x30] sm:$0xff]  ;;  %v202_v12 = vld [vmem:[%s13867_s12 + $0x48] sm:$0xff] }
  0xce   :  { %9296 = vmatprep.subr.bf16.mxu1 %v11141_v4  ;;  %v204_v13 = vld [vmem:[%s13867_s12 + $0x58] sm:$0xff]  ;;  %9264 = vmatprep.subr.bf16.mxu0 %v11141_v4  ;;  %v11171_v14 = vpack.c.bf16 %v199_v11, %v197_v10  ;;  %v201_v16 = vld [vmem:[%s13867_s12 + $0x40] sm:$0xff]  ;;  %v203_v17 = vld [vmem:[%s13867_s12 + $0x50] sm:$0xff] }
  0xcf   :  { %9298 = vmatpush1.bf16.msra.mxu1 %v11152_v8  ;;  %9266 = vmatpush1.bf16.msra.mxu0 %v11152_v8  ;;  %v11175_v15 = vpack.c.bf16 %v204_v13, %v202_v12  ;;  %v206_v18 = vld [vmem:[%s13867_s12 + $0x68] sm:$0xff]  ;;  %v208_v19 = vld [vmem:[%s13867_s12 + $0x78] sm:$0xff]  ;;  %v11191_v20 = vpack.c.bf16 %v203_v17, %v201_v16  ;;  %v205_v22 = vld [vmem:[%s13867_s12 + $0x60] sm:$0xff] }
  0xd0   :  { %9300 = vmatprep.subr.bf16.mxu1 %v11154_v9  ;;  %9268 = vmatprep.subr.bf16.mxu0 %v11154_v9  ;;  %v11195_v21 = vpack.c.bf16 %v208_v19, %v206_v18  ;;  %v207_v23 = vld [vmem:[%s13867_s12 + $0x70] sm:$0xff]  ;;  %v210_v24 = vld [vmem:[%s13867_s12 + $0x88] sm:$0xff]  ;;  %v212_v25 = vld [vmem:[%s13867_s12 + $0x98] sm:$0xff] }
  0xd1   :  { %v11211_v26 = vpack.c.bf16 %v207_v23, %v205_v22  ;;  %v11215_v27 = vpack.c.bf16 %v212_v25, %v210_v24  ;;  %v209_v28 = vld [vmem:[%s13867_s12 + $0x80] sm:$0xff]  ;;  %v211_v29 = vld [vmem:[%s13867_s12 + $0x90] sm:$0xff]  ;;  %v214_v30 = vld [vmem:[%s13867_s12 + $0xa8] sm:$0xff] }
  0xd2   :  { %v216_v31 = vld [vmem:[%s13867_s12 + $0xb8] sm:$0xff]  ;;  %v11231_v32 = vpack.c.bf16 %v211_v29, %v209_v28  ;;  %v213_v34 = vld [vmem:[%s13867_s12 + $0xa0] sm:$0xff]  ;;  %v215_v35 = vld [vmem:[%s13867_s12 + $0xb0] sm:$0xff] }
  0xd3   :  { %9302 = vmatpush1.bf16.msra.mxu1 %v11171_v14  ;;  %9270 = vmatpush1.bf16.msra.mxu0 %v11171_v14  ;;  %v11235_v33 = vpack.c.bf16 %v216_v31, %v214_v30  ;;  %v218_v36 = vld [vmem:[%s13867_s12 + $0xc8] sm:$0xff]  ;;  %v220_v37 = vld [vmem:[%s13867_s12 + $0xd8] sm:$0xff]  ;;  %v11251_v38 = vpack.c.bf16 %v215_v35, %v213_v34  ;;  %v217_v39 = vld [vmem:[%s13867_s12 + $0xc0] sm:$0xff] }
  0xd4   :  { %9304 = vmatprep.subr.bf16.mxu1 %v11175_v15  ;;  %9272 = vmatprep.subr.bf16.mxu0 %v11175_v15  ;;  %v11258_v40 = vpack.c.bf16 %v220_v37, %v218_v36  ;;  %v219_v41 = vld [vmem:[%s13867_s12 + $0xd0] sm:$0xff]  ;;  %v222_v42 = vld [vmem:[%s13867_s12 + $0xe8] sm:$0xff]  ;;  %v224_v43 = vld [vmem:[%s13867_s12 + $0xf8] sm:$0xff] }
  0xd5   :  { %v11271_v44 = vpack.c.bf16 %v219_v41, %v217_v39  ;;  %v221_v45 = vld [vmem:[%s13867_s12 + $0xe0] sm:$0xff]  ;;  %v11278_v46 = vpack.c.bf16 %v224_v43, %v222_v42  ;;  %v223_v47 = vld [vmem:[%s13867_s12 + $0xf0] sm:$0xff]  ;;  %v228_v63 = vld [vmem:[#allocation2 + $0x18] sm:$0xff] }
  0xd6   :  { %v11285_v48 = vpack.c.bf16 %v223_v47, %v221_v45  ;;  %v9870_v1 = vld [vmem:[#allocation4 + $0xf0] ss:$8 sps:$4 sm:$0xff]   ;;  %v9875_v2 = vld [vmem:[#allocation4 + $0x104] ss:$8 sps:$4 sm:$0xff]   ;;  %v9873_v6 = vld [vmem:[#allocation4 + $0x100] ss:$8 sps:$4 sm:$0xff]  }
  0xd7   :  { %9306 = vmatpush1.bf16.msra.mxu1 %v11191_v20  ;;  %9274 = vmatpush1.bf16.msra.mxu0 %v11191_v20  ;;  %v383_v3 = vld [vmem:[#allocation2 + $0x60] sm:$0xff]  ;;  %v9878_v7 = vld [vmem:[#allocation4 + $0x114] ss:$8 sps:$4 sm:$0xff]   ;;  %v384_v10 = vld [vmem:[#allocation2 + $0x68] sm:$0xff] }
  0xd8   :  { %9308 = vmatprep.subr.bf16.mxu1 %v11195_v21  ;;  %9276 = vmatprep.subr.bf16.mxu0 %v11195_v21  ;;  %v229_v5 = vld [vmem:[#allocation2 + $0x20] sm:$0xff]  ;;  %v230_v11 = vld [vmem:[#allocation2 + $0x28] sm:$0xff]  ;;  %v9876_v12 = vld [vmem:[#allocation4 + $0x110] ss:$8 sps:$4 sm:$0xff]  }
  0xd9   :  { %v9881_v13 = vld [vmem:[#allocation4 + $0x124] ss:$8 sps:$4 sm:$0xff]   ;;  %v385_v16 = vld [vmem:[#allocation2 + $0x70] sm:$0xff]  ;;  %v9879_v18 = vld [vmem:[#allocation4 + $0x120] ss:$8 sps:$4 sm:$0xff]  }
  0xda   :  { %v231_v17 = vld [vmem:[#allocation2 + $0x30] sm:$0xff]  ;;  %v386_v22 = vld [vmem:[#allocation2 + $0x78] sm:$0xff]  ;;  %v9887_v25 = vld [vmem:[#allocation4 + $0x144] ss:$8 sps:$4 sm:$0xff]  }
  0xdb   :  { %9310 = vmatpush1.bf16.msra.mxu1 %v11211_v26  ;;  %9278 = vmatpush1.bf16.msra.mxu0 %v11211_v26  ;;  %v9884_v19 = vld [vmem:[#allocation4 + $0x134] ss:$8 sps:$4 sm:$0xff]   ;;  %v9882_v24 = vld [vmem:[#allocation4 + $0x130] ss:$8 sps:$4 sm:$0xff]   ;;  %v945_v28 = vld [vmem:[#allocation2 + $0x80] sm:$0xff] }
  0xdc   :  { %9312 = vmatprep.subr.bf16.mxu1 %v11215_v27  ;;  %9280 = vmatprep.subr.bf16.mxu0 %v11215_v27  ;;  %v232_v23 = vld [vmem:[#allocation2 + $0x38] sm:$0xff]  ;;  %v9885_v29 = vld [vmem:[#allocation4 + $0x140] ss:$8 sps:$4 sm:$0xff]   ;;  %v947_v35 = vld [vmem:[#allocation2 + $0x90] sm:$0xff] }
  0xdd   :  { %v9890_v30 = vld [vmem:[#allocation4 + $0x154] ss:$8 sps:$4 sm:$0xff]   ;;  %v946_v31 = vld [vmem:[#allocation2 + $0x88] sm:$0xff]  ;;  %v9888_v34 = vld [vmem:[#allocation4 + $0x150] ss:$8 sps:$4 sm:$0xff]  }
  0xde   :  { %v9893_v36 = vld [vmem:[#allocation4 + $0x164] ss:$8 sps:$4 sm:$0xff]   ;;  %v9891_v37 = vld [vmem:[#allocation4 + $0x160] ss:$8 sps:$4 sm:$0xff]   ;;  %v9896_v39 = vld [vmem:[#allocation4 + $0x174] ss:$8 sps:$4 sm:$0xff]  }
  0xdf   :  { %9314 = vmatpush1.bf16.msra.mxu1 %v11231_v32  ;;  %9282 = vmatpush1.bf16.msra.mxu0 %v11231_v32  ;;  %v9899_v41 = vld [vmem:[#allocation4 + $0x4] ss:$8 sps:$4 sm:$0xff]   ;;  %v1328_v42 = vld [vmem:[#allocation2 + $0xf8] sm:$0xff] }
  0xe0   :  { %9316 = vmatprep.subr.bf16.mxu1 %v11235_v33  ;;  %9284 = vmatprep.subr.bf16.mxu0 %v11235_v33 }
  0xe3   :  { %9318 = vmatpush1.bf16.msra.mxu1 %v11251_v38  ;;  %9286 = vmatpush1.bf16.msra.mxu0 %v11251_v38 }
  0xe4   :  { %9320 = vmatprep.subr.bf16.mxu1 %v11258_v40  ;;  %9288 = vmatprep.subr.bf16.mxu0 %v11258_v40 }
  0xe7   :  { %9322 = vmatpush1.bf16.msra.mxu1 %v11271_v44  ;;  %9290 = vmatpush1.bf16.msra.mxu0 %v11271_v44 }
  0xe8   :  { %9324 = vmatprep.subr.bf16.mxu1 %v11278_v46  ;;  %9292 = vmatprep.subr.bf16.mxu0 %v11278_v46 }
  0xeb   :  { %9326 = vmatpush1.bf16.msra.mxu1 %v11285_v48  ;;  %9294 = vmatpush1.bf16.msra.mxu0 %v11285_v48 }
  0xec   :  { %9328 = vmatprep.subr.bf16.mxu1 %v11141_v4  ;;  %666 = vmatprep.subr.bf16.mxu0 %v9863_v49 }
  0xee   :  { %452 = vmatmul.mubr.f32.vlgmr.msra.gmra.mrb[0].mxu1 %v379_v50  ;;  %298 = vmatmul.mubr.f32.vlgmr.msra.gmra.mrb[0].mxu0 %v225_v51 }
  0xef   :  { %457 = vmatprep.mubr.f32.mxu1 %v10872_v0  ;;  %303 = vmatprep.mubr.f32.mxu0 %v10872_v0 }
  0xf0   :  { %9330 = vmatpush1.bf16.msra.mxu1 %v11152_v8  ;;  %667 = vmatpush1.bf16.msra.mxu0 %v9861_v52 }
  0xf1   :  { %9332 = vmatprep.subr.bf16.mxu1 %v11154_v9  ;;  %668 = vmatprep.subr.bf16.mxu0 %v9866_v55  ;;  %v9902_v55 = vld [vmem:[#allocation4 + $0x14] ss:$8 sps:$4 sm:$0xff]  }
  0xf2   :  { %458 = vmatmul.mubr.f32.gmra.mrb[2].mxu1 %v380_v53  ;;  %304 = vmatmul.mubr.f32.gmra.mrb[2].mxu0 %v226_v54  ;;  %v9897_v54 = vld [vmem:[#allocation4] ss:$8 sps:$4 sm:$0xff]  }
  0xf3   :  { %463 = vmatprep.mubr.f32.mxu1 %v10872_v0  ;;  %309 = vmatprep.mubr.f32.mxu0 %v10872_v0 }
  0xf4   :  { %9334 = vmatpush1.bf16.msra.mxu1 %v11171_v14  ;;  %669 = vmatpush1.bf16.msra.mxu0 %v9864_v56 }
  0xf5   :  { %9336 = vmatprep.subr.bf16.mxu1 %v11175_v15  ;;  %670 = vmatprep.subr.bf16.mxu0 %v9869_v57 }
  0xf6   :  { %464 = vmatmul.mubr.f32.gmra.mrb[4].mxu1 %v381_v58  ;;  %310 = vmatmul.mubr.f32.gmra.mrb[4].mxu0 %v227_v59 }
  0xf7   :  { %469 = vmatprep.mubr.f32.mxu1 %v10872_v0  ;;  %315 = vmatprep.mubr.f32.mxu0 %v10872_v0 }
  0xf8   :  { %9338 = vmatpush1.bf16.msra.mxu1 %v11191_v20  ;;  %671 = vmatpush1.bf16.msra.mxu0 %v9867_v60 }
  0xf9   :  { %9340 = vmatprep.subr.bf16.mxu1 %v11195_v21  ;;  %672 = vmatprep.subr.bf16.mxu0 %v9872_v61  ;;  %v9900_v61 = vld [vmem:[#allocation4 + $0x10] ss:$8 sps:$4 sm:$0xff]  }
  0xfa   :  { %470 = vmatmul.mubr.f32.gmra.mrb[6].mxu1 %v382_v62  ;;  %316 = vmatmul.mubr.f32.gmra.mrb[6].mxu0 %v228_v63  ;;  %v9905_v62 = vld [vmem:[#allocation4 + $0x24] ss:$8 sps:$4 sm:$0xff]  }
  0xfb   :  { %475 = vmatprep.mubr.f32.mxu1 %v10872_v0  ;;  %321 = vmatprep.mubr.f32.mxu0 %v10872_v0 }
  0xfc   :  { %9342 = vmatpush1.bf16.msra.mxu1 %v11211_v26  ;;  %673 = vmatpush1.bf16.msra.mxu0 %v9870_v1 }
  0xfd   :  { %9344 = vmatprep.subr.bf16.mxu1 %v11215_v27  ;;  %674 = vmatprep.subr.bf16.mxu0 %v9875_v2 }
  0xfe   :  { %476 = vmatmul.mubr.f32.gmra.mrb[8].mxu1 %v383_v3  ;;  %322 = vmatmul.mubr.f32.gmra.mrb[8].mxu0 %v229_v5 }
  0xff   :  { %481 = vmatprep.mubr.f32.mxu1 %v10872_v0  ;;  %327 = vmatprep.mubr.f32.mxu0 %v10872_v0 }
 0x100   :  { %9346 = vmatpush1.bf16.msra.mxu1 %v11231_v32  ;;  %675 = vmatpush1.bf16.msra.mxu0 %v9873_v6 }
 0x101   :  { %9348 = vmatprep.subr.bf16.mxu1 %v11235_v33  ;;  %676 = vmatprep.subr.bf16.mxu0 %v9878_v7  ;;  %v9903_v7 = vld [vmem:[#allocation4 + $0x20] ss:$8 sps:$4 sm:$0xff]  }
 0x102   :  { %482 = vmatmul.mubr.f32.gmra.mrb[10].mxu1 %v384_v10  ;;  %328 = vmatmul.mubr.f32.gmra.mrb[10].mxu0 %v230_v11 }
 0x103   :  { %487 = vmatprep.mubr.f32.mxu1 %v10872_v0  ;;  %333 = vmatprep.mubr.f32.mxu0 %v10872_v0 }
 0x104   :  { %9350 = vmatpush1.bf16.msra.mxu1 %v11251_v38  ;;  %677 = vmatpush1.bf16.msra.mxu0 %v9876_v12  ;;  %v9908_v12 = vld [vmem:[#allocation4 + $0x34] ss:$8 sps:$4 sm:$0xff]  }
 0x105   :  { %9352 = vmatprep.subr.bf16.mxu1 %v11258_v40  ;;  %678 = vmatprep.subr.bf16.mxu0 %v9881_v13 }
 0x106   :  { %488 = vmatmul.mubr.f32.gmra.mrb[12].mxu1 %v385_v16  ;;  %334 = vmatmul.mubr.f32.gmra.mrb[12].mxu0 %v231_v17 }
 0x107   :  { %493 = vmatprep.mubr.f32.mxu1 %v10872_v0  ;;  %339 = vmatprep.mubr.f32.mxu0 %v10872_v0 }
 0x108   :  { %9354 = vmatpush1.bf16.msra.mxu1 %v11271_v44  ;;  %679 = vmatpush1.bf16.msra.mxu0 %v9879_v18 }
 0x109   :  { %9356 = vmatprep.subr.bf16.mxu1 %v11278_v46  ;;  %680 = vmatprep.subr.bf16.mxu0 %v9884_v19  ;;  %v9906_v19 = vld [vmem:[#allocation4 + $0x30] ss:$8 sps:$4 sm:$0xff]  }
 0x10a   :  { %494 = vmatmul.mubr.f32.gmra.mrb[14].mxu1 %v386_v22  ;;  %340 = vmatmul.mubr.f32.gmra.mrb[14].mxu0 %v232_v23  ;;  %v9911_v22 = vld [vmem:[#allocation4 + $0x44] ss:$8 sps:$4 sm:$0xff]  }
 0x10b   :  { %1017 = vmatprep.mubr.f32.mxu1 %v10872_v0 }
 0x10c   :  { %9358 = vmatpush1.bf16.msra.mxu1 %v11285_v48  ;;  %681 = vmatpush1.bf16.msra.mxu0 %v9882_v24 }
 0x10d   :  { %9360 = vmatprep.subr.bf16.mxu1 %v11141_v4  ;;  %682 = vmatprep.subr.bf16.mxu0 %v9887_v25  ;;  %v948_v4 = vld [vmem:[#allocation2 + $0x98] sm:$0xff] }
 0x10f   :  { %1018 = vmatmul.mubr.f32.vlgmr.msra.gmra.mrb[16].mxu1 %v945_v28 }
 0x110   :  { %1023 = vmatprep.mubr.f32.mxu1 %v10872_v0  ;;  %9362 = vmatpush1.bf16.msra.mxu1 %v11152_v8  ;;  %v949_v8 = vld [vmem:[#allocation2 + $0xa0] sm:$0xff] }
 0x111   :  { %9364 = vmatprep.subr.bf16.mxu1 %v11154_v9  ;;  %683 = vmatpush1.bf16.msra.mxu0 %v9885_v29  ;;  %v950_v9 = vld [vmem:[#allocation2 + $0xa8] sm:$0xff] }
 0x112   :  { %684 = vmatprep.subr.bf16.mxu0 %v9890_v30 }
 0x113   :  { %1024 = vmatmul.mubr.f32.gmra.mrb[18].mxu1 %v946_v31  ;;  %v9909_v31 = vld [vmem:[#allocation4 + $0x40] ss:$8 sps:$4 sm:$0xff]  }
 0x114   :  { %9366 = vmatpush1.bf16.msra.mxu1 %v11171_v14  ;;  %1029 = vmatprep.mubr.f32.mxu1 %v10872_v0  ;;  %v951_v14 = vld [vmem:[#allocation2 + $0xb0] sm:$0xff] }
 0x115   :  { %9368 = vmatprep.subr.bf16.mxu1 %v11175_v15  ;;  %685 = vmatpush1.bf16.msra.mxu0 %v9888_v34  ;;  %v952_v15 = vld [vmem:[#allocation2 + $0xb8] sm:$0xff] }
 0x116   :  { %686 = vmatprep.subr.bf16.mxu0 %v9893_v36 }
 0x117   :  { %1030 = vmatmul.mubr.f32.gmra.mrb[20].mxu1 %v947_v35 }
 0x118   :  { %9370 = vmatpush1.bf16.msra.mxu1 %v11191_v20  ;;  %1035 = vmatprep.mubr.f32.mxu1 %v10872_v0  ;;  %v1321_v20 = vld [vmem:[#allocation2 + $0xc0] sm:$0xff] }
 0x119   :  { %9372 = vmatprep.subr.bf16.mxu1 %v11195_v21  ;;  %v1322_v21 = vld [vmem:[#allocation2 + $0xc8] sm:$0xff]  ;;  %687 = vmatpush1.bf16.msra.mxu0 %v9891_v37 }
 0x11a   :  { %688 = vmatprep.subr.bf16.mxu0 %v9896_v39 }
 0x11b   :  { %1036 = vmatmul.mubr.f32.gmra.mrb[22].mxu1 %v948_v4  ;;  %v9914_v4 = vld [vmem:[#allocation4 + $0x54] ss:$8 sps:$4 sm:$0xff]  }
 0x11c   :  { %9374 = vmatpush1.bf16.msra.mxu1 %v11211_v26  ;;  %1041 = vmatprep.mubr.f32.mxu1 %v10872_v0  ;;  %v1323_v26 = vld [vmem:[#allocation2 + $0xd0] sm:$0xff] }
 0x11d   :  { %9376 = vmatprep.subr.bf16.mxu1 %v11215_v27  ;;  %v1324_v27 = vld [vmem:[#allocation2 + $0xd8] sm:$0xff] }
 0x11f   :  { %1042 = vmatmul.mubr.f32.gmra.mrb[24].mxu1 %v949_v8 }
 0x120   :  { %9378 = vmatpush1.bf16.msra.mxu1 %v11231_v32  ;;  %1047 = vmatprep.mubr.f32.mxu1 %v10872_v0  ;;  %v1325_v32 = vld [vmem:[#allocation2 + $0xe0] sm:$0xff] }
 0x121   :  { %9380 = vmatprep.subr.bf16.mxu1 %v11235_v33  ;;  %v1326_v33 = vld [vmem:[#allocation2 + $0xe8] sm:$0xff] }
 0x123   :  { %1048 = vmatmul.mubr.f32.gmra.mrb[26].mxu1 %v950_v9 }
 0x124   :  { %9382 = vmatpush1.bf16.msra.mxu1 %v11251_v38  ;;  %1053 = vmatprep.mubr.f32.mxu1 %v10872_v0  ;;  %v1327_v38 = vld [vmem:[#allocation2 + $0xf0] sm:$0xff] }
 0x125   :  { %9384 = vmatprep.subr.bf16.mxu1 %v11258_v40  ;;  %v9894_v40 = vld [vmem:[#allocation4 + $0x170] ss:$8 sps:$4 sm:$0xff]  }
 0x126   :  { %689 = vmatpush1.bf16.msra.mxu0 %v9894_v40 }
 0x127   :  { %1054 = vmatmul.mubr.f32.gmra.mrb[28].mxu1 %v951_v14  ;;  %871 = vmatprep.subr.bf16.mxu0 %v9899_v41  ;;  %v9920_v41 = vld [vmem:[#allocation4 + $0x74] ss:$8 sps:$4 sm:$0xff]  }
 0x128   :  { %9386 = vmatpush1.bf16.msra.mxu1 %v11271_v44  ;;  %1059 = vmatprep.mubr.f32.mxu1 %v10872_v0 }
 0x129   :  { %9388 = vmatprep.subr.bf16.mxu1 %v11278_v46 }
 0x12b   :  { %1060 = vmatmul.mubr.f32.gmra.mrb[30].mxu1 %v952_v15 }
 0x12c   :  { %9390 = vmatpush1.bf16.msra.mxu1 %v11285_v48  ;;  %1393 = vmatprep.mubr.f32.mxu1 %v10872_v0 }
 0x12f   :  { %1394 = vmatmul.mubr.f32.vlgmr.msra.gmra.mrb[32].mxu1 %v1321_v20  ;;  %v9912_v20 = vld [vmem:[#allocation4 + $0x50] ss:$8 sps:$4 sm:$0xff]  }
 0x130   :  { %1399 = vmatprep.mubr.f32.mxu1 %v10872_v0 }
 0x133   :  { %1400 = vmatmul.mubr.f32.gmra.mrb[34].mxu1 %v1322_v21  ;;  %v9917_v21 = vld [vmem:[#allocation4 + $0x64] ss:$8 sps:$4 sm:$0xff]  }
 0x134   :  { %1405 = vmatprep.mubr.f32.mxu1 %v10872_v0 }
 0x137   :  { %1406 = vmatmul.mubr.f32.gmra.mrb[36].mxu1 %v1323_v26 }
 0x138   :  { %1411 = vmatprep.mubr.f32.mxu1 %v10872_v0 }
 0x13b   :  { %1412 = vmatmul.mubr.f32.gmra.mrb[38].mxu1 %v1324_v27 }
 0x13c   :  { %1417 = vmatprep.mubr.f32.mxu1 %v10872_v0 }
 0x13f   :  { %1418 = vmatmul.mubr.f32.gmra.mrb[40].mxu1 %v1325_v32 }
 0x140   :  { %1423 = vmatprep.mubr.f32.mxu1 %v10872_v0 }
 0x143   :  { %1424 = vmatmul.mubr.f32.gmra.mrb[42].mxu1 %v1326_v33 }
 0x144   :  { %1429 = vmatprep.mubr.f32.mxu1 %v10872_v0 }
 0x147   :  { %1430 = vmatmul.mubr.f32.gmra.mrb[44].mxu1 %v1327_v38  ;;  %v9915_v38 = vld [vmem:[#allocation4 + $0x60] ss:$8 sps:$4 sm:$0xff]  }
 0x148   :  { %1435 = vmatprep.mubr.f32.mxu1 %v10872_v0 }
 0x14b   :  { %1436 = vmatmul.mubr.f32.gmra.mrb[46].mxu1 %v1328_v42 }
 0x14c   :  { %1824 = vmatprep.mubr.f32.mxu1 %v10872_v0 }
 0x1c1   :  { %v453_v43 = vpop.f32.mrb[0].mxu1  ;;  %v11355_v44 = vpop.f32.mrb[0].mxu0 }
 0x1c2   :  { %v455_v45 = vpop.f32.mrb[1].mxu1  ;;  %v11357_v46 = vpop.f32.mrb[1].mxu0 }
 0x1c5   :  { %v459_v47 = vpop.f32.mrb[2].mxu1  ;;  %v11359_v48 = vpop.f32.mrb[2].mxu0 }
 0x1c6   :  { %v500_v49 = vpack.c.bf16 %v459_v47, %v453_v43  ;;  %v461_v50 = vpop.f32.mrb[3].mxu1  ;;  %v346_v51 = vpack.c.bf16 %v11359_v48, %v11355_v44  ;;  %v11363_v52 = vpop.f32.mrb[3].mxu0  ;;  %v9918_v43 = vld [vmem:[#allocation4 + $0x70] ss:$8 sps:$4 sm:$0xff]   ;;  %v9923_v47 = vld [vmem:[#allocation4 + $0x84] ss:$8 sps:$4 sm:$0xff]  }
 0x1c7   :  { %v501_v53 = vpack.c.bf16 %v461_v50, %v455_v45  ;;  %v347_v56 = vpack.c.bf16 %v11363_v52, %v11357_v46  ;;  %v9921_v50 = vld [vmem:[#allocation4 + $0x80] ss:$8 sps:$4 sm:$0xff]  }
 0x1c9   :  { %8004 = vmatprep.mubr.msk.bf16.mxu0 %vm653_vm0, %v501_v53  ;;  %v465_v57 = vpop.f32.mrb[4].mxu1  ;;  %v11368_v58 = vpop.f32.mrb[4].mxu0 }
 0x1ca   :  { %699 = vmatmul.mubr.bf16.vlgmr.msra.gmra.mrb[16].mxu0 %v500_v49  ;;  %v467_v59 = vpop.f32.mrb[5].mxu1  ;;  %v11370_v60 = vpop.f32.mrb[5].mxu0 }
 0x1cb   :  { %872 = vmatpush1.bf16.msra.mxu0 %v9897_v54 }
 0x1cc   :  { %873 = vmatprep.subr.bf16.mxu0 %v9902_v55  ;;  %v9926_v55 = vld [vmem:[#allocation4 + $0x94] ss:$8 sps:$4 sm:$0xff]  }
 0x1cd   :  { %v471_v63 = vpop.f32.mrb[6].mxu1  ;;  %v11372_v1 = vpop.f32.mrb[6].mxu0 }
 0x1ce   :  { %v502_v2 = vpack.c.bf16 %v471_v63, %v465_v57  ;;  %v473_v3 = vpop.f32.mrb[7].mxu1  ;;  %v348_v5 = vpack.c.bf16 %v11372_v1, %v11368_v58  ;;  %v11376_v6 = vpop.f32.mrb[7].mxu0 }
 0x1cf   :  { %874 = vmatpush1.bf16.msra.mxu0 %v9900_v61  ;;  %v503_v10 = vpack.c.bf16 %v473_v3, %v467_v59  ;;  %v349_v11 = vpack.c.bf16 %v11376_v6, %v11370_v60  ;;  %v9929_v59 = vld [vmem:[#allocation4 + $0xa4] ss:$8 sps:$4 sm:$0xff]   ;;  %v9932_v3 = vld [vmem:[#allocation4 + $0xb4] ss:$8 sps:$4 sm:$0xff]  }
 0x1d0   :  { %875 = vmatprep.subr.bf16.mxu0 %v9905_v62  ;;  %v9927_v62 = vld [vmem:[#allocation4 + $0xa0] ss:$8 sps:$4 sm:$0xff]  }
 0x1d1   :  { %8005 = vmatprep.mubr.msk.bf16.mxu0 %vm653_vm0, %v503_v10  ;;  %v477_v13 = vpop.f32.mrb[8].mxu1  ;;  %v11381_v16 = vpop.f32.mrb[8].mxu0 }
 0x1d2   :  { %709 = vmatmul.mubr.bf16.gmra.mrb[20].mxu0 %v502_v2  ;;  %v479_v17 = vpop.f32.mrb[9].mxu1  ;;  %v11383_v18 = vpop.f32.mrb[9].mxu0 }
 0x1d3   :  { %876 = vmatpush1.bf16.msra.mxu0 %v9903_v7 }
 0x1d4   :  { %877 = vmatprep.subr.bf16.mxu0 %v9908_v12  ;;  %v9930_v12 = vld [vmem:[#allocation4 + $0xb0] ss:$8 sps:$4 sm:$0xff]  }
 0x1d5   :  { %v483_v23 = vpop.f32.mrb[10].mxu1  ;;  %v11385_v24 = vpop.f32.mrb[10].mxu0 }
 0x1d6   :  { %v504_v25 = vpack.c.bf16 %v483_v23, %v477_v13  ;;  %v485_v28 = vpop.f32.mrb[11].mxu1  ;;  %v350_v29 = vpack.c.bf16 %v11385_v24, %v11381_v16  ;;  %v11389_v30 = vpop.f32.mrb[11].mxu0 }
 0x1d7   :  { %878 = vmatpush1.bf16.msra.mxu0 %v9906_v19  ;;  %v505_v34 = vpack.c.bf16 %v485_v28, %v479_v17  ;;  %v351_v35 = vpack.c.bf16 %v11389_v30, %v11383_v18  ;;  %v9935_v17 = vld [vmem:[#allocation4 + $0x184] ss:$8 sps:$4 sm:$0xff]   ;;  %v9938_v28 = vld [vmem:[#allocation4 + $0x194] ss:$8 sps:$4 sm:$0xff]  }
 0x1d8   :  { %879 = vmatprep.subr.bf16.mxu0 %v9911_v22  ;;  %v9933_v22 = vld [vmem:[#allocation4 + $0x180] ss:$8 sps:$4 sm:$0xff]  }
 0x1d9   :  { %8006 = vmatprep.mubr.msk.bf16.mxu0 %vm653_vm0, %v505_v34  ;;  %v489_v8 = vpop.f32.mrb[12].mxu1  ;;  %v11394_v9 = vpop.f32.mrb[12].mxu0 }
 0x1da   :  { %719 = vmatmul.mubr.bf16.gmra.mrb[24].mxu0 %v504_v25  ;;  %v491_v14 = vpop.f32.mrb[13].mxu1  ;;  %v11396_v15 = vpop.f32.mrb[13].mxu0 }
 0x1db   :  { %880 = vmatpush1.bf16.msra.mxu0 %v9909_v31 }
 0x1dc   :  { %881 = vmatprep.subr.bf16.mxu0 %v9914_v4  ;;  %v9936_v4 = vld [vmem:[#allocation4 + $0x190] ss:$8 sps:$4 sm:$0xff]  }
 0x1dd   :  { %v495_v26 = vpop.f32.mrb[14].mxu1  ;;  %v11398_v27 = vpop.f32.mrb[14].mxu0 }
 0x1de   :  { %v506_v32 = vpack.c.bf16 %v495_v26, %v489_v8  ;;  %v497_v33 = vpop.f32.mrb[15].mxu1  ;;  %v352_v36 = vpack.c.bf16 %v11398_v27, %v11394_v9  ;;  %v11402_v37 = vpop.f32.mrb[15].mxu0 }
 0x1df   :  { %882 = vmatpush1.bf16.msra.mxu0 %v9912_v20  ;;  %v507_v39 = vpack.c.bf16 %v497_v33, %v491_v14  ;;  %v353_v40 = vpack.c.bf16 %v11402_v37, %v11396_v15  ;;  %v9941_v14 = vld [vmem:[#allocation4 + $0x1a4] ss:$8 sps:$4 sm:$0xff]  }
 0x1e0   :  { %883 = vmatprep.subr.bf16.mxu0 %v9917_v21  ;;  %v9939_v21 = vld [vmem:[#allocation4 + $0x1a0] ss:$8 sps:$4 sm:$0xff]  }
 0x1e1   :  { %8007 = vmatprep.mubr.msk.bf16.mxu0 %vm653_vm0, %v507_v39 }
 0x1e2   :  { %729 = vmatmul.mubr.bf16.gmra.mrb[28].mxu0 %v506_v32  ;;  %v11407_v42 = vpop.f32.mrb[16].mxu1  ;;  %v9947_v32 = vld [vmem:[#allocation4 + $0x1c4] ss:$8 sps:$4 sm:$0xff]  }
 0x1e3   :  { %884 = vmatpush1.bf16.msra.mxu0 %v9915_v38  ;;  %8032 = vmatprep.mubr.msk.bf16.mxu0 %vm653_vm0, %v347_v56  ;;  %v11413_v45 = vpop.f32.mrb[17].mxu1  ;;  %v9924_v56 = vld [vmem:[#allocation4 + $0x90] ss:$8 sps:$4 sm:$0xff]   ;;  %v9945_v38 = vld [vmem:[#allocation4 + $0x1c0] ss:$8 sps:$4 sm:$0xff]  }
 0x1e4   :  { %885 = vmatprep.subr.bf16.mxu0 %v9920_v41  ;;  %v9953_v41 = vld [vmem:[#allocation4 + $0x1e4] ss:$8 sps:$4 sm:$0xff]  }
 0x1e6   :  { %v11415_v49 = vpop.f32.mrb[18].mxu1 }
 0x1e7   :  { %886 = vmatpush1.bf16.msra.mxu0 %v9918_v43  ;;  %v1066_v53 = vpack.c.bf16 %v11415_v49, %v11407_v42  ;;  %v11419_v54 = vpop.f32.mrb[19].mxu1  ;;  %v9978_v42 = vld [vmem:[#allocation4 + $0x270] ss:$8 sps:$4 sm:$0xff]   ;;  %v9983_v49 = vld [vmem:[#allocation4 + $0x284] ss:$8 sps:$4 sm:$0xff]  }
 0x1e8   :  { %887 = vmatprep.subr.bf16.mxu0 %v9923_v47  ;;  %v1067_v46 = vpack.c.bf16 %v11419_v54, %v11413_v45  ;;  %v9951_v47 = vld [vmem:[#allocation4 + $0x1e0] ss:$8 sps:$4 sm:$0xff]  }
 0x1ea   :  { %v11423_v52 = vpop.f32.mrb[20].mxu1 }
 0x1eb   :  { %888 = vmatpush1.bf16.msra.mxu0 %v9921_v50  ;;  %v11425_v57 = vpop.f32.mrb[21].mxu1 }
 0x1ec   :  { %889 = vmatprep.subr.bf16.mxu0 %v9926_v55  ;;  %v9959_v55 = vld [vmem:[#allocation4 + $0x204] ss:$8 sps:$4 sm:$0xff]  }
 0x1ee   :  { %v11427_v61 = vpop.f32.mrb[22].mxu1 }
 0x1ef   :  { %890 = vmatpush1.bf16.msra.mxu0 %v9924_v56  ;;  %v1068_v63 = vpack.c.bf16 %v11427_v61, %v11423_v52  ;;  %v11431_v2 = vpop.f32.mrb[23].mxu1  ;;  %v9984_v52 = vld [vmem:[#allocation4 + $0x290] ss:$8 sps:$4 sm:$0xff]   ;;  %v9989_v61 = vld [vmem:[#allocation4 + $0x2a4] ss:$8 sps:$4 sm:$0xff]  }
 0x1f0   :  { %891 = vmatprep.subr.bf16.mxu0 %v9929_v59  ;;  %v1069_v7 = vpack.c.bf16 %v11431_v2, %v11425_v57  ;;  %v9957_v59 = vld [vmem:[#allocation4 + $0x200] ss:$8 sps:$4 sm:$0xff]   ;;  %v9986_v57 = vld [vmem:[#allocation4 + $0x294] ss:$8 sps:$4 sm:$0xff]  }
 0x1f1   :  { %v9992_v2 = vld [vmem:[#allocation4 + $0x2b4] ss:$8 sps:$4 sm:$0xff]  }
 0x1f2   :  { %v11435_v10 = vpop.f32.mrb[24].mxu1 }
 0x1f3   :  { %892 = vmatpush1.bf16.msra.mxu0 %v9927_v62  ;;  %v11437_v13 = vpop.f32.mrb[25].mxu1 }
 0x1f4   :  { %893 = vmatprep.subr.bf16.mxu0 %v9932_v3  ;;  %v9965_v3 = vld [vmem:[#allocation4 + $0x224] ss:$8 sps:$4 sm:$0xff]  }
 0x1f6   :  { %v11439_v19 = vpop.f32.mrb[26].mxu1 }
 0x1f7   :  { %894 = vmatpush1.bf16.msra.mxu0 %v9930_v12  ;;  %v1070_v23 = vpack.c.bf16 %v11439_v19, %v11435_v10  ;;  %v11443_v25 = vpop.f32.mrb[27].mxu1  ;;  %v9995_v10 = vld [vmem:[#allocation4 + $0x2c4] ss:$8 sps:$4 sm:$0xff]   ;;  %v9998_v19 = vld [vmem:[#allocation4 + $0x2d4] ss:$8 sps:$4 sm:$0xff]  }
 0x1f8   :  { %1231 = vmatprep.subr.bf16.mxu0 %v9935_v17  ;;  %v1071_v31 = vpack.c.bf16 %v11443_v25, %v11437_v13  ;;  %v9963_v17 = vld [vmem:[#allocation4 + $0x220] ss:$8 sps:$4 sm:$0xff]   ;;  %v10001_v25 = vld [vmem:[#allocation4 + $0x2e4] ss:$8 sps:$4 sm:$0xff]  }
 0x1f9   :  { %v9993_v13 = vld [vmem:[#allocation4 + $0x2c0] ss:$8 sps:$4 sm:$0xff]  }
 0x1fa   :  { %904 = vmatmul.mubr.bf16.vlgmr.msra.gmra.mrb[16].mxu0 %v346_v51  ;;  %v11450_v34 = vpop.f32.mrb[28].mxu1  ;;  %v9944_v51 = vld [vmem:[#allocation4 + $0x1b4] ss:$8 sps:$4 sm:$0xff]  }
 0x1fb   :  { %1232 = vmatpush1.bf16.msra.mxu0 %v9933_v22  ;;  %8033 = vmatprep.mubr.msk.bf16.mxu0 %vm653_vm0, %v349_v11  ;;  %v11456_v8 = vpop.f32.mrb[29].mxu1  ;;  %v9942_v11 = vld [vmem:[#allocation4 + $0x1b0] ss:$8 sps:$4 sm:$0xff]  }
 0x1fc   :  { %1233 = vmatprep.subr.bf16.mxu0 %v9938_v28 }
 0x1fe   :  { %v11458_v20 = vpop.f32.mrb[30].mxu1 }
 0x1ff   :  { %1234 = vmatpush1.bf16.msra.mxu0 %v9936_v4  ;;  %v1072_v44 = vpack.c.bf16 %v11458_v20, %v11450_v34  ;;  %v11462_v48 = vpop.f32.mrb[31].mxu1  ;;  %v9968_v4 = vld [vmem:[#allocation4 + $0x234] ss:$8 sps:$4 sm:$0xff]  }
 0x200   :  { %1235 = vmatprep.subr.bf16.mxu0 %v9941_v14  ;;  %v1073_v60 = vpack.c.bf16 %v11462_v48, %v11456_v8  ;;  %v10004_v34 = vld [vmem:[#allocation4 + $0x2f4] ss:$8 sps:$4 sm:$0xff]   ;;  %v10002_v8 = vld [vmem:[#allocation4 + $0x2f0] ss:$8 sps:$4 sm:$0xff]  }
 0x202   :  { %914 = vmatmul.mubr.bf16.gmra.mrb[20].mxu0 %v348_v5  ;;  %v11469_v6 = vpop.f32.mrb[32].mxu1  ;;  %v9950_v5 = vld [vmem:[#allocation4 + $0x1d4] ss:$8 sps:$4 sm:$0xff]  }
 0x203   :  { %1236 = vmatpush1.bf16.msra.mxu0 %v9939_v21  ;;  %8034 = vmatprep.mubr.msk.bf16.mxu0 %vm653_vm0, %v351_v35  ;;  %v11475_v26 = vpop.f32.mrb[33].mxu1  ;;  %v9948_v35 = vld [vmem:[#allocation4 + $0x1d0] ss:$8 sps:$4 sm:$0xff]  }
 0x204   :  { %1237 = vmatprep.subr.bf16.mxu0 %v9944_v51  ;;  %v9966_v21 = vld [vmem:[#allocation4 + $0x230] ss:$8 sps:$4 sm:$0xff]   ;;  %v9971_v51 = vld [vmem:[#allocation4 + $0x244] ss:$8 sps:$4 sm:$0xff]  }
 0x206   :  { %v11477_v33 = vpop.f32.mrb[34].mxu1 }
 0x207   :  { %1238 = vmatpush1.bf16.msra.mxu0 %v9942_v11  ;;  %v1442_v58 = vpack.c.bf16 %v11477_v33, %v11469_v6  ;;  %v11481_v1 = vpop.f32.mrb[35].mxu1  ;;  %v9969_v11 = vld [vmem:[#allocation4 + $0x240] ss:$8 sps:$4 sm:$0xff]  }
 0x208   :  { %1239 = vmatprep.subr.bf16.mxu0 %v9947_v32  ;;  %v1443_v18 = vpack.c.bf16 %v11481_v1, %v11475_v26  ;;  %v9974_v32 = vld [vmem:[#allocation4 + $0x254] ss:$8 sps:$4 sm:$0xff]  }
 0x20a   :  { %924 = vmatmul.mubr.bf16.gmra.mrb[24].mxu0 %v350_v29  ;;  %v11488_v30 = vpop.f32.mrb[36].mxu1  ;;  %v9956_v29 = vld [vmem:[#allocation4 + $0x1f4] ss:$8 sps:$4 sm:$0xff]  }
 0x20b   :  { %1240 = vmatpush1.bf16.msra.mxu0 %v9945_v38  ;;  %8035 = vmatprep.mubr.msk.bf16.mxu0 %vm653_vm0, %v353_v40  ;;  %v11494_v39 = vpop.f32.mrb[37].mxu1  ;;  %v9954_v40 = vld [vmem:[#allocation4 + $0x1f0] ss:$8 sps:$4 sm:$0xff]  }
 0x20c   :  { %1241 = vmatprep.subr.bf16.mxu0 %v9950_v5  ;;  %v9972_v38 = vld [vmem:[#allocation4 + $0x250] ss:$8 sps:$4 sm:$0xff]   ;;  %v9977_v5 = vld [vmem:[#allocation4 + $0x264] ss:$8 sps:$4 sm:$0xff]  }
 0x20e   :  { %v11496_v43 = vpop.f32.mrb[38].mxu1 }
 0x20f   :  { %1242 = vmatpush1.bf16.msra.mxu0 %v9948_v35  ;;  %v1444_v16 = vpack.c.bf16 %v11496_v43, %v11488_v30  ;;  %v11500_v24 = vpop.f32.mrb[39].mxu1  ;;  %v9975_v35 = vld [vmem:[#allocation4 + $0x260] ss:$8 sps:$4 sm:$0xff]  }
 0x210   :  { %1243 = vmatprep.subr.bf16.mxu0 %v9953_v41  ;;  %v1445_v15 = vpack.c.bf16 %v11500_v24, %v11494_v39  ;;  %v9980_v41 = vld [vmem:[#allocation4 + $0x274] ss:$8 sps:$4 sm:$0xff]  }
 0x212   :  { %934 = vmatmul.mubr.bf16.gmra.mrb[28].mxu0 %v352_v36  ;;  %v11507_v37 = vpop.f32.mrb[40].mxu1  ;;  %v9962_v36 = vld [vmem:[#allocation4 + $0x214] ss:$8 sps:$4 sm:$0xff]  }
 0x213   :  { %1244 = vmatpush1.bf16.msra.mxu0 %v9951_v47  ;;  %8060 = vmatprep.mubr.msk.bf16.mxu0 %vm653_vm0, %v1067_v46  ;;  %v11513_v50 = vpop.f32.mrb[41].mxu1  ;;  %v9960_v46 = vld [vmem:[#allocation4 + $0x210] ss:$8 sps:$4 sm:$0xff]  }
 0x214   :  { %1245 = vmatprep.subr.bf16.mxu0 %v9956_v29 }
 0x216   :  { %v11515_v56 = vpop.f32.mrb[42].mxu1 }
 0x217   :  { %1246 = vmatpush1.bf16.msra.mxu0 %v9954_v40  ;;  %v1446_v9 = vpack.c.bf16 %v11515_v56, %v11507_v37  ;;  %v11519_v27 = vpop.f32.mrb[43].mxu1 }
 0x218   :  { %1247 = vmatprep.subr.bf16.mxu0 %v9959_v55  ;;  %v1447_v45 = vpack.c.bf16 %v11519_v27, %v11513_v50 }
 0x21a   :  { %v11523_v54 = vpop.f32.mrb[44].mxu1 }
 0x21b   :  { %1248 = vmatpush1.bf16.msra.mxu0 %v9957_v59  ;;  %v11525_v62 = vpop.f32.mrb[45].mxu1 }
 0x21c   :  { %1249 = vmatprep.subr.bf16.mxu0 %v9962_v36 }
 0x21e   :  { %v11527_v12 = vpop.f32.mrb[46].mxu1 }
 0x21f   :  { %1250 = vmatpush1.bf16.msra.mxu0 %v9960_v46  ;;  %v1448_v22 = vpack.c.bf16 %v11527_v12, %v11523_v54  ;;  %v11531_v28 = vpop.f32.mrb[47].mxu1 }
 0x220   :  { %1251 = vmatprep.subr.bf16.mxu0 %v9965_v3  ;;  %v1449_v14 = vpack.c.bf16 %v11531_v28, %v11525_v62 }
 0x223   :  { %1252 = vmatpush1.bf16.msra.mxu0 %v9963_v17 }
 0x224   :  { %1253 = vmatprep.subr.bf16.mxu0 %v9968_v4 }
 0x227   :  { %1254 = vmatpush1.bf16.msra.mxu0 %v9966_v21 }
 0x228   :  { %1607 = vmatprep.subr.bf16.mxu0 %v9971_v51 }
 0x22a   :  { %1264 = vmatmul.mubr.bf16.vlgmr.msra.gmra.mrb[16].mxu0 %v1066_v53  ;;  %v9981_v53 = vld [vmem:[#allocation4 + $0x280] ss:$8 sps:$4 sm:$0xff]  }
 0x22b   :  { %1608 = vmatpush1.bf16.msra.mxu0 %v9969_v11  ;;  %8061 = vmatprep.mubr.msk.bf16.mxu0 %vm653_vm0, %v1069_v7  ;;  %v9990_v7 = vld [vmem:[#allocation4 + $0x2b0] ss:$8 sps:$4 sm:$0xff]  }
 0x22c   :  { %1609 = vmatprep.subr.bf16.mxu0 %v9974_v32 }
 0x22f   :  { %1610 = vmatpush1.bf16.msra.mxu0 %v9972_v38 }
 0x230   :  { %1611 = vmatprep.subr.bf16.mxu0 %v9977_v5 }
 0x232   :  { %1274 = vmatmul.mubr.bf16.gmra.mrb[20].mxu0 %v1068_v63  ;;  %v9987_v63 = vld [vmem:[#allocation4 + $0x2a0] ss:$8 sps:$4 sm:$0xff]  }
 0x233   :  { %1612 = vmatpush1.bf16.msra.mxu0 %v9975_v35  ;;  %8062 = vmatprep.mubr.msk.bf16.mxu0 %vm653_vm0, %v1071_v31  ;;  %v9999_v31 = vld [vmem:[#allocation4 + $0x2e0] ss:$8 sps:$4 sm:$0xff]  }
 0x234   :  { %1613 = vmatprep.subr.bf16.mxu0 %v9980_v41 }
 0x237   :  { %1614 = vmatpush1.bf16.msra.mxu0 %v9978_v42 }
 0x238   :  { %1615 = vmatprep.subr.bf16.mxu0 %v9983_v49 }
 0x23a   :  { %1284 = vmatmul.mubr.bf16.gmra.mrb[24].mxu0 %v1070_v23  ;;  %v9996_v23 = vld [vmem:[#allocation4 + $0x2d0] ss:$8 sps:$4 sm:$0xff]  }
 0x23b   :  { %1616 = vmatpush1.bf16.msra.mxu0 %v9981_v53  ;;  %8063 = vmatprep.mubr.msk.bf16.mxu0 %vm653_vm0, %v1073_v60 }
 0x23c   :  { %1617 = vmatprep.subr.bf16.mxu0 %v9986_v57 }
 0x23f   :  { %1618 = vmatpush1.bf16.msra.mxu0 %v9984_v52 }
 0x240   :  { %1619 = vmatprep.subr.bf16.mxu0 %v9989_v61 }
 0x242   :  { %1294 = vmatmul.mubr.bf16.gmra.mrb[28].mxu0 %v1072_v44 }
 0x243   :  { %1620 = vmatpush1.bf16.msra.mxu0 %v9987_v63  ;;  %8088 = vmatprep.mubr.msk.bf16.mxu0 %vm653_vm0, %v1443_v18 }
 0x244   :  { %1621 = vmatprep.subr.bf16.mxu0 %v9992_v2 }
 0x247   :  { %1622 = vmatpush1.bf16.msra.mxu0 %v9990_v7 }
 0x248   :  { %1623 = vmatprep.subr.bf16.mxu0 %v9995_v10 }
 0x24b   :  { %1624 = vmatpush1.bf16.msra.mxu0 %v9993_v13  ;;  %v1744_v13 = vld [vmem:[#allocation6] sm:$0xff] }
 0x24c   :  { %1625 = vmatprep.subr.bf16.mxu0 %v9998_v19  ;;  %v2455_v19 = vld [vmem:[#allocation6 + $0x40] sm:$0xff] }
 0x24f   :  { %1626 = vmatpush1.bf16.msra.mxu0 %v9996_v23  ;;  %v1745_v23 = vld [vmem:[#allocation6 + $0x8] sm:$0xff] }
 0x250   :  { %1627 = vmatprep.subr.bf16.mxu0 %v10001_v25  ;;  %v2456_v25 = vld [vmem:[#allocation6 + $0x48] sm:$0xff] }
 0x253   :  { %1628 = vmatpush1.bf16.msra.mxu0 %v9999_v31  ;;  %v1746_v31 = vld [vmem:[#allocation6 + $0x10] sm:$0xff] }
 0x254   :  { %1629 = vmatprep.subr.bf16.mxu0 %v10004_v34  ;;  %v2457_v34 = vld [vmem:[#allocation6 + $0x50] sm:$0xff] }
 0x257   :  { %1630 = vmatpush1.bf16.msra.mxu0 %v10002_v8  ;;  %v1747_v8 = vld [vmem:[#allocation6 + $0x18] sm:$0xff] }
 0x25a   :  { %1640 = vmatmul.mubr.bf16.vlgmr.msra.gmra.mrb[16].mxu0 %v1442_v58 }
 0x25b   :  { %8089 = vmatprep.mubr.msk.bf16.mxu0 %vm653_vm0, %v1445_v15 }
 0x262   :  { %1650 = vmatmul.mubr.bf16.gmra.mrb[20].mxu0 %v1444_v16 }
 0x263   :  { %8090 = vmatprep.mubr.msk.bf16.mxu0 %vm653_vm0, %v1447_v45 }
 0x26a   :  { %1660 = vmatmul.mubr.bf16.gmra.mrb[24].mxu0 %v1446_v9 }
 0x26b   :  { %8091 = vmatprep.mubr.msk.bf16.mxu0 %vm653_vm0, %v1449_v14 }
 0x272   :  { %1670 = vmatmul.mubr.bf16.gmra.mrb[28].mxu0 %v1448_v22 }
 0x273   :  { %2535 = vmatprep.mubr.f32.mxu0 %v10872_v0 }
 0x32d   :  { %v1641_v20 = vpop.f32.mrb[16].mxu0 }
 0x32e   :  { %v1712_v44 = vmul.f32 0.2, %v1641_v20  ;;  %v1643_v48 = vpop.f32.mrb[17].mxu0  ;;  %vm1696_vm1 = vcmp.ge.f32.partialorder %v1641_v20, 0.0 }
 0x32f   :  { %v1713_v60 = vmul.f32 0.2, %v1643_v48  ;;  %v1645_v6 = vpop.f32.mrb[18].mxu0  ;;  %vm1697_vm2 = vcmp.ge.f32.partialorder %v1643_v48, 0.0 }
 0x330   :  { %vm1698_vm3 = vcmp.ge.f32.partialorder %v1645_v6, 0.0  ;;  %v1714_v26 = vmul.f32 0.2, %v1645_v6  ;;  %v1647_v33 = vpop.f32.mrb[19].mxu0  ;;  %v1728_v1 = vsel %vm1696_vm1, %v1641_v20, %v1712_v44  ;;  %v2458_v20 = vld [vmem:[#allocation6 + $0x58] sm:$0xff] }
 0x331   :  { %vm1699_vm4 = vcmp.ge.f32.partialorder %v1647_v33, 0.0  ;;  %v1715_v58 = vmul.f32 0.2, %v1647_v33  ;;  %v1729_v30 = vsel %vm1697_vm2, %v1643_v48, %v1713_v60  ;;  %v10007_v44 = vld [vmem:[%s13868_s15 + $0x104] ss:$8 sps:$4 sm:$0xff]   ;;  %vm3414_vm2 = vcmask 130048  }
 0x332   :  { %v1730_v18 = vsel %vm1698_vm3, %v1645_v6, %v1714_v26  ;;  %v1886_v48 = vld [vmem:[#allocation6 + $0x20] sm:$0xff]  ;;  %v10010_v26 = vld [vmem:[%s13868_s15 + $0x114] ss:$8 sps:$4 sm:$0xff]  }
 0x333   :  { %v11588_v39 = vpack.c.bf16 %v1730_v18, %v1728_v1  ;;  %v1731_v43 = vsel %vm1699_vm4, %v1647_v33, %v1715_v58  ;;  %v10005_v60 = vld [vmem:[%s13868_s15 + $0x100] ss:$8 sps:$4 sm:$0xff]   ;;  %v10008_v58 = vld [vmem:[%s13868_s15 + $0x110] ss:$8 sps:$4 sm:$0xff]   ;;  %v10013_v18 = vld [vmem:[%s13868_s15 + $0x124] ss:$8 sps:$4 sm:$0xff]  }
 0x334   :  { %v11590_v47 = vpack.c.bf16 %v1731_v43, %v1729_v30  ;;  %v2819_v6 = vld [vmem:[#allocation6 + $0x60] sm:$0xff]  ;;  %v1887_v33 = vld [vmem:[#allocation6 + $0x28] sm:$0xff]  ;;  %v1888_v30 = vld [vmem:[#allocation6 + $0x30] sm:$0xff] }
 0x335   :  { %v1651_v16 = vpop.f32.mrb[20].mxu0  ;;  %v2820_v1 = vld [vmem:[#allocation6 + $0x68] sm:$0xff]  ;;  %v10016_v43 = vld [vmem:[%s13868_s15 + $0x134] ss:$8 sps:$4 sm:$0xff]  }
 0x336   :  { %v1716_v24 = vmul.f32 0.2, %v1651_v16  ;;  %v1653_v29 = vpop.f32.mrb[21].mxu0  ;;  %9392 = vmatprep.subr.bf16.mxu1 %v11590_v47  ;;  %9424 = vmatprep.subr.bf16.mxu0 %v11590_v47  ;;  %vm1700_vm5 = vcmp.ge.f32.partialorder %v1651_v16, 0.0 }
 0x337   :  { %v1717_v15 = vmul.f32 0.2, %v1653_v29  ;;  %v1655_v37 = vpop.f32.mrb[22].mxu0  ;;  %9394 = vmatpush1.bf16.msra.mxu1 %v11588_v39  ;;  %9426 = vmatpush1.bf16.msra.mxu0 %v11588_v39  ;;  %vm1701_vm6 = vcmp.ge.f32.partialorder %v1653_v29, 0.0 }
 0x338   :  { %vm1702_vm7 = vcmp.ge.f32.partialorder %v1655_v37, 0.0  ;;  %v1718_v40 = vmul.f32 0.2, %v1655_v37  ;;  %v1657_v50 = vpop.f32.mrb[23].mxu0  ;;  %v1732_v56 = vsel %vm1700_vm5, %v1651_v16, %v1716_v24  ;;  %v10014_v16 = vld [vmem:[%s13868_s15 + $0x130] ss:$8 sps:$4 sm:$0xff]  }
 0x339   :  { %vm1703_vm8 = vcmp.ge.f32.partialorder %v1657_v50, 0.0  ;;  %v1719_v55 = vmul.f32 0.2, %v1657_v50  ;;  %v1733_v9 = vsel %vm1701_vm6, %v1653_v29, %v1717_v15  ;;  %v10019_v24 = vld [vmem:[%s13868_s15 + $0x144] ss:$8 sps:$4 sm:$0xff]  }
 0x33a   :  { %v1734_v59 = vsel %vm1702_vm7, %v1655_v37, %v1718_v40  ;;  %v10017_v29 = vld [vmem:[%s13868_s15 + $0x140] ss:$8 sps:$4 sm:$0xff]   ;;  %v10022_v15 = vld [vmem:[%s13868_s15 + $0x154] ss:$8 sps:$4 sm:$0xff]   ;;  %v10020_v37 = vld [vmem:[%s13868_s15 + $0x150] ss:$8 sps:$4 sm:$0xff]  }
 0x33b   :  { %v11596_v27 = vpack.c.bf16 %v1734_v59, %v1732_v56  ;;  %v1735_v36 = vsel %vm1703_vm8, %v1657_v50, %v1719_v55  ;;  %v10025_v40 = vld [vmem:[%s13868_s15 + $0x164] ss:$8 sps:$4 sm:$0xff]   ;;  %v10023_v50 = vld [vmem:[%s13868_s15 + $0x160] ss:$8 sps:$4 sm:$0xff]   ;;  %v10028_v55 = vld [vmem:[%s13868_s15 + $0x174] ss:$8 sps:$4 sm:$0xff]  }
 0x33c   :  { %v9395_v45 = vpack.c.bf16 %v1735_v36, %v1733_v9  ;;  %v10026_v56 = vld [vmem:[%s13868_s15 + $0x170] ss:$8 sps:$4 sm:$0xff]   ;;  %v10031_v59 = vld [vmem:[%s13868_s15 + $0x184] ss:$8 sps:$4 sm:$0xff]   ;;  %v10029_v9 = vld [vmem:[%s13868_s15 + $0x180] ss:$8 sps:$4 sm:$0xff]  }
 0x33d   :  { %v1661_v54 = vpop.f32.mrb[24].mxu0  ;;  %v10032_v36 = vld [vmem:[%s13868_s15 + $0x190] ss:$8 sps:$4 sm:$0xff]  }
 0x33e   :  { %v1720_v46 = vmul.f32 0.2, %v1661_v54  ;;  %v1663_v62 = vpop.f32.mrb[25].mxu0  ;;  %9396 = vmatprep.subr.bf16.mxu1 %v9395_v45  ;;  %9428 = vmatprep.subr.bf16.mxu0 %v9395_v45  ;;  %vm1704_vm9 = vcmp.ge.f32.partialorder %v1661_v54, 0.0 }
 0x33f   :  { %v1721_v3 = vmul.f32 0.2, %v1663_v62  ;;  %v1665_v12 = vpop.f32.mrb[26].mxu0  ;;  %9398 = vmatpush1.bf16.msra.mxu1 %v11596_v27  ;;  %9430 = vmatpush1.bf16.msra.mxu0 %v11596_v27  ;;  %vm1705_vm10 = vcmp.ge.f32.partialorder %v1663_v62, 0.0 }
 0x340   :  { %vm1706_vm11 = vcmp.ge.f32.partialorder %v1665_v12, 0.0  ;;  %v1722_v17 = vmul.f32 0.2, %v1665_v12  ;;  %v1667_v22 = vpop.f32.mrb[27].mxu0  ;;  %v1736_v4 = vsel %vm1704_vm9, %v1661_v54, %v1720_v46  ;;  %v10035_v54 = vld [vmem:[%s13868_s15 + $0x1a0] ss:$8 sps:$4 sm:$0xff]  }
 0x341   :  { %vm1707_vm12 = vcmp.ge.f32.partialorder %v1667_v22, 0.0  ;;  %v1723_v28 = vmul.f32 0.2, %v1667_v22  ;;  %v1737_v21 = vsel %vm1705_vm10, %v1663_v62, %v1721_v3  ;;  %v2821_v46 = vld [vmem:[#allocation6 + $0x70] sm:$0xff]  ;;  %v2822_v3 = vld [vmem:[#allocation6 + $0x78] sm:$0xff] }
 0x342   :  { %v1738_v14 = vsel %vm1706_vm11, %v1665_v12, %v1722_v17  ;;  %v10040_v62 = vld [vmem:[%s13868_s15 + $0x1b4] ss:$8 sps:$4 sm:$0xff]   ;;  %v10038_v12 = vld [vmem:[%s13868_s15 + $0x1b0] ss:$8 sps:$4 sm:$0xff]   ;;  %v10041_v17 = vld [vmem:[%s13868_s15 + $0x1c0] ss:$8 sps:$4 sm:$0xff]  }
 0x343   :  { %v9401_v51 = vpack.c.bf16 %v1738_v14, %v1736_v4  ;;  %v1739_v11 = vsel %vm1707_vm12, %v1667_v22, %v1723_v28  ;;  %v10043_v22 = vld [vmem:[%s13868_s15 + $0x1c4] ss:$8 sps:$4 sm:$0xff]   ;;  %v10046_v28 = vld [vmem:[%s13868_s15 + $0x1d4] ss:$8 sps:$4 sm:$0xff]   ;;  %v10044_v4 = vld [vmem:[%s13868_s15 + $0x1d0] ss:$8 sps:$4 sm:$0xff]  }
 0x344   :  { %v9399_v32 = vpack.c.bf16 %v1739_v11, %v1737_v21  ;;  %v10047_v14 = vld [vmem:[%s13868_s15 + $0x1e0] ss:$8 sps:$4 sm:$0xff]   ;;  %v10049_v21 = vld [vmem:[%s13868_s15 + $0x1e4] ss:$8 sps:$4 sm:$0xff]   ;;  %v10050_v11 = vld [vmem:[%s13868_s15 + $0x1f0] ss:$8 sps:$4 sm:$0xff]  }
 0x345   :  { %v1671_v38 = vpop.f32.mrb[28].mxu0  ;;  %vm3621_vm11 = vcmask 261120  }
 0x346   :  { %v1724_v5 = vmul.f32 0.2, %v1671_v38  ;;  %v1673_v35 = vpop.f32.mrb[29].mxu0  ;;  %9400 = vmatprep.subr.bf16.mxu1 %v9399_v32  ;;  %9432 = vmatprep.subr.bf16.mxu0 %v9399_v32  ;;  %vm1708_vm13 = vcmp.ge.f32.partialorder %v1671_v38, 0.0 }
 0x347   :  { %v1725_v41 = vmul.f32 0.2, %v1673_v35  ;;  %v1675_v42 = vpop.f32.mrb[30].mxu0  ;;  %9402 = vmatpush1.bf16.msra.mxu1 %v9401_v51  ;;  %9434 = vmatpush1.bf16.msra.mxu0 %v9401_v51  ;;  %vm1709_vm14 = vcmp.ge.f32.partialorder %v1673_v35, 0.0 }
 0x348   :  { %vm1710_vm15 = vcmp.ge.f32.partialorder %v1675_v42, 0.0  ;;  %v1726_v49 = vmul.f32 0.2, %v1675_v42  ;;  %v1677_v53 = vpop.f32.mrb[31].mxu0  ;;  %v1740_v52 = vsel %vm1708_vm13, %v1671_v38, %v1724_v5 }
 0x349   :  { %vm1711_vm1 = vcmp.ge.f32.partialorder %v1677_v53, 0.0  ;;  %v1727_v57 = vmul.f32 0.2, %v1677_v53  ;;  %v1741_v63 = vsel %vm1709_vm14, %v1673_v35, %v1725_v41 }
 0x34a   :  { %v1742_v61 = vsel %vm1710_vm15, %v1675_v42, %v1726_v49 }
 0x34b   :  { %v9405_v2 = vpack.c.bf16 %v1742_v61, %v1740_v52  ;;  %v1743_v7 = vsel %vm1711_vm1, %v1677_v53, %v1727_v57 }
 0x34c   :  { %v9403_v10 = vpack.c.bf16 %v1743_v7, %v1741_v63 }
 0x34e   :  { %9404 = vmatprep.subr.bf16.mxu1 %v9403_v10  ;;  %9436 = vmatprep.subr.bf16.mxu0 %v9403_v10 }
 0x34f   :  { %9406 = vmatpush1.bf16.msra.mxu1 %v9405_v2  ;;  %9438 = vmatpush1.bf16.msra.mxu0 %v9405_v2 }
 0x350   :  { %9408 = vmatprep.subr.bf16.mxu1 %v11590_v47  ;;  %9440 = vmatprep.subr.bf16.mxu0 %v11590_v47  ;;  %v1889_v47 = vld [vmem:[#allocation6 + $0x38] sm:$0xff] }
 0x352   :  { %8092 = vmatmul.mubr.msk.f32.vlgmr.msra.gmra.mrb[48].mxu1 %vm653_vm0, %v1744_v13  ;;  %8196 = vmatmul.mubr.msk.f32.vlgmr.msra.gmra.mrb[32].mxu0 %vm653_vm0, %v2455_v19 }
 0x353   :  { %9410 = vmatpush1.bf16.msra.mxu1 %v11588_v39  ;;  %9442 = vmatpush1.bf16.msra.mxu0 %v11588_v39  ;;  %v10011_v39 = vld [vmem:[%s13868_s15 + $0x120] ss:$8 sps:$4 sm:$0xff]  }
 0x354   :  { %9412 = vmatprep.subr.bf16.mxu1 %v9395_v45  ;;  %9444 = vmatprep.subr.bf16.mxu0 %v9395_v45  ;;  %v10037_v45 = vld [vmem:[%s13868_s15 + $0x1a4] ss:$8 sps:$4 sm:$0xff]  }
 0x355   :  { %1830 = vmatprep.mubr.f32.mxu1 %v10872_v0  ;;  %2541 = vmatprep.mubr.f32.mxu0 %v10872_v0 }
 0x356   :  { %8093 = vmatmul.mubr.msk.f32.gmra.mrb[50].mxu1 %vm653_vm0, %v1745_v23  ;;  %8197 = vmatmul.mubr.msk.f32.gmra.mrb[34].mxu0 %vm653_vm0, %v2456_v25 }
 0x357   :  { %9414 = vmatpush1.bf16.msra.mxu1 %v11596_v27  ;;  %9446 = vmatpush1.bf16.msra.mxu0 %v11596_v27  ;;  %v10034_v27 = vld [vmem:[%s13868_s15 + $0x194] ss:$8 sps:$4 sm:$0xff]  }
 0x358   :  { %9416 = vmatprep.subr.bf16.mxu1 %v9399_v32  ;;  %9448 = vmatprep.subr.bf16.mxu0 %v9399_v32  ;;  %v10055_v32 = vld [vmem:[%s13868_s15 + $0x4] ss:$8 sps:$4 sm:$0xff]  }
 0x359   :  { %1836 = vmatprep.mubr.f32.mxu1 %v10872_v0  ;;  %2547 = vmatprep.mubr.f32.mxu0 %v10872_v0 }
 0x35a   :  { %8094 = vmatmul.mubr.msk.f32.gmra.mrb[52].mxu1 %vm653_vm0, %v1746_v31  ;;  %8198 = vmatmul.mubr.msk.f32.gmra.mrb[36].mxu0 %vm653_vm0, %v2457_v34 }
 0x35b   :  { %9418 = vmatpush1.bf16.msra.mxu1 %v9401_v51  ;;  %9450 = vmatpush1.bf16.msra.mxu0 %v9401_v51  ;;  %v10052_v51 = vld [vmem:[%s13868_s15 + $0x1f4] ss:$8 sps:$4 sm:$0xff]  }
 0x35c   :  { %9420 = vmatprep.subr.bf16.mxu1 %v9403_v10  ;;  %9452 = vmatprep.subr.bf16.mxu0 %v9403_v10 }
 0x35d   :  { %1842 = vmatprep.mubr.f32.mxu1 %v10872_v0  ;;  %2553 = vmatprep.mubr.f32.mxu0 %v10872_v0 }
 0x35e   :  { %8095 = vmatmul.mubr.msk.f32.gmra.mrb[54].mxu1 %vm653_vm0, %v1747_v8  ;;  %8199 = vmatmul.mubr.msk.f32.gmra.mrb[38].mxu0 %vm653_vm0, %v2458_v20 }
 0x35f   :  { %9422 = vmatpush1.bf16.msra.mxu1 %v9405_v2  ;;  %9454 = vmatpush1.bf16.msra.mxu0 %v9405_v2 }
 0x360   :  { %1966 = vmatprep.mubr.f32.mxu1 %v10872_v0  ;;  %2188 = vmatprep.subr.bf16.mxu1 %v10007_v44 }
 0x361   :  { %2899 = vmatprep.mubr.f32.mxu0 %v10872_v0 }
 0x362   :  { %8096 = vmatmul.mubr.msk.f32.vlgmr.msra.gmra.mrb[56].mxu1 %vm653_vm0, %v1886_v48  ;;  %8264 = vmatmul.mubr.msk.f32.vlgmr.msra.gmra.mrb[40].mxu0 %vm653_vm0, %v2819_v6  ;;  %v10058_v6 = vld [vmem:[%s13868_s15 + $0x14] ss:$8 sps:$4 sm:$0xff]  }
 0x363   :  { %1972 = vmatprep.mubr.f32.mxu1 %v10872_v0  ;;  %2189 = vmatpush1.bf16.msra.mxu1 %v10005_v60  ;;  %v10053_v60 = vld [vmem:[%s13868_s15] ss:$8 sps:$4 sm:$0xff]  }
 0x364   :  { %2190 = vmatprep.subr.bf16.mxu1 %v10010_v26  ;;  %2905 = vmatprep.mubr.f32.mxu0 %v10872_v0 }
 0x366   :  { %8097 = vmatmul.mubr.msk.f32.gmra.mrb[58].mxu1 %vm653_vm0, %v1887_v33  ;;  %8265 = vmatmul.mubr.msk.f32.gmra.mrb[42].mxu0 %vm653_vm0, %v2820_v1  ;;  %v10061_v1 = vld [vmem:[%s13868_s15 + $0x24] ss:$8 sps:$4 sm:$0xff]  }
 0x367   :  { %1978 = vmatprep.mubr.f32.mxu1 %v10872_v0  ;;  %2191 = vmatpush1.bf16.msra.mxu1 %v10008_v58  ;;  %v10056_v58 = vld [vmem:[%s13868_s15 + $0x10] ss:$8 sps:$4 sm:$0xff]  }
 0x368   :  { %2192 = vmatprep.subr.bf16.mxu1 %v10013_v18  ;;  %2911 = vmatprep.mubr.f32.mxu0 %v10872_v0 }
 0x36a   :  { %8098 = vmatmul.mubr.msk.f32.gmra.mrb[60].mxu1 %vm653_vm0, %v1888_v30  ;;  %8266 = vmatmul.mubr.msk.f32.gmra.mrb[44].mxu0 %vm653_vm0, %v2821_v46  ;;  %v10083_v46 = vld [vmem:[%s13868_s15 + $0xa0] ss:$8 sps:$4 sm:$0xff]  }
 0x36b   :  { %1984 = vmatprep.mubr.f32.mxu1 %v10872_v0  ;;  %2193 = vmatpush1.bf16.msra.mxu1 %v10011_v39 }
 0x36c   :  { %2194 = vmatprep.subr.bf16.mxu1 %v10016_v43  ;;  %2917 = vmatprep.mubr.f32.mxu0 %v10872_v0 }
 0x36e   :  { %8099 = vmatmul.mubr.msk.f32.gmra.mrb[62].mxu1 %vm653_vm0, %v1889_v47  ;;  %8267 = vmatmul.mubr.msk.f32.gmra.mrb[46].mxu0 %vm653_vm0, %v2822_v3  ;;  %v10059_v47 = vld [vmem:[%s13868_s15 + $0x20] ss:$8 sps:$4 sm:$0xff]   ;;  %v10086_v3 = vld [vmem:[%s13868_s15 + $0xb0] ss:$8 sps:$4 sm:$0xff]  }
 0x36f   :  { %2195 = vmatpush1.bf16.msra.mxu1 %v10014_v16  ;;  %v10064_v16 = vld [vmem:[%s13868_s15 + $0x34] ss:$8 sps:$4 sm:$0xff]  }
 0x370   :  { %2196 = vmatprep.subr.bf16.mxu1 %v10019_v24  ;;  %v10062_v24 = vld [vmem:[%s13868_s15 + $0x30] ss:$8 sps:$4 sm:$0xff]  }
 0x373   :  { %2197 = vmatpush1.bf16.msra.mxu1 %v10017_v29  ;;  %v10067_v29 = vld [vmem:[%s13868_s15 + $0x44] ss:$8 sps:$4 sm:$0xff]  }
 0x374   :  { %2198 = vmatprep.subr.bf16.mxu1 %v10022_v15  ;;  %v10065_v15 = vld [vmem:[%s13868_s15 + $0x40] ss:$8 sps:$4 sm:$0xff]  }
 0x377   :  { %2199 = vmatpush1.bf16.msra.mxu1 %v10020_v37  ;;  %v10070_v37 = vld [vmem:[%s13868_s15 + $0x54] ss:$8 sps:$4 sm:$0xff]  }
 0x378   :  { %2200 = vmatprep.subr.bf16.mxu1 %v10025_v40  ;;  %v10068_v40 = vld [vmem:[%s13868_s15 + $0x50] ss:$8 sps:$4 sm:$0xff]  }
 0x37b   :  { %2201 = vmatpush1.bf16.msra.mxu1 %v10023_v50  ;;  %v10073_v50 = vld [vmem:[%s13868_s15 + $0x64] ss:$8 sps:$4 sm:$0xff]  }
 0x37c   :  { %2202 = vmatprep.subr.bf16.mxu1 %v10028_v55  ;;  %v10071_v55 = vld [vmem:[%s13868_s15 + $0x60] ss:$8 sps:$4 sm:$0xff]  }
 0x37f   :  { %2203 = vmatpush1.bf16.msra.mxu1 %v10026_v56  ;;  %v10076_v56 = vld [vmem:[%s13868_s15 + $0x74] ss:$8 sps:$4 sm:$0xff]  }
 0x380   :  { %2204 = vmatprep.subr.bf16.mxu1 %v10031_v59  ;;  %v10074_v59 = vld [vmem:[%s13868_s15 + $0x70] ss:$8 sps:$4 sm:$0xff]  }
 0x383   :  { %2205 = vmatpush1.bf16.msra.mxu1 %v10029_v9  ;;  %v10079_v9 = vld [vmem:[%s13868_s15 + $0x84] ss:$8 sps:$4 sm:$0xff]  }
 0x384   :  { %2206 = vmatprep.subr.bf16.mxu1 %v10034_v27  ;;  %v10077_v27 = vld [vmem:[%s13868_s15 + $0x80] ss:$8 sps:$4 sm:$0xff]  }
 0x387   :  { %2207 = vmatpush1.bf16.msra.mxu1 %v10032_v36  ;;  %v10082_v36 = vld [vmem:[%s13868_s15 + $0x94] ss:$8 sps:$4 sm:$0xff]  }
 0x388   :  { %2208 = vmatprep.subr.bf16.mxu1 %v10037_v45  ;;  %v10080_v45 = vld [vmem:[%s13868_s15 + $0x90] ss:$8 sps:$4 sm:$0xff]  }
 0x38b   :  { %2209 = vmatpush1.bf16.msra.mxu1 %v10035_v54  ;;  %v10085_v54 = vld [vmem:[%s13868_s15 + $0xa4] ss:$8 sps:$4 sm:$0xff]  }
 0x38c   :  { %2210 = vmatprep.subr.bf16.mxu1 %v10040_v62  ;;  %v10088_v62 = vld [vmem:[%s13868_s15 + $0xb4] ss:$8 sps:$4 sm:$0xff]  }
 0x38f   :  { %2211 = vmatpush1.bf16.msra.mxu1 %v10038_v12  ;;  %v10091_v12 = vld [vmem:[%s13868_s15 + $0xc4] ss:$8 sps:$4 sm:$0xff]  }
 0x390   :  { %2212 = vmatprep.subr.bf16.mxu1 %v10043_v22 }
 0x393   :  { %2213 = vmatpush1.bf16.msra.mxu1 %v10041_v17 }
 0x394   :  { %2214 = vmatprep.subr.bf16.mxu1 %v10046_v28  ;;  %v10089_v28 = vld [vmem:[%s13868_s15 + $0xc0] ss:$8 sps:$4 sm:$0xff]  }
 0x397   :  { %2215 = vmatpush1.bf16.msra.mxu1 %v10044_v4 }
 0x398   :  { %2216 = vmatprep.subr.bf16.mxu1 %v10049_v21 }
 0x39b   :  { %2217 = vmatpush1.bf16.msra.mxu1 %v10047_v14  ;;  %v10094_v14 = vld [vmem:[%s13868_s15 + $0xd4] ss:$8 sps:$4 sm:$0xff]  }
 0x39c   :  { %2218 = vmatprep.subr.bf16.mxu1 %v10052_v51 }
 0x39f   :  { %2219 = vmatpush1.bf16.msra.mxu1 %v10050_v11 }
 0x3a0   :  { %2401 = vmatprep.subr.bf16.mxu1 %v10055_v32  ;;  %v10092_v32 = vld [vmem:[%s13868_s15 + $0xd0] ss:$8 sps:$4 sm:$0xff]  }
 0x425   :  { %v11735_v38 = vpop.f32.mrb[48].mxu1  ;;  %v11753_v7 = vpop.f32.mrb[32].mxu0 }
 0x426   :  { %v1828_v5 = vpop.f32.mrb[49].mxu1  ;;  %v11755_v10 = vpop.f32.mrb[33].mxu0 }
 0x429   :  { %v11737_v35 = vpop.f32.mrb[50].mxu1  ;;  %v11757_v19 = vpop.f32.mrb[34].mxu0 }
 0x42a   :  { %v1849_v41 = vpack.c.bf16 %v11737_v35, %v11735_v38  ;;  %v1834_v42 = vpop.f32.mrb[51].mxu1  ;;  %v2560_v25 = vpack.c.bf16 %v11757_v19, %v11753_v7  ;;  %v11761_v31 = vpop.f32.mrb[35].mxu0  ;;  %v10107_v38 = vld [vmem:[%s13868_s15 + $0x220] ss:$8 sps:$4 sm:$0xff]   ;;  %v10112_v35 = vld [vmem:[%s13868_s15 + $0x234] ss:$8 sps:$4 sm:$0xff]  }
 0x42b   :  { %v1850_v49 = vpack.c.bf16 %v1834_v42, %v1828_v5  ;;  %v2561_v34 = vpack.c.bf16 %v11761_v31, %v11755_v10  ;;  %v10097_v5 = vld [vmem:[%s13868_s15 + $0xe4] ss:$8 sps:$4 sm:$0xff]   ;;  %v10155_v7 = vld [vmem:[%s13868_s15 + $0x320] ss:$8 sps:$4 sm:$0xff]   ;;  %v10160_v19 = vld [vmem:[%s13868_s15 + $0x334] ss:$8 sps:$4 sm:$0xff]  }
 0x42c   :  { %v10115_v10 = vld [vmem:[%s13868_s15 + $0x244] ss:$8 sps:$4 sm:$0xff]  }
 0x42d   :  { %v11741_v53 = vpop.f32.mrb[52].mxu1  ;;  %v11837_v17 = vpop.f32.mrb[36].mxu0 }
 0x42e   :  { %v11743_v57 = vpop.f32.mrb[53].mxu1  ;;  %v11839_v22 = vpop.f32.mrb[37].mxu0 }
 0x431   :  { %v11745_v52 = vpop.f32.mrb[54].mxu1  ;;  %v11844_v4 = vpop.f32.mrb[38].mxu0 }
 0x432   :  { %v1851_v61 = vpack.c.bf16 %v11745_v52, %v11741_v53  ;;  %v11749_v63 = vpop.f32.mrb[55].mxu1  ;;  %v2562_v21 = vpack.c.bf16 %v11844_v4, %v11837_v17  ;;  %v11851_v51 = vpop.f32.mrb[39].mxu0  ;;  %v3227_v53 = vld [vmem:[%s13869_s14 + $0x8] sm:$0xff]  ;;  %v3244_v52 = vld [vmem:[%s13869_s14 + $0x90] sm:$0xff] }
 0x433   :  { %v1852_v2 = vpack.c.bf16 %v11749_v63, %v11743_v57  ;;  %v2563_v11 = vpack.c.bf16 %v11851_v51, %v11839_v22  ;;  %v3242_v57 = vld [vmem:[%s13869_s14 + $0x80] sm:$0xff]  ;;  %v3243_v63 = vld [vmem:[%s13869_s14 + $0x88] sm:$0xff]  ;;  %v10166_v4 = vld [vmem:[%s13868_s15 + $0x354] ss:$8 sps:$4 sm:$0xff]  }
 0x434   :  { %v10163_v22 = vld [vmem:[%s13868_s15 + $0x344] ss:$8 sps:$4 sm:$0xff]   ;;  %v10161_v17 = vld [vmem:[%s13868_s15 + $0x340] ss:$8 sps:$4 sm:$0xff]  }
 0x435   :  { %v1968_v13 = vpop.f32.mrb[56].mxu1  ;;  %v11861_v42 = vpop.f32.mrb[40].mxu0  ;;  %v10169_v51 = vld [vmem:[%s13868_s15 + $0x364] ss:$8 sps:$4 sm:$0xff]  }
 0x436   :  { %v1970_v23 = vpop.f32.mrb[57].mxu1 }
 0x439   :  { %v1974_v8 = vpop.f32.mrb[58].mxu1 }
 0x43a   :  { %v1991_v20 = vpack.c.bf16 %v1974_v8, %v1968_v13  ;;  %v1976_v44 = vpop.f32.mrb[59].mxu1  ;;  %v11866_v13 = vpop.f32.mrb[41].mxu0 }
 0x43b   :  { %v1992_v48 = vpack.c.bf16 %v1976_v44, %v1970_v23  ;;  %v10100_v23 = vld [vmem:[%s13868_s15 + $0xf4] ss:$8 sps:$4 sm:$0xff]   ;;  %v11871_v8 = vpop.f32.mrb[42].mxu0 }
 0x43c   :  { %v11875_v44 = vpop.f32.mrb[43].mxu0 }
 0x43d   :  { %2220 = vmatprep.mubr.bf16.mxu1 %v1992_v48  ;;  %v1980_v26 = vpop.f32.mrb[60].mxu1  ;;  %v2925_v48 = vpack.c.bf16 %v11875_v44, %v11866_v13  ;;  %v10172_v13 = vld [vmem:[%s13868_s15 + $0x374] ss:$8 sps:$4 sm:$0xff]   ;;  %v10170_v44 = vld [vmem:[%s13868_s15 + $0x370] ss:$8 sps:$4 sm:$0xff]  }
 0x43e   :  { %2221 = vmatmul.mubr.bf16.vlgmr.msra.gmra.mrb[64].mxu1 %v1991_v20  ;;  %v1982_v33 = vpop.f32.mrb[61].mxu1  ;;  %v2924_v20 = vpack.c.bf16 %v11871_v8, %v11861_v42  ;;  %v3230_v8 = vld [vmem:[%s13869_s14 + $0x20] sm:$0xff] }
 0x43f   :  { %2402 = vmatpush1.bf16.msra.mxu1 %v10053_v60  ;;  %v10098_v60 = vld [vmem:[%s13868_s15 + $0xf0] ss:$8 sps:$4 sm:$0xff]  }
 0x440   :  { %2403 = vmatprep.subr.bf16.mxu1 %v10058_v6  ;;  %v10103_v6 = vld [vmem:[%s13868_s15 + $0x204] ss:$8 sps:$4 sm:$0xff]  }
 0x441   :  { %v1986_v18 = vpop.f32.mrb[62].mxu1 }
 0x442   :  { %v1993_v30 = vpack.c.bf16 %v1986_v18, %v1980_v26  ;;  %v1988_v39 = vpop.f32.mrb[63].mxu1  ;;  %v11885_v26 = vpop.f32.mrb[44].mxu0 }
 0x443   :  { %v1994_v43 = vpack.c.bf16 %v1988_v39, %v1982_v33  ;;  %2404 = vmatpush1.bf16.msra.mxu1 %v10056_v58  ;;  %v10101_v33 = vld [vmem:[%s13868_s15 + $0x200] ss:$8 sps:$4 sm:$0xff]   ;;  %v11890_v58 = vpop.f32.mrb[45].mxu0 }
 0x444   :  { %2405 = vmatprep.subr.bf16.mxu1 %v10061_v1  ;;  %v10106_v1 = vld [vmem:[%s13868_s15 + $0x214] ss:$8 sps:$4 sm:$0xff]   ;;  %v11895_v18 = vpop.f32.mrb[46].mxu0 }
 0x445   :  { %2230 = vmatprep.mubr.bf16.mxu1 %v1994_v43  ;;  %v11899_v39 = vpop.f32.mrb[47].mxu0 }
 0x446   :  { %2231 = vmatmul.mubr.bf16.gmra.mrb[68].mxu1 %v1993_v30  ;;  %v2926_v30 = vpack.c.bf16 %v11895_v18, %v11885_v26  ;;  %v2927_v43 = vpack.c.bf16 %v11899_v39, %v11890_v58  ;;  %v3248_v58 = vld [vmem:[%s13869_s14 + $0xb0] sm:$0xff]  ;;  %v3249_v18 = vld [vmem:[%s13869_s14 + $0xb8] sm:$0xff] }
 0x447   :  { %2406 = vmatpush1.bf16.msra.mxu1 %v10059_v47  ;;  %2433 = vmatprep.mubr.bf16.mxu1 %v1850_v49  ;;  %v10095_v49 = vld [vmem:[%s13868_s15 + $0xe0] ss:$8 sps:$4 sm:$0xff]   ;;  %v10104_v47 = vld [vmem:[%s13868_s15 + $0x210] ss:$8 sps:$4 sm:$0xff]  }
 0x448   :  { %2407 = vmatprep.subr.bf16.mxu1 %v10064_v16  ;;  %v10109_v16 = vld [vmem:[%s13868_s15 + $0x224] ss:$8 sps:$4 sm:$0xff]   ;;  %v3232_v39 = vld [vmem:[%s13869_s14 + $0x30] sm:$0xff] }
 0x44b   :  { %2408 = vmatpush1.bf16.msra.mxu1 %v10062_v24  ;;  %v11939_v24 = vpack.c.bf16 %v3243_v63, %v3242_v57  ;;  %v10178_v57 = vld [vmem:[%s13868_s15 + $0x394] ss:$8 sps:$4 sm:$0xff]   ;;  %v10176_v63 = vld [vmem:[%s13868_s15 + $0x390] ss:$8 sps:$4 sm:$0xff]  }
 0x44c   :  { %2409 = vmatprep.subr.bf16.mxu1 %v10067_v29  ;;  %v3228_v29 = vld [vmem:[%s13869_s14 + $0x10] sm:$0xff] }
 0x44d   :  { %9456 = vmatprep.subr.bf16.mxu0 %v11939_v24 }
 0x44f   :  { %2410 = vmatpush1.bf16.msra.mxu1 %v10065_v15  ;;  %v3229_v15 = vld [vmem:[%s13869_s14 + $0x18] sm:$0xff] }
 0x450   :  { %2411 = vmatprep.subr.bf16.mxu1 %v10070_v37  ;;  %v11965_v37 = vpack.c.bf16 %v3229_v15, %v3228_v29  ;;  %v10185_v29 = vld [vmem:[%s13868_s15 + $0x3c0] ss:$8 sps:$4 sm:$0xff]   ;;  %v10190_v15 = vld [vmem:[%s13868_s15 + $0x3d4] ss:$8 sps:$4 sm:$0xff]  }
 0x453   :  { %2412 = vmatpush1.bf16.msra.mxu1 %v10068_v40  ;;  %v10113_v40 = vld [vmem:[%s13868_s15 + $0x240] ss:$8 sps:$4 sm:$0xff]  }
 0x454   :  { %2413 = vmatprep.subr.bf16.mxu1 %v10073_v50  ;;  %v10118_v50 = vld [vmem:[%s13868_s15 + $0x254] ss:$8 sps:$4 sm:$0xff]  }
 0x457   :  { %2414 = vmatpush1.bf16.msra.mxu1 %v10071_v55  ;;  %v10116_v55 = vld [vmem:[%s13868_s15 + $0x250] ss:$8 sps:$4 sm:$0xff]  }
 0x458   :  { %2415 = vmatprep.subr.bf16.mxu1 %v10076_v56  ;;  %v10121_v56 = vld [vmem:[%s13868_s15 + $0x264] ss:$8 sps:$4 sm:$0xff]  }
 0x45b   :  { %2416 = vmatpush1.bf16.msra.mxu1 %v10074_v59  ;;  %v10119_v59 = vld [vmem:[%s13868_s15 + $0x260] ss:$8 sps:$4 sm:$0xff]  }
 0x45c   :  { %2417 = vmatprep.subr.bf16.mxu1 %v10079_v9  ;;  %v10124_v9 = vld [vmem:[%s13868_s15 + $0x274] ss:$8 sps:$4 sm:$0xff]  }
 0x45f   :  { %2418 = vmatpush1.bf16.msra.mxu1 %v10077_v27  ;;  %v10122_v27 = vld [vmem:[%s13868_s15 + $0x270] ss:$8 sps:$4 sm:$0xff]  }
 0x460   :  { %2419 = vmatprep.subr.bf16.mxu1 %v10082_v36  ;;  %v10127_v36 = vld [vmem:[%s13868_s15 + $0x284] ss:$8 sps:$4 sm:$0xff]  }
 0x463   :  { %2420 = vmatpush1.bf16.msra.mxu1 %v10080_v45  ;;  %v10125_v45 = vld [vmem:[%s13868_s15 + $0x280] ss:$8 sps:$4 sm:$0xff]  }
 0x464   :  { %2421 = vmatprep.subr.bf16.mxu1 %v10085_v54  ;;  %v10130_v54 = vld [vmem:[%s13868_s15 + $0x294] ss:$8 sps:$4 sm:$0xff]  }
 0x467   :  { %2422 = vmatpush1.bf16.msra.mxu1 %v10083_v46  ;;  %v10128_v46 = vld [vmem:[%s13868_s15 + $0x290] ss:$8 sps:$4 sm:$0xff]  }
 0x468   :  { %2423 = vmatprep.subr.bf16.mxu1 %v10088_v62  ;;  %v10133_v62 = vld [vmem:[%s13868_s15 + $0x2a4] ss:$8 sps:$4 sm:$0xff]  }
 0x46b   :  { %2424 = vmatpush1.bf16.msra.mxu1 %v10086_v3  ;;  %v10131_v3 = vld [vmem:[%s13868_s15 + $0x2a0] ss:$8 sps:$4 sm:$0xff]  }
 0x46c   :  { %2425 = vmatprep.subr.bf16.mxu1 %v10091_v12  ;;  %v10136_v12 = vld [vmem:[%s13868_s15 + $0x2b4] ss:$8 sps:$4 sm:$0xff]  }
 0x46f   :  { %2426 = vmatpush1.bf16.msra.mxu1 %v10089_v28  ;;  %v10134_v28 = vld [vmem:[%s13868_s15 + $0x2b0] ss:$8 sps:$4 sm:$0xff]  }
 0x470   :  { %2427 = vmatprep.subr.bf16.mxu1 %v10094_v14  ;;  %v10139_v14 = vld [vmem:[%s13868_s15 + $0x2c4] ss:$8 sps:$4 sm:$0xff]  }
 0x473   :  { %2428 = vmatpush1.bf16.msra.mxu1 %v10092_v32  ;;  %v10137_v32 = vld [vmem:[%s13868_s15 + $0x2c0] ss:$8 sps:$4 sm:$0xff]  }
 0x474   :  { %2429 = vmatprep.subr.bf16.mxu1 %v10097_v5  ;;  %v10142_v5 = vld [vmem:[%s13868_s15 + $0x2d4] ss:$8 sps:$4 sm:$0xff]  }
 0x477   :  { %2430 = vmatpush1.bf16.msra.mxu1 %v10095_v49  ;;  %v10140_v49 = vld [vmem:[%s13868_s15 + $0x2d0] ss:$8 sps:$4 sm:$0xff]  }
 0x478   :  { %2431 = vmatprep.subr.bf16.mxu1 %v10100_v23  ;;  %v10145_v23 = vld [vmem:[%s13868_s15 + $0x2e4] ss:$8 sps:$4 sm:$0xff]  }
 0x47b   :  { %2432 = vmatpush1.bf16.msra.mxu1 %v10098_v60  ;;  %v10143_v60 = vld [vmem:[%s13868_s15 + $0x2e0] ss:$8 sps:$4 sm:$0xff]  }
 0x47c   :  { %2757 = vmatprep.subr.bf16.mxu1 %v10103_v6  ;;  %v10148_v6 = vld [vmem:[%s13868_s15 + $0x2f4] ss:$8 sps:$4 sm:$0xff]  }
 0x47e   :  { %2434 = vmatmul.mubr.bf16.vlgmr.msra.gmra.mrb[64].mxu1 %v1849_v41  ;;  %v10110_v41 = vld [vmem:[%s13868_s15 + $0x230] ss:$8 sps:$4 sm:$0xff]  }
 0x47f   :  { %2443 = vmatprep.mubr.bf16.mxu1 %v1852_v2  ;;  %2758 = vmatpush1.bf16.msra.mxu1 %v10101_v33  ;;  %v3226_v2 = vld [vmem:[%s13869_s14] sm:$0xff]  ;;  %v10146_v33 = vld [vmem:[%s13868_s15 + $0x2f0] ss:$8 sps:$4 sm:$0xff]  }
 0x480   :  { %2759 = vmatprep.subr.bf16.mxu1 %v10106_v1  ;;  %v11953_v31 = vpack.c.bf16 %v3227_v53, %v3226_v2  ;;  %v10151_v1 = vld [vmem:[%s13868_s15 + $0x304] ss:$8 sps:$4 sm:$0xff]   ;;  %v10179_v53 = vld [vmem:[%s13868_s15 + $0x3a0] ss:$8 sps:$4 sm:$0xff]  }
 0x481   :  { %v10181_v2 = vld [vmem:[%s13868_s15 + $0x3a4] ss:$8 sps:$4 sm:$0xff]  }
 0x482   :  { %9458 = vmatpush3.bf16.msra.mxu0 %v11953_v31 }
 0x483   :  { %2760 = vmatpush1.bf16.msra.mxu1 %v10104_v47  ;;  %v10149_v47 = vld [vmem:[%s13868_s15 + $0x300] ss:$8 sps:$4 sm:$0xff]  }
 0x484   :  { %2761 = vmatprep.subr.bf16.mxu1 %v10109_v16  ;;  %v10154_v16 = vld [vmem:[%s13868_s15 + $0x314] ss:$8 sps:$4 sm:$0xff]  }
 0x486   :  { %2444 = vmatmul.mubr.bf16.gmra.mrb[68].mxu1 %v1851_v61  ;;  %v3245_v61 = vld [vmem:[%s13869_s14 + $0x98] sm:$0xff] }
 0x487   :  { %2762 = vmatpush1.bf16.msra.mxu1 %v10107_v38  ;;  %2789 = vmatprep.mubr.bf16.mxu1 %v2561_v34  ;;  %v11955_v34 = vpack.c.bf16 %v3245_v61, %v3244_v52  ;;  %v10152_v38 = vld [vmem:[%s13868_s15 + $0x310] ss:$8 sps:$4 sm:$0xff]   ;;  %v10184_v52 = vld [vmem:[%s13868_s15 + $0x3b4] ss:$8 sps:$4 sm:$0xff]  }
 0x488   :  { %2763 = vmatprep.subr.bf16.mxu1 %v10112_v35  ;;  %v10157_v35 = vld [vmem:[%s13868_s15 + $0x324] ss:$8 sps:$4 sm:$0xff]   ;;  %v10182_v61 = vld [vmem:[%s13868_s15 + $0x3b0] ss:$8 sps:$4 sm:$0xff]  }
 0x489   :  { %9460 = vmatprep.subr.bf16.mxu0 %v11955_v34 }
 0x48a   :  { %9462 = vmatpush3.bf16.msra.mxu0 %v11965_v37 }
 0x48b   :  { %2764 = vmatpush1.bf16.msra.mxu1 %v10110_v41  ;;  %v10173_v41 = vld [vmem:[%s13868_s15 + $0x380] ss:$8 sps:$4 sm:$0xff]  }
 0x48c   :  { %2765 = vmatprep.subr.bf16.mxu1 %v10115_v10  ;;  %v10187_v10 = vld [vmem:[%s13868_s15 + $0x3c4] ss:$8 sps:$4 sm:$0xff]  }
 0x48f   :  { %2766 = vmatpush1.bf16.msra.mxu1 %v10113_v40  ;;  %v10188_v40 = vld [vmem:[%s13868_s15 + $0x3d0] ss:$8 sps:$4 sm:$0xff]  }
 0x490   :  { %2767 = vmatprep.subr.bf16.mxu1 %v10118_v50  ;;  %v10193_v50 = vld [vmem:[%s13868_s15 + $0x3e4] ss:$8 sps:$4 sm:$0xff]  }
 0x493   :  { %2768 = vmatpush1.bf16.msra.mxu1 %v10116_v55  ;;  %v10191_v55 = vld [vmem:[%s13868_s15 + $0x3e0] ss:$8 sps:$4 sm:$0xff]  }
 0x494   :  { %2769 = vmatprep.subr.bf16.mxu1 %v10121_v56  ;;  %v10196_v56 = vld [vmem:[%s13868_s15 + $0x3f4] ss:$8 sps:$4 sm:$0xff]  }
 0x497   :  { %2770 = vmatpush1.bf16.msra.mxu1 %v10119_v59  ;;  %v10194_v59 = vld [vmem:[%s13868_s15 + $0x3f0] ss:$8 sps:$4 sm:$0xff]  }
 0x498   :  { %2771 = vmatprep.subr.bf16.mxu1 %v10124_v9  ;;  %v3246_v9 = vld [vmem:[%s13869_s14 + $0xa0] sm:$0xff] }
 0x49b   :  { %2772 = vmatpush1.bf16.msra.mxu1 %v10122_v27  ;;  %v3247_v27 = vld [vmem:[%s13869_s14 + $0xa8] sm:$0xff] }
 0x49c   :  { %2773 = vmatprep.subr.bf16.mxu1 %v10127_v36  ;;  %v12162_v42 = vpack.c.bf16 %v3247_v27, %v3246_v9 }
 0x49e   :  { %9464 = vmatprep.subr.bf16.mxu0 %v12162_v42 }
 0x49f   :  { %2774 = vmatpush1.bf16.msra.mxu1 %v10125_v45  ;;  %v3250_v45 = vld [vmem:[%s13869_s14 + $0xc0] sm:$0xff] }
 0x4a0   :  { %2775 = vmatprep.subr.bf16.mxu1 %v10130_v54  ;;  %v3251_v54 = vld [vmem:[%s13869_s14 + $0xc8] sm:$0xff] }
 0x4a3   :  { %2776 = vmatpush1.bf16.msra.mxu1 %v10128_v46  ;;  %v12198_v46 = vpack.c.bf16 %v3251_v54, %v3250_v45 }
 0x4a4   :  { %2777 = vmatprep.subr.bf16.mxu1 %v10133_v62  ;;  %v3234_v62 = vld [vmem:[%s13869_s14 + $0x40] sm:$0xff] }
 0x4a7   :  { %2778 = vmatpush1.bf16.msra.mxu1 %v10131_v3  ;;  %v3235_v3 = vld [vmem:[%s13869_s14 + $0x48] sm:$0xff] }
 0x4a8   :  { %2779 = vmatprep.subr.bf16.mxu1 %v10136_v12  ;;  %v12206_v12 = vpack.c.bf16 %v3235_v3, %v3234_v62 }
 0x4ab   :  { %2780 = vmatpush1.bf16.msra.mxu1 %v10134_v28  ;;  %v3252_v28 = vld [vmem:[%s13869_s14 + $0xd0] sm:$0xff] }
 0x4ac   :  { %2781 = vmatprep.subr.bf16.mxu1 %v10139_v14  ;;  %v3253_v14 = vld [vmem:[%s13869_s14 + $0xd8] sm:$0xff] }
 0x4af   :  { %2782 = vmatpush1.bf16.msra.mxu1 %v10137_v32  ;;  %v12216_v32 = vpack.c.bf16 %v3253_v14, %v3252_v28 }
 0x4b0   :  { %2783 = vmatprep.subr.bf16.mxu1 %v10142_v5  ;;  %v3236_v5 = vld [vmem:[%s13869_s14 + $0x50] sm:$0xff] }
 0x4b3   :  { %2784 = vmatpush1.bf16.msra.mxu1 %v10140_v49  ;;  %v3237_v49 = vld [vmem:[%s13869_s14 + $0x58] sm:$0xff] }
 0x4b4   :  { %2785 = vmatprep.subr.bf16.mxu1 %v10145_v23  ;;  %v12224_v23 = vpack.c.bf16 %v3237_v49, %v3236_v5 }
 0x4b7   :  { %2786 = vmatpush1.bf16.msra.mxu1 %v10143_v60  ;;  %v3254_v60 = vld [vmem:[%s13869_s14 + $0xe0] sm:$0xff] }
 0x4b8   :  { %2787 = vmatprep.subr.bf16.mxu1 %v10148_v6  ;;  %v3255_v6 = vld [vmem:[%s13869_s14 + $0xe8] sm:$0xff] }
 0x4bb   :  { %2788 = vmatpush1.bf16.msra.mxu1 %v10146_v33  ;;  %v12234_v33 = vpack.c.bf16 %v3255_v6, %v3254_v60 }
 0x4bc   :  { %3121 = vmatprep.subr.bf16.mxu1 %v10151_v1  ;;  %v3238_v1 = vld [vmem:[%s13869_s14 + $0x60] sm:$0xff] }
 0x4be   :  { %2790 = vmatmul.mubr.bf16.vlgmr.msra.gmra.mrb[64].mxu1 %v2560_v25  ;;  %v10158_v25 = vld [vmem:[%s13868_s15 + $0x330] ss:$8 sps:$4 sm:$0xff]  }
 0x4bf   :  { %3122 = vmatpush1.bf16.msra.mxu1 %v10149_v47  ;;  %2799 = vmatprep.mubr.bf16.mxu1 %v2563_v11  ;;  %v10167_v11 = vld [vmem:[%s13868_s15 + $0x360] ss:$8 sps:$4 sm:$0xff]  }
 0x4c0   :  { %3123 = vmatprep.subr.bf16.mxu1 %v10154_v16  ;;  %v3239_v47 = vld [vmem:[%s13869_s14 + $0x68] sm:$0xff] }
 0x4c1   :  { %v12242_v16 = vpack.c.bf16 %v3239_v47, %v3238_v1 }
 0x4c3   :  { %3124 = vmatpush1.bf16.msra.mxu1 %v10152_v38  ;;  %v3256_v38 = vld [vmem:[%s13869_s14 + $0xf0] sm:$0xff] }
 0x4c4   :  { %3125 = vmatprep.subr.bf16.mxu1 %v10157_v35  ;;  %v3257_v35 = vld [vmem:[%s13869_s14 + $0xf8] sm:$0xff] }
 0x4c6   :  { %2800 = vmatmul.mubr.bf16.gmra.mrb[68].mxu1 %v2562_v21  ;;  %v10164_v21 = vld [vmem:[%s13868_s15 + $0x350] ss:$8 sps:$4 sm:$0xff]  }
 0x4c7   :  { %3126 = vmatpush1.bf16.msra.mxu1 %v10155_v7  ;;  %3153 = vmatprep.mubr.bf16.mxu1 %v2925_v48  ;;  %v10175_v48 = vld [vmem:[%s13868_s15 + $0x384] ss:$8 sps:$4 sm:$0xff]   ;;  %v12252_v7 = vpack.c.bf16 %v3257_v35, %v3256_v38 }
 0x4c8   :  { %3127 = vmatprep.subr.bf16.mxu1 %v10160_v19  ;;  %v3240_v19 = vld [vmem:[%s13869_s14 + $0x70] sm:$0xff] }
 0x4cb   :  { %3128 = vmatpush1.bf16.msra.mxu1 %v10158_v25  ;;  %v3241_v25 = vld [vmem:[%s13869_s14 + $0x78] sm:$0xff] }
 0x4cc   :  { %3129 = vmatprep.subr.bf16.mxu1 %v10163_v22  ;;  %v12260_v22 = vpack.c.bf16 %v3241_v25, %v3240_v19 }
 0x4cf   :  { %3130 = vmatpush1.bf16.msra.mxu1 %v10161_v17 }
 0x4d0   :  { %3131 = vmatprep.subr.bf16.mxu1 %v10166_v4 }
 0x4d3   :  { %3132 = vmatpush1.bf16.msra.mxu1 %v10164_v21 }
 0x4d4   :  { %3133 = vmatprep.subr.bf16.mxu1 %v10169_v51 }
 0x4d7   :  { %3134 = vmatpush1.bf16.msra.mxu1 %v10167_v11 }
 0x4d8   :  { %3135 = vmatprep.subr.bf16.mxu1 %v10172_v13 }
 0x4db   :  { %3136 = vmatpush1.bf16.msra.mxu1 %v10170_v44 }
 0x4dc   :  { %3137 = vmatprep.subr.bf16.mxu1 %v10175_v48 }
 0x4df   :  { %3138 = vmatpush1.bf16.msra.mxu1 %v10173_v41 }
 0x4e0   :  { %3139 = vmatprep.subr.bf16.mxu1 %v10178_v57 }
 0x4e3   :  { %3140 = vmatpush1.bf16.msra.mxu1 %v10176_v63 }
 0x4e4   :  { %3141 = vmatprep.subr.bf16.mxu1 %v10181_v2 }
 0x4e7   :  { %3142 = vmatpush1.bf16.msra.mxu1 %v10179_v53 }
 0x4e8   :  { %3143 = vmatprep.subr.bf16.mxu1 %v10184_v52 }
 0x4eb   :  { %3144 = vmatpush1.bf16.msra.mxu1 %v10182_v61 }
 0x4ec   :  { %3145 = vmatprep.subr.bf16.mxu1 %v10187_v10 }
 0x4ef   :  { %3146 = vmatpush1.bf16.msra.mxu1 %v10185_v29 }
 0x4f0   :  { %3147 = vmatprep.subr.bf16.mxu1 %v10190_v15 }
 0x4f3   :  { %3148 = vmatpush1.bf16.msra.mxu1 %v10188_v40 }
 0x4f4   :  { %3149 = vmatprep.subr.bf16.mxu1 %v10193_v50 }
 0x4f7   :  { %3150 = vmatpush1.bf16.msra.mxu1 %v10191_v55 }
 0x4f8   :  { %3151 = vmatprep.subr.bf16.mxu1 %v10196_v56 }
 0x4fb   :  { %3152 = vmatpush1.bf16.msra.mxu1 %v10194_v59 }
 0x4fe   :  { %3154 = vmatmul.mubr.bf16.vlgmr.msra.gmra.mrb[64].mxu1 %v2924_v20  ;;  %v3231_v20 = vld [vmem:[%s13869_s14 + $0x28] sm:$0xff] }
 0x4ff   :  { %3163 = vmatprep.mubr.bf16.mxu1 %v2927_v43  ;;  %v12170_v26 = vpack.c.bf16 %v3231_v20, %v3230_v8  ;;  %v3233_v43 = vld [vmem:[%s13869_s14 + $0x38] sm:$0xff] }
 0x500   :  { %v12188_v36 = vpack.c.bf16 %v3233_v43, %v3232_v39 }
 0x501   :  { %9466 = vmatpush3.bf16.msra.mxu0 %v12170_v26 }
 0x506   :  { %3164 = vmatmul.mubr.bf16.gmra.mrb[68].mxu1 %v2926_v30  ;;  %v12180_v30 = vpack.c.bf16 %v3249_v18, %v3248_v58 }
 0x507   :  { %4339 = vmatprep.mubr.f32.mxu1 %v10872_v0 }
 0x508   :  { %9468 = vmatprep.subr.bf16.mxu0 %v12180_v30 }
 0x509   :  { %9470 = vmatpush3.bf16.msra.mxu0 %v12188_v36 }
 0x50a   :  { %9472 = vmatprep.subr.bf16.mxu0 %v12198_v46 }
 0x50d   :  { %9474 = vmatpush3.bf16.msra.mxu0 %v12206_v12 }
 0x50e   :  { %9476 = vmatprep.subr.bf16.mxu0 %v12216_v32 }
 0x511   :  { %9478 = vmatpush3.bf16.msra.mxu0 %v12224_v23 }
 0x512   :  { %9480 = vmatprep.subr.bf16.mxu0 %v12234_v33 }
 0x515   :  { %9482 = vmatpush3.bf16.msra.mxu0 %v12242_v16 }
 0x516   :  { %9484 = vmatprep.subr.bf16.mxu0 %v12252_v7 }
 0x519   :  { %9486 = vmatpush3.bf16.msra.mxu0 %v12260_v22 }
 0x51a   :  { %9488 = vmatprep.subr.bf16.mxu0 %v11939_v24 }
 0x5d1   :  { %v12265_v17 = vpop.f32.mrb[64].mxu1 }
 0x5d2   :  { %v12267_v4 = vpop.f32.mrb[65].mxu1  ;;  %v3200_v51 = vmul.f32 %v12265_v17, %v12265_v17 }
 0x5d3   :  { %v12269_v21 = vpop.f32.mrb[66].mxu1  ;;  %v3201_v24 = vmul.f32 %v12267_v4, %v12267_v4 }
 0x5d4   :  { %v3182_v11 = vadd.f32 %v12269_v21, %v12265_v17  ;;  %v3202_v13 = vmul.f32 %v12269_v21, %v12269_v21  ;;  %v12277_v44 = vpop.f32.mrb[67].mxu1 }
 0x5d5   :  { %v3191_v48 = vadd.f32 %v12277_v44, %v12267_v4  ;;  %v3203_v41 = vmul.f32 %v12277_v44, %v12277_v44 }
 0x5d6   :  { %v3208_v57 = vadd.f32 %v3202_v13, %v3200_v51 }
 0x5d7   :  { %v3217_v63 = vadd.f32 %v3203_v41, %v3201_v24 }
 0x5d9   :  { %v12285_v2 = vpop.f32.mrb[68].mxu1 }
 0x5da   :  { %v3183_v53 = vadd.f32 %v3182_v11, %v12285_v2  ;;  %v3204_v52 = vmul.f32 %v12285_v2, %v12285_v2  ;;  %v12290_v61 = vpop.f32.mrb[69].mxu1 }
 0x5db   :  { %v3192_v10 = vadd.f32 %v3191_v48, %v12290_v61  ;;  %v3205_v29 = vmul.f32 %v12290_v61, %v12290_v61  ;;  %v12295_v15 = vpop.f32.mrb[70].mxu1 }
 0x5dc   :  { %v3209_v40 = vadd.f32 %v3208_v57, %v3204_v52  ;;  %v3184_v50 = vadd.f32 %v3183_v53, %v12295_v15  ;;  %v3206_v55 = vmul.f32 %v12295_v15, %v12295_v15  ;;  %v12300_v56 = vpop.f32.mrb[71].mxu1  ;;  %v3403_v57 = vld [vmem:[%s13870_s26] sm:$0x1]  ;;  %s13871_s26 = sld [smem:[#allocation29_spill]] }
 0x5dd   :  { %v3218_v59 = vadd.f32 %v3217_v63, %v3205_v29  ;;  %v3193_v9 = vadd.f32 %v3192_v10, %v12300_v56  ;;  %v3207_v27 = vmul.f32 %v12300_v56, %v12300_v56  ;;  %v3407_v52 = vld [vmem:[%s13823_s8] sm:$0x1] }
 0x5de   :  { %v3185_v8 = vrot.slane %v3184_v50, 4  ;;  %v3210_v20 = vadd.f32 %v3209_v40, %v3206_v55  ;;  %v3563_v40 = vlaneseq }
 0x5df   :  { %v3194_v58 = vrot.slane %v3193_v9, 4  ;;  %v3219_v18 = vadd.f32 %v3218_v59, %v3207_v27 }
 0x5e0   :  { %v3186_v39 = vadd.f32 %v3185_v8, %v3184_v50  ;;  %v3211_v19 = vrot.slane %v3210_v20, 4  ;;  %v3564_v50 = vshrl.u32 %v3563_v40, 7  ;;  %v10211_v40 = vld [vmem:[%s13825_s10 + $0x144] ss:$8 sps:$4 sm:$0xff]  }
 0x5e1   :  { %v3195_v43 = vadd.f32 %v3194_v58, %v3193_v9  ;;  %v3220_v45 = vrot.slane %v3219_v18, 4 }
 0x5e2   :  { %v3187_v54 = vrot.slane %v3186_v39, 2  ;;  %v3212_v25 = vadd.f32 %v3211_v19, %v3210_v20  ;;  %v12331_v55 = vsub.s32 0, %v3564_v50  ;;  %v10209_v50 = vld [vmem:[%s13825_s10 + $0x140] ss:$8 sps:$4 sm:$0xff]  }
 0x5e3   :  { %v3196_v62 = vrot.slane %v3195_v43, 2  ;;  %v3221_v3 = vadd.f32 %v3220_v45, %v3219_v18 }
 0x5e4   :  { %v3188_v28 = vadd.f32 %v3187_v54, %v3186_v39 }
 0x5e5   :  { %v3197_v14 = vadd.f32 %v3196_v62, %v3195_v43  ;;  %v3222_v5 = vrot.slane %v3221_v3, 2 }
 0x5e6   :  { %v3189_v49 = vrot.slane %v3188_v28, 1 }
 0x5e7   :  { %v3198_v60 = vrot.slane %v3197_v14, 1  ;;  %v3223_v6 = vadd.f32 %v3222_v5, %v3221_v3 }
 0x5e8   :  { %v3190_v38 = vadd.f32 %v3189_v49, %v3188_v28 }
 0x5e9   :  { %v3199_v1 = vadd.f32 %v3198_v60, %v3197_v14  ;;  %v3224_v47 = vrot.slane %v3223_v6, 1 }
 0x5eb   :  { %3322 = vmatprep.mubr.f32.mxu0 %v3199_v1  ;;  %v3225_v35 = vadd.f32 %v3224_v47, %v3223_v6 }
 0x5ec   :  { %3323 = vmatmul.mubr.f32.vlgmr.msra.gmra.mrb[48].mxu0 %v3190_v38 }
 0x5ed   :  { %9490 = vmatpush3.bf16.msra.mxu0 %v11953_v31  ;;  %3394 = vmatprep.mubr.f32.mxu0 %v3225_v35  ;;  %v3213_v31 = vrot.slane %v3212_v25, 2 }
 0x5ee   :  { %9492 = vmatprep.subr.bf16.mxu0 %v11955_v34 }
 0x5ef   :  { %v3214_v34 = vadd.f32 %v3213_v31, %v3212_v25 }
 0x5f1   :  { %9494 = vmatpush3.bf16.msra.mxu0 %v11965_v37  ;;  %v3215_v37 = vrot.slane %v3214_v34, 1 }
 0x5f2   :  { %9496 = vmatprep.subr.bf16.mxu0 %v12162_v42 }
 0x5f3   :  { %v3216_v42 = vadd.f32 %v3215_v37, %v3214_v34 }
 0x5f5   :  { %9498 = vmatpush3.bf16.msra.mxu0 %v12170_v26  ;;  %v3411_v26 = vld [vmem:[#allocation7 + $0x8] sm:$0xff] }
 0x5f6   :  { %9500 = vmatprep.subr.bf16.mxu0 %v12180_v30  ;;  %v3413_v30 = vld [vmem:[#allocation7 + $0x18] sm:$0xff] }
 0x5f9   :  { %9502 = vmatpush3.bf16.msra.mxu0 %v12188_v36  ;;  %v3410_v36 = vld [vmem:[#allocation7] sm:$0xff] }
 0x5fa   :  { %9504 = vmatprep.subr.bf16.mxu0 %v12198_v46  ;;  %v9519_v46 = vpack.c.bf16 %v3413_v30, %v3411_v26 }
 0x5fd   :  { %9506 = vmatpush3.bf16.msra.mxu0 %v12206_v12  ;;  %v3412_v12 = vld [vmem:[#allocation7 + $0x10] sm:$0xff] }
 0x5fe   :  { %9508 = vmatprep.subr.bf16.mxu0 %v12216_v32  ;;  %v9521_v32 = vpack.c.bf16 %v3412_v12, %v3410_v36 }
 0x601   :  { %9510 = vmatpush3.bf16.msra.mxu0 %v12224_v23 }
 0x602   :  { %9512 = vmatprep.subr.bf16.mxu0 %v12234_v33 }
 0x605   :  { %9514 = vmatpush3.bf16.msra.mxu0 %v12242_v16 }
 0x606   :  { %9516 = vmatprep.subr.bf16.mxu0 %v12252_v7 }
 0x609   :  { %9518 = vmatpush3.bf16.msra.mxu0 %v12260_v22 }
 0x60a   :  { %9520 = vmatprep.subr.bf16.mxu0 %v9519_v46 }
 0x60c   :  { %3395 = vmatmul.mubr.f32.vlgmr.msra.gmra.mrb[50].mxu0 %v3216_v42 }
 0x60d   :  { %3482 = vmatprep.mubr.f32.mxu0 %v10872_v0  ;;  %9522 = vmatpush1.bf16.msra.mxu0 %v9521_v32 }
 0x60e   :  { %9524 = vmatprep.subr.bf16.mxu0 %v9519_v46 }
 0x6bf   :  { %v8997_v23 = vpop.f32.mrb[48].mxu0 }
 0x6c0   :  { %v8998_v33 = vpop.f32.mrb[49].mxu0 }
 0x6c1   :  { %v8999_v16 = vadd.f32 %v8998_v33, %v8997_v23  ;;  %v3619_v33 = vld [vmem:[#allocation9] sm:$0xff] }
 0x6c3   :  { %v3329_v7 = vmul.f32 0.001953125, %v8999_v16  ;;  %v4267_v16 = vld [vmem:[#allocation9 + $0x20] sm:$0xff] }
 0x6c5   :  { %v3401_v13 = vmul.f32 %v3329_v7, %v3329_v7 }
 0x6df   :  { %v9032_v51 = vpop.f32.mrb[50].mxu0 }
 0x6e0   :  { %v9033_v11 = vpop.f32.mrb[51].mxu0 }
 0x6e1   :  { %v9034_v22 = vadd.f32 %v9033_v11, %v9032_v51  ;;  %v4268_v51 = vld [vmem:[#allocation9 + $0x28] sm:$0xff] }
 0x6e2   :  { %v10199_v11 = vld [vmem:[%s13825_s10 + $0x104] ss:$8 sps:$4 sm:$0xff]  }
 0x6e3   :  { %v3400_v24 = vmul.f32 0.001953125, %v9034_v22  ;;  %v3740_v22 = vld [vmem:[#allocation9 + $0x10] sm:$0xff] }
 0x6e5   :  { %v3402_v48 = vsub.f32 %v3400_v24, %v3401_v13  ;;  %v10197_v13 = vld [vmem:[%s13825_s10 + $0x100] ss:$8 sps:$4 sm:$0xff]   ;;  %v4595_v24 = vld [vmem:[#allocation9 + $0x30] sm:$0xff] }
 0x6e7   :  { %v3404_v41 = vadd.f32 1e-05, %v3402_v48  ;;  %v10202_v48 = vld [vmem:[%s13825_s10 + $0x114] ss:$8 sps:$4 sm:$0xff]  }
 0x6e9   :  { %10645 = vrsqrt.f32 %v3404_v41  ;;  %v3741_v41 = vld [vmem:[#allocation9 + $0x18] sm:$0xff] }
 0x6f3   :  { %v10646_v63 = vpop.eup %10645 }
 0x6f4   :  { %v3406_v53 = vmul.f32 %v10646_v63, %v3403_v57  ;;  %v10200_v57 = vld [vmem:[%s13825_s10 + $0x110] ss:$8 sps:$4 sm:$0xff]  }
 0x6f5   :  { %v4596_v63 = vld [vmem:[#allocation9 + $0x38] sm:$0xff] }
 0x6f6   :  { %8332 = vmatmul.mubr.msk.f32.vlgmr.msra.gmra.mrb[52].mxu0 %vm3414_vm2, %v3406_v53  ;;  %v3408_v10 = vmul.f32 %v3406_v53, %v3329_v7  ;;  %v3620_v7 = vld [vmem:[#allocation9 + $0x8] sm:$0xff] }
 0x6f7   :  { %9526 = vmatpush1.bf16.msra.mxu0 %v9521_v32  ;;  %3556 = vmatprep.mubr.f32.mxu0 %v10872_v0  ;;  %v10205_v53 = vld [vmem:[%s13825_s10 + $0x124] ss:$8 sps:$4 sm:$0xff]  }
 0x6f8   :  { %v3409_v29 = vsub.f32 %v3407_v52, %v3408_v10  ;;  %v10203_v52 = vld [vmem:[%s13825_s10 + $0x120] ss:$8 sps:$4 sm:$0xff]   ;;  %v10208_v10 = vld [vmem:[%s13825_s10 + $0x134] ss:$8 sps:$4 sm:$0xff]  }
 0x6fa   :  { %8333 = vmatmul.mubr.msk.f32.vlgmr.msra.gmra.mrb[54].mxu0 %vm3414_vm2, %v3409_v29  ;;  %v10206_v29 = vld [vmem:[%s13825_s10 + $0x130] ss:$8 sps:$4 sm:$0xff]  }
 0x6fb   :  { %3692 = vmatprep.mubr.f32.mxu0 %v10872_v0 }
 0x7c9   :  { %v3484_v59 = vpop.f32.mrb[52].mxu0 }
 0x7ca   :  { %v3566_v9 = vrot.slane %v3484_v59, %v12331_v55  ;;  %v3486_v27 = vpop.f32.mrb[53].mxu0  ;;  %v10214_v59 = vld [vmem:[%s13825_s10 + $0x154] ss:$8 sps:$4 sm:$0xff]  }
 0x7cb   :  { %v3570_v8 = vrot.slane %v3486_v27, %v12331_v55  ;;  %v10217_v27 = vld [vmem:[%s13825_s10 + $0x164] ss:$8 sps:$4 sm:$0xff]  }
 0x7cc   :  { %v3571_v20 = vmul.f32 %v3566_v9, %v12265_v17  ;;  %v3573_v58 = vmul.f32 %v3566_v9, %v12269_v21  ;;  %v3575_v18 = vmul.f32 %v3566_v9, %v12285_v2  ;;  %v3577_v39 = vmul.f32 %v3566_v9, %v12295_v15  ;;  %v10212_v9 = vld [vmem:[%s13825_s10 + $0x150] ss:$8 sps:$4 sm:$0xff]  }
 0x7cd   :  { %v3572_v43 = vmul.f32 %v3570_v8, %v12267_v4  ;;  %v3574_v45 = vmul.f32 %v3570_v8, %v12277_v44  ;;  %v3576_v54 = vmul.f32 %v3570_v8, %v12290_v61  ;;  %v3578_v62 = vmul.f32 %v3570_v8, %v12300_v56  ;;  %v3558_v3 = vpop.f32.mrb[54].mxu0  ;;  %v10215_v8 = vld [vmem:[%s13825_s10 + $0x160] ss:$8 sps:$4 sm:$0xff]  }
 0x7ce   :  { %v3582_v28 = vrot.slane %v3558_v3, %v12331_v55  ;;  %v3560_v14 = vpop.f32.mrb[55].mxu0  ;;  %v10232_v3 = vld [vmem:[%s13825_s10 + $0x1b4] ss:$8 sps:$4 sm:$0xff]  }
 0x7cf   :  { %v3586_v17 = vrot.slane %v3560_v14, %v12331_v55  ;;  %v10235_v14 = vld [vmem:[%s13825_s10 + $0x1c4] ss:$8 sps:$4 sm:$0xff]  }
 0x7d0   :  { %v3587_v5 = vadd.f32 %v3582_v28, %v3571_v20  ;;  %v3589_v21 = vadd.f32 %v3582_v28, %v3573_v58  ;;  %v3591_v49 = vadd.f32 %v3582_v28, %v3575_v18  ;;  %v3593_v2 = vadd.f32 %v3582_v28, %v3577_v39  ;;  %v10220_v20 = vld [vmem:[%s13825_s10 + $0x174] ss:$8 sps:$4 sm:$0xff]   ;;  %v10218_v58 = vld [vmem:[%s13825_s10 + $0x170] ss:$8 sps:$4 sm:$0xff]   ;;  %v10223_v18 = vld [vmem:[%s13825_s10 + $0x184] ss:$8 sps:$4 sm:$0xff]  }
 0x7d1   :  { %v3588_v60 = vadd.f32 %v3586_v17, %v3572_v43  ;;  %v3590_v15 = vadd.f32 %v3586_v17, %v3574_v45  ;;  %v3592_v6 = vadd.f32 %v3586_v17, %v3576_v54  ;;  %v3594_v4 = vadd.f32 %v3586_v17, %v3578_v62  ;;  %v10221_v39 = vld [vmem:[%s13825_s10 + $0x180] ss:$8 sps:$4 sm:$0xff]   ;;  %v10226_v43 = vld [vmem:[%s13825_s10 + $0x194] ss:$8 sps:$4 sm:$0xff]   ;;  %v10224_v45 = vld [vmem:[%s13825_s10 + $0x190] ss:$8 sps:$4 sm:$0xff]  }
 0x7d2   :  { %vm3595_vm3 = vcmp.ge.f32.partialorder %v3587_v5, 0.0  ;;  %vm3597_vm4 = vcmp.ge.f32.partialorder %v3589_v21, 0.0  ;;  %v3603_v44 = vmul.f32 0.2, %v3587_v5  ;;  %v3605_v61 = vmul.f32 0.2, %v3589_v21 }
 0x7d3   :  { %vm3596_vm5 = vcmp.ge.f32.partialorder %v3588_v60, 0.0  ;;  %vm3598_vm6 = vcmp.ge.f32.partialorder %v3590_v15, 0.0  ;;  %v3604_v56 = vmul.f32 0.2, %v3588_v60  ;;  %v3606_v1 = vmul.f32 0.2, %v3590_v15 }
 0x7d4   :  { %v3611_v47 = vsel %vm3595_vm3, %v3587_v5, %v3603_v44  ;;  %v3613_v38 = vsel %vm3597_vm4, %v3589_v21, %v3605_v61  ;;  %vm3600_vm7 = vcmp.ge.f32.partialorder %v3592_v6, 0.0  ;;  %vm3602_vm8 = vcmp.ge.f32.partialorder %v3594_v4, 0.0  ;;  %v10229_v54 = vld [vmem:[%s13825_s10 + $0x1a4] ss:$8 sps:$4 sm:$0xff]   ;;  %v10227_v62 = vld [vmem:[%s13825_s10 + $0x1a0] ss:$8 sps:$4 sm:$0xff]  }
 0x7d5   :  { %v3612_v35 = vsel %vm3596_vm5, %v3588_v60, %v3604_v56  ;;  %v3614_v19 = vsel %vm3598_vm6, %v3590_v15, %v3606_v1  ;;  %v9529_v25 = vpack.c.bf16 %v3613_v38, %v3611_v47  ;;  %v3608_v31 = vmul.f32 0.2, %v3592_v6  ;;  %v10230_v28 = vld [vmem:[%s13825_s10 + $0x1b0] ss:$8 sps:$4 sm:$0xff]   ;;  %v10233_v17 = vld [vmem:[%s13825_s10 + $0x1c0] ss:$8 sps:$4 sm:$0xff]  }
 0x7d6   :  { %v9527_v34 = vpack.c.bf16 %v3614_v19, %v3612_v35  ;;  %v3610_v37 = vmul.f32 0.2, %v3594_v4  ;;  %vm3599_vm9 = vcmp.ge.f32.partialorder %v3591_v49, 0.0  ;;  %vm3601_vm10 = vcmp.ge.f32.partialorder %v3593_v2, 0.0  ;;  %v10236_v5 = vld [vmem:[%s13825_s10 + $0x1d0] ss:$8 sps:$4 sm:$0xff]  }
 0x7d7   :  { %v3616_v42 = vsel %vm3600_vm7, %v3592_v6, %v3608_v31  ;;  %v3607_v26 = vmul.f32 0.2, %v3591_v49  ;;  %v3609_v30 = vmul.f32 0.2, %v3593_v2  ;;  %v10238_v21 = vld [vmem:[%s13825_s10 + $0x1d4] ss:$8 sps:$4 sm:$0xff]  }
 0x7d8   :  { %9528 = vmatprep.subr.bf16.mxu0 %v9527_v34  ;;  %9544 = vmatprep.subr.bf16.mxu1 %v9527_v34  ;;  %v3618_v36 = vsel %vm3602_vm8, %v3594_v4, %v3610_v37  ;;  %v10242_v60 = vld [vmem:[%s13825_s10 + $0x1f0] ss:$8 sps:$4 sm:$0xff]   ;;  %v10244_v15 = vld [vmem:[%s13825_s10 + $0x1f4] ss:$8 sps:$4 sm:$0xff]   ;;  %v10247_v6 = vld [vmem:[%s13825_s10 + $0x4] ss:$8 sps:$4 sm:$0xff]  }
 0x7d9   :  { %9530 = vmatpush1.bf16.msra.mxu0 %v9529_v25  ;;  %9546 = vmatpush1.bf16.msra.mxu1 %v9529_v25  ;;  %v9531_v46 = vpack.c.bf16 %v3618_v36, %v3616_v42  ;;  %v3615_v12 = vsel %vm3599_vm9, %v3591_v49, %v3607_v26  ;;  %v3617_v32 = vsel %vm3601_vm10, %v3593_v2, %v3609_v30  ;;  %v10241_v49 = vld [vmem:[%s13825_s10 + $0x1e4] ss:$8 sps:$4 sm:$0xff]   ;;  %v10239_v2 = vld [vmem:[%s13825_s10 + $0x1e0] ss:$8 sps:$4 sm:$0xff]   ;;  %vm7969_vm3 = vcmask 1024  }
 0x7da   :  { %v9533_v23 = vpack.c.bf16 %v3617_v32, %v3615_v12  ;;  %v10245_v12 = vld [vmem:[%s13825_s10] ss:$8 sps:$4 sm:$0xff]   ;;  %v10250_v32 = vld [vmem:[%s13825_s10 + $0x14] ss:$8 sps:$4 sm:$0xff]  }
 0x7db   :  { %9532 = vmatprep.subr.bf16.mxu0 %v9531_v46  ;;  %9548 = vmatprep.subr.bf16.mxu1 %v9531_v46 }
 0x7dd   :  { %9534 = vmatpush1.bf16.msra.mxu0 %v9533_v23  ;;  %9550 = vmatpush1.bf16.msra.mxu1 %v9533_v23 }
 0x7de   :  { %9536 = vmatprep.subr.bf16.mxu0 %v9527_v34  ;;  %9552 = vmatprep.subr.bf16.mxu1 %v9527_v34 }
 0x7e0   :  { %8334 = vmatmul.mubr.msk.f32.vlgmr.msra.gmra.mrb[56].mxu0 %vm3621_vm11, %v3619_v33  ;;  %8434 = vmatmul.mubr.msk.f32.vlgmr.msra.gmra.mrb[72].mxu1 %vm3621_vm11, %v4267_v16  ;;  %v10253_v33 = vld [vmem:[%s13825_s10 + $0x24] ss:$8 sps:$4 sm:$0xff]   ;;  %v10251_v16 = vld [vmem:[%s13825_s10 + $0x20] ss:$8 sps:$4 sm:$0xff]  }
 0x7e1   :  { %9538 = vmatpush1.bf16.msra.mxu0 %v9529_v25  ;;  %9554 = vmatpush1.bf16.msra.mxu1 %v9529_v25 }
 0x7e2   :  { %9540 = vmatprep.subr.bf16.mxu0 %v9531_v46  ;;  %9556 = vmatprep.subr.bf16.mxu1 %v9531_v46 }
 0x7e3   :  { %3698 = vmatprep.mubr.f32.mxu0 %v10872_v0  ;;  %4345 = vmatprep.mubr.f32.mxu1 %v10872_v0 }
 0x7e4   :  { %8335 = vmatmul.mubr.msk.f32.gmra.mrb[58].mxu0 %vm3621_vm11, %v3620_v7  ;;  %8435 = vmatmul.mubr.msk.f32.gmra.mrb[74].mxu1 %vm3621_vm11, %v4268_v51  ;;  %v10256_v7 = vld [vmem:[%s13825_s10 + $0x34] ss:$8 sps:$4 sm:$0xff]   ;;  %v10254_v51 = vld [vmem:[%s13825_s10 + $0x30] ss:$8 sps:$4 sm:$0xff]  }
 0x7e5   :  { %9542 = vmatpush1.bf16.msra.mxu0 %v9533_v23  ;;  %9558 = vmatpush1.bf16.msra.mxu1 %v9533_v23  ;;  %v10248_v23 = vld [vmem:[%s13825_s10 + $0x10] ss:$8 sps:$4 sm:$0xff]  }
 0x7e6   :  { %3812 = vmatprep.mubr.f32.mxu0 %v10872_v0  ;;  %4020 = vmatprep.subr.bf16.mxu0 %v10199_v11  ;;  %v10259_v11 = vld [vmem:[%s13825_s10 + $0x44] ss:$8 sps:$4 sm:$0xff]  }
 0x7e7   :  { %4667 = vmatprep.mubr.f32.mxu1 %v10872_v0 }
 0x7e8   :  { %8336 = vmatmul.mubr.msk.f32.vlgmr.msra.gmra.mrb[60].mxu0 %vm3621_vm11, %v3740_v22  ;;  %8500 = vmatmul.mubr.msk.f32.vlgmr.msra.gmra.mrb[76].mxu1 %vm3621_vm11, %v4595_v24  ;;  %v10257_v22 = vld [vmem:[%s13825_s10 + $0x40] ss:$8 sps:$4 sm:$0xff]   ;;  %v10260_v24 = vld [vmem:[%s13825_s10 + $0x50] ss:$8 sps:$4 sm:$0xff]  }
 0x7e9   :  { %3818 = vmatprep.mubr.f32.mxu0 %v10872_v0  ;;  %4021 = vmatpush1.bf16.msra.mxu0 %v10197_v13  ;;  %v10262_v13 = vld [vmem:[%s13825_s10 + $0x54] ss:$8 sps:$4 sm:$0xff]  }
 0x7ea   :  { %4022 = vmatprep.subr.bf16.mxu0 %v10202_v48  ;;  %4673 = vmatprep.mubr.f32.mxu1 %v10872_v0  ;;  %v10265_v48 = vld [vmem:[%s13825_s10 + $0x64] ss:$8 sps:$4 sm:$0xff]  }
 0x7ec   :  { %8337 = vmatmul.mubr.msk.f32.gmra.mrb[62].mxu0 %vm3621_vm11, %v3741_v41  ;;  %8501 = vmatmul.mubr.msk.f32.gmra.mrb[78].mxu1 %vm3621_vm11, %v4596_v63  ;;  %v10263_v41 = vld [vmem:[%s13825_s10 + $0x60] ss:$8 sps:$4 sm:$0xff]   ;;  %v10266_v63 = vld [vmem:[%s13825_s10 + $0x70] ss:$8 sps:$4 sm:$0xff]  }
 0x7ed   :  { %4023 = vmatpush1.bf16.msra.mxu0 %v10200_v57  ;;  %v10268_v57 = vld [vmem:[%s13825_s10 + $0x74] ss:$8 sps:$4 sm:$0xff]  }
 0x7ee   :  { %4024 = vmatprep.subr.bf16.mxu0 %v10205_v53  ;;  %v10271_v53 = vld [vmem:[%s13825_s10 + $0x84] ss:$8 sps:$4 sm:$0xff]  }
 0x7f1   :  { %4025 = vmatpush1.bf16.msra.mxu0 %v10203_v52  ;;  %v10269_v52 = vld [vmem:[%s13825_s10 + $0x80] ss:$8 sps:$4 sm:$0xff]  }
 0x7f2   :  { %4026 = vmatprep.subr.bf16.mxu0 %v10208_v10  ;;  %v10274_v10 = vld [vmem:[%s13825_s10 + $0x94] ss:$8 sps:$4 sm:$0xff]  }
 0x7f5   :  { %4027 = vmatpush1.bf16.msra.mxu0 %v10206_v29  ;;  %v10272_v29 = vld [vmem:[%s13825_s10 + $0x90] ss:$8 sps:$4 sm:$0xff]  }
 0x7f6   :  { %4028 = vmatprep.subr.bf16.mxu0 %v10211_v40  ;;  %v10277_v40 = vld [vmem:[%s13825_s10 + $0xa4] ss:$8 sps:$4 sm:$0xff]  }
 0x7f9   :  { %4029 = vmatpush1.bf16.msra.mxu0 %v10209_v50  ;;  %v10275_v50 = vld [vmem:[%s13825_s10 + $0xa0] ss:$8 sps:$4 sm:$0xff]  }
 0x7fa   :  { %4030 = vmatprep.subr.bf16.mxu0 %v10214_v59  ;;  %v10280_v59 = vld [vmem:[%s13825_s10 + $0xb4] ss:$8 sps:$4 sm:$0xff]  }
 0x7fd   :  { %4031 = vmatpush1.bf16.msra.mxu0 %v10212_v9  ;;  %v10278_v9 = vld [vmem:[%s13825_s10 + $0xb0] ss:$8 sps:$4 sm:$0xff]  }
 0x7fe   :  { %4032 = vmatprep.subr.bf16.mxu0 %v10217_v27  ;;  %v10283_v27 = vld [vmem:[%s13825_s10 + $0xc4] ss:$8 sps:$4 sm:$0xff]  }
 0x801   :  { %4033 = vmatpush1.bf16.msra.mxu0 %v10215_v8  ;;  %v10281_v8 = vld [vmem:[%s13825_s10 + $0xc0] ss:$8 sps:$4 sm:$0xff]  }
 0x802   :  { %4034 = vmatprep.subr.bf16.mxu0 %v10220_v20  ;;  %v10286_v20 = vld [vmem:[%s13825_s10 + $0xd4] ss:$8 sps:$4 sm:$0xff]  }
 0x805   :  { %4035 = vmatpush1.bf16.msra.mxu0 %v10218_v58  ;;  %v10284_v58 = vld [vmem:[%s13825_s10 + $0xd0] ss:$8 sps:$4 sm:$0xff]  }
 0x806   :  { %4036 = vmatprep.subr.bf16.mxu0 %v10223_v18  ;;  %v10289_v18 = vld [vmem:[%s13825_s10 + $0xe4] ss:$8 sps:$4 sm:$0xff]  }
 0x809   :  { %4037 = vmatpush1.bf16.msra.mxu0 %v10221_v39  ;;  %v10287_v39 = vld [vmem:[%s13825_s10 + $0xe0] ss:$8 sps:$4 sm:$0xff]  }
 0x80a   :  { %4038 = vmatprep.subr.bf16.mxu0 %v10226_v43 }
 0x80d   :  { %4039 = vmatpush1.bf16.msra.mxu0 %v10224_v45  ;;  %v10292_v45 = vld [vmem:[%s13825_s10 + $0xf4] ss:$8 sps:$4 sm:$0xff]  }
 0x80e   :  { %4040 = vmatprep.subr.bf16.mxu0 %v10229_v54 }
 0x811   :  { %4041 = vmatpush1.bf16.msra.mxu0 %v10227_v62 }
 0x812   :  { %4042 = vmatprep.subr.bf16.mxu0 %v10232_v3 }
 0x815   :  { %4043 = vmatpush1.bf16.msra.mxu0 %v10230_v28 }
 0x816   :  { %4044 = vmatprep.subr.bf16.mxu0 %v10235_v14  ;;  %v10290_v14 = vld [vmem:[%s13825_s10 + $0xf0] ss:$8 sps:$4 sm:$0xff]  }
 0x819   :  { %4045 = vmatpush1.bf16.msra.mxu0 %v10233_v17 }
 0x81a   :  { %4046 = vmatprep.subr.bf16.mxu0 %v10238_v21  ;;  %v10293_v21 = vld [vmem:[%s13825_s10 + $0x200] ss:$8 sps:$4 sm:$0xff]  }
 0x81d   :  { %4047 = vmatpush1.bf16.msra.mxu0 %v10236_v5  ;;  %v10295_v5 = vld [vmem:[%s13825_s10 + $0x204] ss:$8 sps:$4 sm:$0xff]  }
 0x81e   :  { %4048 = vmatprep.subr.bf16.mxu0 %v10241_v49  ;;  %v10298_v49 = vld [vmem:[%s13825_s10 + $0x214] ss:$8 sps:$4 sm:$0xff]  }
 0x821   :  { %4049 = vmatpush1.bf16.msra.mxu0 %v10239_v2  ;;  %v10296_v2 = vld [vmem:[%s13825_s10 + $0x210] ss:$8 sps:$4 sm:$0xff]  }
 0x822   :  { %4050 = vmatprep.subr.bf16.mxu0 %v10244_v15  ;;  %v4970_v15 = vld [vmem:[%s13826_s11 + $0x80] sm:$0xff] }
 0x825   :  { %4051 = vmatpush1.bf16.msra.mxu0 %v10242_v60  ;;  %v10301_v60 = vld [vmem:[%s13825_s10 + $0x224] ss:$8 sps:$4 sm:$0xff]  }
 0x826   :  { %4223 = vmatprep.subr.bf16.mxu0 %v10247_v6  ;;  %v4971_v6 = vld [vmem:[%s13826_s11 + $0x88] sm:$0xff] }
 0x8b3   :  { %v12458_v4 = vpop.f32.mrb[56].mxu0  ;;  %v12464_v38 = vpop.f32.mrb[72].mxu1 }
 0x8b4   :  { %v3696_v44 = vpop.f32.mrb[57].mxu0  ;;  %v12466_v35 = vpop.f32.mrb[73].mxu1 }
 0x8b7   :  { %v12460_v61 = vpop.f32.mrb[58].mxu0  ;;  %v12468_v25 = vpop.f32.mrb[74].mxu1 }
 0x8b8   :  { %v3705_v56 = vpack.c.bf16 %v12460_v61, %v12458_v4  ;;  %v3702_v1 = vpop.f32.mrb[59].mxu0  ;;  %v4352_v34 = vpack.c.bf16 %v12468_v25, %v12464_v38  ;;  %v12472_v37 = vpop.f32.mrb[75].mxu1  ;;  %v12611_v4 = vpack.c.bf16 %v4971_v6, %v4970_v15  ;;  %v4955_v61 = vld [vmem:[%s13826_s11 + $0x8] sm:$0xff]  ;;  %v10346_v15 = vld [vmem:[%s13825_s10 + $0x314] ss:$8 sps:$4 sm:$0xff]  }
 0x8b9   :  { %v3706_v47 = vpack.c.bf16 %v3702_v1, %v3696_v44  ;;  %v4353_v42 = vpack.c.bf16 %v12472_v37, %v12466_v35  ;;  %v4954_v44 = vld [vmem:[%s13826_s11] sm:$0xff]  ;;  %v4973_v1 = vld [vmem:[%s13826_s11 + $0x98] sm:$0xff]  ;;  %v4956_v35 = vld [vmem:[%s13826_s11 + $0x10] sm:$0xff] }
 0x8ba   :  { %v4974_v37 = vld [vmem:[%s13826_s11 + $0xa0] sm:$0xff]  ;;  %9560 = vmatprep.subr.bf16.mxu1 %v12611_v4  ;;  %v10344_v6 = vld [vmem:[%s13825_s10 + $0x310] ss:$8 sps:$4 sm:$0xff]   ;;  %v10352_v25 = vld [vmem:[%s13825_s10 + $0x334] ss:$8 sps:$4 sm:$0xff]  }
 0x8bb   :  { %v3814_v19 = vpop.f32.mrb[60].mxu0  ;;  %v12563_v43 = vpop.f32.mrb[76].mxu1  ;;  %v10347_v38 = vld [vmem:[%s13825_s10 + $0x320] ss:$8 sps:$4 sm:$0xff]  }
 0x8bc   :  { %v3816_v31 = vpop.f32.mrb[61].mxu0  ;;  %v12568_v54 = vpop.f32.mrb[77].mxu1 }
 0x8bf   :  { %v3820_v26 = vpop.f32.mrb[62].mxu0  ;;  %v12570_v62 = vpop.f32.mrb[78].mxu1 }
 0x8c0   :  { %v3825_v30 = vpack.c.bf16 %v3820_v26, %v3814_v19  ;;  %v3822_v36 = vpop.f32.mrb[63].mxu0  ;;  %v4680_v3 = vpack.c.bf16 %v12570_v62, %v12563_v43  ;;  %v12574_v28 = vpop.f32.mrb[79].mxu1  ;;  %v4963_v43 = vld [vmem:[%s13826_s11 + $0x48] sm:$0xff] }
 0x8c1   :  { %v3826_v46 = vpack.c.bf16 %v3822_v36, %v3816_v31  ;;  %v4681_v17 = vpack.c.bf16 %v12574_v28, %v12568_v54  ;;  %v4957_v31 = vld [vmem:[%s13826_s11 + $0x18] sm:$0xff]  ;;  %v10355_v54 = vld [vmem:[%s13825_s10 + $0x344] ss:$8 sps:$4 sm:$0xff]   ;;  %v10353_v28 = vld [vmem:[%s13825_s10 + $0x340] ss:$8 sps:$4 sm:$0xff]  }
 0x8c2   :  { %v12640_v26 = vpack.c.bf16 %v4957_v31, %v4956_v35  ;;  %v10364_v35 = vld [vmem:[%s13825_s10 + $0x374] ss:$8 sps:$4 sm:$0xff]   ;;  %v10362_v31 = vld [vmem:[%s13825_s10 + $0x370] ss:$8 sps:$4 sm:$0xff]  }
 0x8c3   :  { %4052 = vmatprep.mubr.bf16.mxu0 %v3826_v46  ;;  %v4958_v46 = vld [vmem:[%s13826_s11 + $0x20] sm:$0xff] }
 0x8c4   :  { %4053 = vmatmul.mubr.bf16.vlgmr.msra.gmra.mrb[64].mxu0 %v3825_v30  ;;  %v10299_v30 = vld [vmem:[%s13825_s10 + $0x220] ss:$8 sps:$4 sm:$0xff]  }
 0x8c5   :  { %4224 = vmatpush1.bf16.msra.mxu0 %v10245_v12  ;;  %4255 = vmatprep.mubr.bf16.mxu0 %v3706_v47  ;;  %v12622_v47 = vpack.c.bf16 %v4955_v61, %v4954_v44  ;;  %v4959_v12 = vld [vmem:[%s13826_s11 + $0x28] sm:$0xff]  ;;  %v10356_v61 = vld [vmem:[%s13825_s10 + $0x350] ss:$8 sps:$4 sm:$0xff]  }
 0x8c6   :  { %4225 = vmatprep.subr.bf16.mxu0 %v10250_v32  ;;  %v10304_v32 = vld [vmem:[%s13825_s10 + $0x234] ss:$8 sps:$4 sm:$0xff]   ;;  %v10349_v44 = vld [vmem:[%s13825_s10 + $0x324] ss:$8 sps:$4 sm:$0xff]  }
 0x8c7   :  { %9562 = vmatpush3.bf16.msra.mxu1 %v12622_v47 }
 0x8c9   :  { %4226 = vmatpush1.bf16.msra.mxu0 %v10248_v23  ;;  %v4976_v23 = vld [vmem:[%s13826_s11 + $0xb0] sm:$0xff] }
 0x8ca   :  { %4227 = vmatprep.subr.bf16.mxu0 %v10253_v33  ;;  %v4977_v33 = vld [vmem:[%s13826_s11 + $0xb8] sm:$0xff] }
 0x8cd   :  { %4228 = vmatpush1.bf16.msra.mxu0 %v10251_v16  ;;  %v12664_v16 = vpack.c.bf16 %v4959_v12, %v4958_v46  ;;  %v10368_v46 = vld [vmem:[%s13825_s10 + $0x390] ss:$8 sps:$4 sm:$0xff]   ;;  %v10373_v12 = vld [vmem:[%s13825_s10 + $0x3a4] ss:$8 sps:$4 sm:$0xff]  }
 0x8ce   :  { %4229 = vmatprep.subr.bf16.mxu0 %v10256_v7  ;;  %v10302_v7 = vld [vmem:[%s13825_s10 + $0x230] ss:$8 sps:$4 sm:$0xff]  }
 0x8d1   :  { %4230 = vmatpush1.bf16.msra.mxu0 %v10254_v51  ;;  %v12670_v51 = vpack.c.bf16 %v4977_v33, %v4976_v23  ;;  %v10376_v23 = vld [vmem:[%s13825_s10 + $0x3b4] ss:$8 sps:$4 sm:$0xff]   ;;  %v10374_v33 = vld [vmem:[%s13825_s10 + $0x3b0] ss:$8 sps:$4 sm:$0xff]  }
 0x8d2   :  { %4231 = vmatprep.subr.bf16.mxu0 %v10259_v11  ;;  %v4960_v11 = vld [vmem:[%s13826_s11 + $0x30] sm:$0xff] }
 0x8d5   :  { %4232 = vmatpush1.bf16.msra.mxu0 %v10257_v22  ;;  %v4961_v22 = vld [vmem:[%s13826_s11 + $0x38] sm:$0xff] }
 0x8d6   :  { %4233 = vmatprep.subr.bf16.mxu0 %v10262_v13  ;;  %v10307_v13 = vld [vmem:[%s13825_s10 + $0x244] ss:$8 sps:$4 sm:$0xff]  }
 0x8d9   :  { %4234 = vmatpush1.bf16.msra.mxu0 %v10260_v24  ;;  %v12682_v24 = vpack.c.bf16 %v4961_v22, %v4960_v11  ;;  %v10377_v11 = vld [vmem:[%s13825_s10 + $0x3c0] ss:$8 sps:$4 sm:$0xff]   ;;  %v10382_v22 = vld [vmem:[%s13825_s10 + $0x3d4] ss:$8 sps:$4 sm:$0xff]  }
 0x8da   :  { %4235 = vmatprep.subr.bf16.mxu0 %v10265_v48  ;;  %v10305_v48 = vld [vmem:[%s13825_s10 + $0x240] ss:$8 sps:$4 sm:$0xff]  }
 0x8dd   :  { %4236 = vmatpush1.bf16.msra.mxu0 %v10263_v41  ;;  %v10310_v41 = vld [vmem:[%s13825_s10 + $0x254] ss:$8 sps:$4 sm:$0xff]  }
 0x8de   :  { %4237 = vmatprep.subr.bf16.mxu0 %v10268_v57  ;;  %v10308_v57 = vld [vmem:[%s13825_s10 + $0x250] ss:$8 sps:$4 sm:$0xff]  }
 0x8e1   :  { %4238 = vmatpush1.bf16.msra.mxu0 %v10266_v63  ;;  %v10313_v63 = vld [vmem:[%s13825_s10 + $0x264] ss:$8 sps:$4 sm:$0xff]  }
 0x8e2   :  { %4239 = vmatprep.subr.bf16.mxu0 %v10271_v53  ;;  %v10311_v53 = vld [vmem:[%s13825_s10 + $0x260] ss:$8 sps:$4 sm:$0xff]  }
 0x8e5   :  { %4240 = vmatpush1.bf16.msra.mxu0 %v10269_v52  ;;  %v10316_v52 = vld [vmem:[%s13825_s10 + $0x274] ss:$8 sps:$4 sm:$0xff]  }
 0x8e6   :  { %4241 = vmatprep.subr.bf16.mxu0 %v10274_v10  ;;  %v10314_v10 = vld [vmem:[%s13825_s10 + $0x270] ss:$8 sps:$4 sm:$0xff]  }
 0x8e9   :  { %4242 = vmatpush1.bf16.msra.mxu0 %v10272_v29  ;;  %v10319_v29 = vld [vmem:[%s13825_s10 + $0x284] ss:$8 sps:$4 sm:$0xff]  }
 0x8ea   :  { %4243 = vmatprep.subr.bf16.mxu0 %v10277_v40  ;;  %v10317_v40 = vld [vmem:[%s13825_s10 + $0x280] ss:$8 sps:$4 sm:$0xff]  }
 0x8ed   :  { %4244 = vmatpush1.bf16.msra.mxu0 %v10275_v50  ;;  %v10322_v50 = vld [vmem:[%s13825_s10 + $0x294] ss:$8 sps:$4 sm:$0xff]  }
 0x8ee   :  { %4245 = vmatprep.subr.bf16.mxu0 %v10280_v59  ;;  %v10320_v59 = vld [vmem:[%s13825_s10 + $0x290] ss:$8 sps:$4 sm:$0xff]  }
 0x8f1   :  { %4246 = vmatpush1.bf16.msra.mxu0 %v10278_v9  ;;  %v10325_v9 = vld [vmem:[%s13825_s10 + $0x2a4] ss:$8 sps:$4 sm:$0xff]  }
 0x8f2   :  { %4247 = vmatprep.subr.bf16.mxu0 %v10283_v27  ;;  %v10323_v27 = vld [vmem:[%s13825_s10 + $0x2a0] ss:$8 sps:$4 sm:$0xff]  }
 0x8f5   :  { %4248 = vmatpush1.bf16.msra.mxu0 %v10281_v8  ;;  %v10328_v8 = vld [vmem:[%s13825_s10 + $0x2b4] ss:$8 sps:$4 sm:$0xff]  }
 0x8f6   :  { %4249 = vmatprep.subr.bf16.mxu0 %v10286_v20  ;;  %v10326_v20 = vld [vmem:[%s13825_s10 + $0x2b0] ss:$8 sps:$4 sm:$0xff]  }
 0x8f9   :  { %4250 = vmatpush1.bf16.msra.mxu0 %v10284_v58  ;;  %v10331_v58 = vld [vmem:[%s13825_s10 + $0x2c4] ss:$8 sps:$4 sm:$0xff]  }
 0x8fa   :  { %4251 = vmatprep.subr.bf16.mxu0 %v10289_v18  ;;  %v10329_v18 = vld [vmem:[%s13825_s10 + $0x2c0] ss:$8 sps:$4 sm:$0xff]  }
 0x8fd   :  { %4252 = vmatpush1.bf16.msra.mxu0 %v10287_v39  ;;  %v10334_v39 = vld [vmem:[%s13825_s10 + $0x2d4] ss:$8 sps:$4 sm:$0xff]  }
 0x8fe   :  { %4253 = vmatprep.subr.bf16.mxu0 %v10292_v45  ;;  %v10332_v45 = vld [vmem:[%s13825_s10 + $0x2d0] ss:$8 sps:$4 sm:$0xff]  }
 0x901   :  { %4254 = vmatpush1.bf16.msra.mxu0 %v10290_v14  ;;  %v10337_v14 = vld [vmem:[%s13825_s10 + $0x2e4] ss:$8 sps:$4 sm:$0xff]  }
 0x902   :  { %4547 = vmatprep.subr.bf16.mxu0 %v10295_v5  ;;  %v10335_v5 = vld [vmem:[%s13825_s10 + $0x2e0] ss:$8 sps:$4 sm:$0xff]  }
 0x904   :  { %4256 = vmatmul.mubr.bf16.vlgmr.msra.gmra.mrb[64].mxu0 %v3705_v56  ;;  %v4972_v56 = vld [vmem:[%s13826_s11 + $0x90] sm:$0xff] }
 0x905   :  { %4548 = vmatpush1.bf16.msra.mxu0 %v10293_v21  ;;  %4579 = vmatprep.mubr.bf16.mxu0 %v4353_v42  ;;  %v12624_v19 = vpack.c.bf16 %v4973_v1, %v4972_v56  ;;  %v4975_v42 = vld [vmem:[%s13826_s11 + $0xa8] sm:$0xff]  ;;  %v10340_v21 = vld [vmem:[%s13825_s10 + $0x2f4] ss:$8 sps:$4 sm:$0xff]  }
 0x906   :  { %4549 = vmatprep.subr.bf16.mxu0 %v10298_v49  ;;  %v12646_v36 = vpack.c.bf16 %v4975_v42, %v4974_v37  ;;  %v10338_v49 = vld [vmem:[%s13825_s10 + $0x2f0] ss:$8 sps:$4 sm:$0xff]   ;;  %v10361_v56 = vld [vmem:[%s13825_s10 + $0x364] ss:$8 sps:$4 sm:$0xff]   ;;  %v10359_v1 = vld [vmem:[%s13825_s10 + $0x360] ss:$8 sps:$4 sm:$0xff]  }
 0x907   :  { %9564 = vmatprep.subr.bf16.mxu1 %v12624_v19  ;;  %v10367_v37 = vld [vmem:[%s13825_s10 + $0x384] ss:$8 sps:$4 sm:$0xff]   ;;  %v10365_v42 = vld [vmem:[%s13825_s10 + $0x380] ss:$8 sps:$4 sm:$0xff]  }
 0x908   :  { %9566 = vmatpush3.bf16.msra.mxu1 %v12640_v26 }
 0x909   :  { %4550 = vmatpush1.bf16.msra.mxu0 %v10296_v2  ;;  %9568 = vmatprep.subr.bf16.mxu1 %v12646_v36  ;;  %v10343_v2 = vld [vmem:[%s13825_s10 + $0x304] ss:$8 sps:$4 sm:$0xff]  }
 0x90a   :  { %4551 = vmatprep.subr.bf16.mxu0 %v10301_v60  ;;  %v10341_v60 = vld [vmem:[%s13825_s10 + $0x300] ss:$8 sps:$4 sm:$0xff]  }
 0x90c   :  { %9570 = vmatpush3.bf16.msra.mxu1 %v12664_v16 }
 0x90d   :  { %4552 = vmatpush1.bf16.msra.mxu0 %v10299_v30  ;;  %9572 = vmatprep.subr.bf16.mxu1 %v12670_v51  ;;  %v10370_v30 = vld [vmem:[%s13825_s10 + $0x394] ss:$8 sps:$4 sm:$0xff]  }
 0x90e   :  { %4553 = vmatprep.subr.bf16.mxu0 %v10304_v32  ;;  %v10371_v32 = vld [vmem:[%s13825_s10 + $0x3a0] ss:$8 sps:$4 sm:$0xff]  }
 0x910   :  { %9574 = vmatpush3.bf16.msra.mxu1 %v12682_v24 }
 0x911   :  { %4554 = vmatpush1.bf16.msra.mxu0 %v10302_v7  ;;  %v10379_v7 = vld [vmem:[%s13825_s10 + $0x3c4] ss:$8 sps:$4 sm:$0xff]  }
 0x912   :  { %4555 = vmatprep.subr.bf16.mxu0 %v10307_v13  ;;  %v10380_v13 = vld [vmem:[%s13825_s10 + $0x3d0] ss:$8 sps:$4 sm:$0xff]  }
 0x915   :  { %4556 = vmatpush1.bf16.msra.mxu0 %v10305_v48  ;;  %v10385_v48 = vld [vmem:[%s13825_s10 + $0x3e4] ss:$8 sps:$4 sm:$0xff]  }
 0x916   :  { %4557 = vmatprep.subr.bf16.mxu0 %v10310_v41  ;;  %v10383_v41 = vld [vmem:[%s13825_s10 + $0x3e0] ss:$8 sps:$4 sm:$0xff]  }
 0x919   :  { %4558 = vmatpush1.bf16.msra.mxu0 %v10308_v57  ;;  %v10388_v57 = vld [vmem:[%s13825_s10 + $0x3f4] ss:$8 sps:$4 sm:$0xff]  }
 0x91a   :  { %4559 = vmatprep.subr.bf16.mxu0 %v10313_v63  ;;  %v10386_v63 = vld [vmem:[%s13825_s10 + $0x3f0] ss:$8 sps:$4 sm:$0xff]  }
 0x91d   :  { %4560 = vmatpush1.bf16.msra.mxu0 %v10311_v53  ;;  %v4978_v53 = vld [vmem:[%s13826_s11 + $0xc0] sm:$0xff] }
 0x91e   :  { %4561 = vmatprep.subr.bf16.mxu0 %v10316_v52  ;;  %v4979_v52 = vld [vmem:[%s13826_s11 + $0xc8] sm:$0xff] }
 0x921   :  { %4562 = vmatpush1.bf16.msra.mxu0 %v10314_v10  ;;  %v12867_v10 = vpack.c.bf16 %v4979_v52, %v4978_v53 }
 0x922   :  { %4563 = vmatprep.subr.bf16.mxu0 %v10319_v29  ;;  %v4962_v29 = vld [vmem:[%s13826_s11 + $0x40] sm:$0xff] }
 0x923   :  { %v12875_v62 = vpack.c.bf16 %v4963_v43, %v4962_v29  ;;  %9576 = vmatprep.subr.bf16.mxu1 %v12867_v10  ;;  %v5143_v29 = vld [vmem:[#allocation10 + $0x28] sm:$0xff]  ;;  %v5145_v43 = vld [vmem:[#allocation10 + $0x38] sm:$0xff] }
 0x925   :  { %4564 = vmatpush1.bf16.msra.mxu0 %v10317_v40  ;;  %9578 = vmatpush3.bf16.msra.mxu1 %v12875_v62  ;;  %v4981_v40 = vld [vmem:[%s13826_s11 + $0xd8] sm:$0xff] }
 0x926   :  { %4565 = vmatprep.subr.bf16.mxu0 %v10322_v50 }
 0x929   :  { %4566 = vmatpush1.bf16.msra.mxu0 %v10320_v59  ;;  %v4964_v59 = vld [vmem:[%s13826_s11 + $0x50] sm:$0xff] }
 0x92a   :  { %4567 = vmatprep.subr.bf16.mxu0 %v10325_v9  ;;  %v4965_v9 = vld [vmem:[%s13826_s11 + $0x58] sm:$0xff] }
 0x92d   :  { %4568 = vmatpush1.bf16.msra.mxu0 %v10323_v27  ;;  %v12893_v27 = vpack.c.bf16 %v4965_v9, %v4964_v59 }
 0x92e   :  { %4569 = vmatprep.subr.bf16.mxu0 %v10328_v8  ;;  %v4982_v8 = vld [vmem:[%s13826_s11 + $0xe0] sm:$0xff] }
 0x931   :  { %4570 = vmatpush1.bf16.msra.mxu0 %v10326_v20  ;;  %v4983_v20 = vld [vmem:[%s13826_s11 + $0xe8] sm:$0xff] }
 0x932   :  { %4571 = vmatprep.subr.bf16.mxu0 %v10331_v58  ;;  %v9583_v58 = vpack.c.bf16 %v4983_v20, %v4982_v8 }
 0x935   :  { %4572 = vmatpush1.bf16.msra.mxu0 %v10329_v18  ;;  %v4966_v18 = vld [vmem:[%s13826_s11 + $0x60] sm:$0xff] }
 0x936   :  { %4573 = vmatprep.subr.bf16.mxu0 %v10334_v39  ;;  %v4967_v39 = vld [vmem:[%s13826_s11 + $0x68] sm:$0xff] }
 0x939   :  { %4574 = vmatpush1.bf16.msra.mxu0 %v10332_v45  ;;  %v9585_v45 = vpack.c.bf16 %v4967_v39, %v4966_v18 }
 0x93a   :  { %4575 = vmatprep.subr.bf16.mxu0 %v10337_v14  ;;  %v4984_v14 = vld [vmem:[%s13826_s11 + $0xf0] sm:$0xff] }
 0x93d   :  { %4576 = vmatpush1.bf16.msra.mxu0 %v10335_v5  ;;  %v4985_v5 = vld [vmem:[%s13826_s11 + $0xf8] sm:$0xff] }
 0x93e   :  { %4577 = vmatprep.subr.bf16.mxu0 %v10340_v21  ;;  %v4968_v21 = vld [vmem:[%s13826_s11 + $0x70] sm:$0xff] }
 0x941   :  { %4578 = vmatpush1.bf16.msra.mxu0 %v10338_v49  ;;  %v9587_v49 = vpack.c.bf16 %v4985_v5, %v4984_v14 }
 0x942   :  { %4875 = vmatprep.subr.bf16.mxu0 %v10343_v2  ;;  %v4969_v2 = vld [vmem:[%s13826_s11 + $0x78] sm:$0xff] }
 0x944   :  { %4580 = vmatmul.mubr.bf16.vlgmr.msra.gmra.mrb[64].mxu0 %v4352_v34  ;;  %v10350_v34 = vld [vmem:[%s13825_s10 + $0x330] ss:$8 sps:$4 sm:$0xff]  }
 0x945   :  { %4876 = vmatpush1.bf16.msra.mxu0 %v10341_v60  ;;  %4907 = vmatprep.mubr.bf16.mxu0 %v4681_v17  ;;  %v10358_v17 = vld [vmem:[%s13825_s10 + $0x354] ss:$8 sps:$4 sm:$0xff]   ;;  %v9589_v60 = vpack.c.bf16 %v4969_v2, %v4968_v21 }
 0x946   :  { %4877 = vmatprep.subr.bf16.mxu0 %v10346_v15 }
 0x949   :  { %4878 = vmatpush1.bf16.msra.mxu0 %v10344_v6 }
 0x94a   :  { %4879 = vmatprep.subr.bf16.mxu0 %v10349_v44 }
 0x94d   :  { %4880 = vmatpush1.bf16.msra.mxu0 %v10347_v38 }
 0x94e   :  { %4881 = vmatprep.subr.bf16.mxu0 %v10352_v25 }
 0x951   :  { %4882 = vmatpush1.bf16.msra.mxu0 %v10350_v34 }
 0x952   :  { %4883 = vmatprep.subr.bf16.mxu0 %v10355_v54 }
 0x955   :  { %4884 = vmatpush1.bf16.msra.mxu0 %v10353_v28 }
 0x956   :  { %4885 = vmatprep.subr.bf16.mxu0 %v10358_v17 }
 0x959   :  { %4886 = vmatpush1.bf16.msra.mxu0 %v10356_v61 }
 0x95a   :  { %4887 = vmatprep.subr.bf16.mxu0 %v10361_v56 }
 0x95d   :  { %4888 = vmatpush1.bf16.msra.mxu0 %v10359_v1 }
 0x95e   :  { %4889 = vmatprep.subr.bf16.mxu0 %v10364_v35 }
 0x961   :  { %4890 = vmatpush1.bf16.msra.mxu0 %v10362_v31 }
 0x962   :  { %4891 = vmatprep.subr.bf16.mxu0 %v10367_v37 }
 0x965   :  { %4892 = vmatpush1.bf16.msra.mxu0 %v10365_v42 }
 0x966   :  { %4893 = vmatprep.subr.bf16.mxu0 %v10370_v30 }
 0x969   :  { %4894 = vmatpush1.bf16.msra.mxu0 %v10368_v46 }
 0x96a   :  { %4895 = vmatprep.subr.bf16.mxu0 %v10373_v12 }
 0x96d   :  { %4896 = vmatpush1.bf16.msra.mxu0 %v10371_v32 }
 0x96e   :  { %4897 = vmatprep.subr.bf16.mxu0 %v10376_v23 }
 0x971   :  { %4898 = vmatpush1.bf16.msra.mxu0 %v10374_v33 }
 0x972   :  { %4899 = vmatprep.subr.bf16.mxu0 %v10379_v7 }
 0x975   :  { %4900 = vmatpush1.bf16.msra.mxu0 %v10377_v11 }
 0x976   :  { %4901 = vmatprep.subr.bf16.mxu0 %v10382_v22 }
 0x979   :  { %4902 = vmatpush1.bf16.msra.mxu0 %v10380_v13 }
 0x97a   :  { %4903 = vmatprep.subr.bf16.mxu0 %v10385_v48 }
 0x97d   :  { %4904 = vmatpush1.bf16.msra.mxu0 %v10383_v41 }
 0x97e   :  { %4905 = vmatprep.subr.bf16.mxu0 %v10388_v57 }
 0x981   :  { %4906 = vmatpush1.bf16.msra.mxu0 %v10386_v63 }
 0x984   :  { %4908 = vmatmul.mubr.bf16.vlgmr.msra.gmra.mrb[64].mxu0 %v4680_v3  ;;  %v4980_v3 = vld [vmem:[%s13826_s11 + $0xd0] sm:$0xff] }
 0x985   :  { %6021 = vmatprep.mubr.f32.mxu0 %v10872_v0  ;;  %v12885_v50 = vpack.c.bf16 %v4981_v40, %v4980_v3  ;;  %v9627_v3 = vpack.c.bf16 %v5145_v43, %v5143_v29  ;;  %v5142_v40 = vld [vmem:[#allocation10 + $0x20] sm:$0xff] }
 0x986   :  { %v10403_v29 = vld [vmem:[%s13831_s16 + $0x144] ss:$8 sps:$4 sm:$0xff]   ;;  %v10401_v43 = vld [vmem:[%s13831_s16 + $0x140] ss:$8 sps:$4 sm:$0xff]  }
 0x987   :  { %9580 = vmatprep.subr.bf16.mxu1 %v12885_v50 }
 0x988   :  { %9582 = vmatpush3.bf16.msra.mxu1 %v12893_v27 }
 0x989   :  { %9584 = vmatprep.subr.bf16.mxu1 %v9583_v58 }
 0x98c   :  { %9586 = vmatpush3.bf16.msra.mxu1 %v9585_v45 }
 0x98d   :  { %9588 = vmatprep.subr.bf16.mxu1 %v9587_v49 }
 0x990   :  { %9590 = vmatpush3.bf16.msra.mxu1 %v9589_v60 }
 0x991   :  { %9592 = vmatprep.subr.bf16.mxu1 %v12611_v4 }
 0xa57   :  { %v12922_v15 = vpop.f32.mrb[64].mxu0 }
 0xa58   :  { %v12924_v6 = vpop.f32.mrb[65].mxu0  ;;  %v4936_v38 = vmul.f32 %v12922_v15, %v12922_v15 }
 0xa59   :  { %v12926_v44 = vpop.f32.mrb[66].mxu0  ;;  %v4937_v4 = vmul.f32 %v12924_v6, %v12924_v6 }
 0xa5a   :  { %v4922_v25 = vadd.f32 %v12926_v44, %v12922_v15  ;;  %v4938_v34 = vmul.f32 %v12926_v44, %v12926_v44  ;;  %v12934_v54 = vpop.f32.mrb[67].mxu0 }
 0xa5b   :  { %v4929_v28 = vadd.f32 %v12934_v54, %v12924_v6  ;;  %v4939_v17 = vmul.f32 %v12934_v54, %v12934_v54 }
 0xa5c   :  { %v4923_v61 = vrot.slane %v4922_v25, 4  ;;  %v4940_v56 = vadd.f32 %v4938_v34, %v4936_v38 }
 0xa5d   :  { %v4930_v1 = vrot.slane %v4929_v28, 4  ;;  %v4947_v35 = vadd.f32 %v4939_v17, %v4937_v4 }
 0xa5e   :  { %v4924_v31 = vadd.f32 %v4923_v61, %v4922_v25  ;;  %v4941_v63 = vrot.slane %v4940_v56, 4  ;;  %v5135_v25 = vld [vmem:[#allocation13] sm:$0x1] }
 0xa5f   :  { %v4931_v37 = vadd.f32 %v4930_v1, %v4929_v28  ;;  %v4948_v42 = vrot.slane %v4947_v35, 4 }
 0xa60   :  { %v4925_v30 = vrot.slane %v4924_v31, 2  ;;  %v4942_v53 = vadd.f32 %v4941_v63, %v4940_v56  ;;  %v5953_v63 = vld [vmem:[#allocation15 + $0x10] sm:$0xff] }
 0xa61   :  { %v4932_v46 = vrot.slane %v4931_v37, 2  ;;  %v4949_v12 = vadd.f32 %v4948_v42, %v4947_v35 }
 0xa62   :  { %v4926_v32 = vadd.f32 %v4925_v30, %v4924_v31 }
 0xa63   :  { %v4933_v23 = vadd.f32 %v4932_v46, %v4931_v37  ;;  %v4950_v33 = vrot.slane %v4949_v12, 2 }
 0xa64   :  { %v4927_v7 = vrot.slane %v4926_v32, 1 }
 0xa65   :  { %v4934_v11 = vrot.slane %v4933_v23, 1  ;;  %v4951_v22 = vadd.f32 %v4950_v33, %v4949_v12 }
 0xa66   :  { %v4928_v41 = vadd.f32 %v4927_v7, %v4926_v32 }
 0xa67   :  { %v4935_v13 = vadd.f32 %v4934_v11, %v4933_v23  ;;  %v4952_v48 = vrot.slane %v4951_v22, 1 }
 0xa69   :  { %5050 = vmatprep.mubr.f32.mxu1 %v4935_v13  ;;  %v4953_v57 = vadd.f32 %v4952_v48, %v4951_v22 }
 0xa6a   :  { %5051 = vmatmul.mubr.f32.vlgmr.msra.gmra.mrb[80].mxu1 %v4928_v41 }
 0xa6b   :  { %9594 = vmatpush3.bf16.msra.mxu1 %v12622_v47  ;;  %5122 = vmatprep.mubr.f32.mxu1 %v4953_v57  ;;  %v4943_v47 = vrot.slane %v4942_v53, 2  ;;  %v5330_v57 = vld [vmem:[#allocation15] sm:$0xff] }
 0xa6c   :  { %9596 = vmatprep.subr.bf16.mxu1 %v12624_v19 }
 0xa6d   :  { %v4944_v19 = vadd.f32 %v4943_v47, %v4942_v53  ;;  %v10391_v53 = vld [vmem:[%s13831_s16 + $0x104] ss:$8 sps:$4 sm:$0xff]  }
 0xa6e   :  { %v5440_v47 = vld [vmem:[#allocation15 + $0x8] sm:$0xff] }
 0xa6f   :  { %9598 = vmatpush3.bf16.msra.mxu1 %v12640_v26  ;;  %v4945_v26 = vrot.slane %v4944_v19, 1 }
 0xa70   :  { %9600 = vmatprep.subr.bf16.mxu1 %v12646_v36 }
 0xa71   :  { %v4946_v36 = vadd.f32 %v4945_v26, %v4944_v19  ;;  %v10389_v19 = vld [vmem:[%s13831_s16 + $0x100] ss:$8 sps:$4 sm:$0xff]  }
 0xa72   :  { %v6267_v26 = vld [vmem:[#allocation15 + $0x18] sm:$0xff] }
 0xa73   :  { %9602 = vmatpush3.bf16.msra.mxu1 %v12664_v16  ;;  %v5139_v16 = vld [vmem:[#allocation10 + $0x8] sm:$0xff] }
 0xa74   :  { %9604 = vmatprep.subr.bf16.mxu1 %v12670_v51  ;;  %v5141_v51 = vld [vmem:[#allocation10 + $0x18] sm:$0xff] }
 0xa75   :  { %v9623_v52 = vpack.c.bf16 %v5141_v51, %v5139_v16  ;;  %v10392_v16 = vld [vmem:[%s13831_s16 + $0x110] ss:$8 sps:$4 sm:$0xff]   ;;  %v10397_v51 = vld [vmem:[%s13831_s16 + $0x124] ss:$8 sps:$4 sm:$0xff]  }
 0xa77   :  { %9606 = vmatpush3.bf16.msra.mxu1 %v12682_v24  ;;  %v5138_v24 = vld [vmem:[#allocation10] sm:$0xff] }
 0xa78   :  { %9608 = vmatprep.subr.bf16.mxu1 %v12867_v10  ;;  %v5140_v10 = vld [vmem:[#allocation10 + $0x10] sm:$0xff] }
 0xa7b   :  { %9610 = vmatpush3.bf16.msra.mxu1 %v12875_v62  ;;  %v9625_v62 = vpack.c.bf16 %v5140_v10, %v5138_v24  ;;  %v10395_v24 = vld [vmem:[%s13831_s16 + $0x120] ss:$8 sps:$4 sm:$0xff]   ;;  %v10398_v10 = vld [vmem:[%s13831_s16 + $0x130] ss:$8 sps:$4 sm:$0xff]  }
 0xa7c   :  { %9612 = vmatprep.subr.bf16.mxu1 %v12885_v50  ;;  %v5144_v50 = vld [vmem:[#allocation10 + $0x30] sm:$0xff] }
 0xa7d   :  { %v9629_v59 = vpack.c.bf16 %v5144_v50, %v5142_v40  ;;  %v10409_v40 = vld [vmem:[%s13831_s16 + $0x164] ss:$8 sps:$4 sm:$0xff]   ;;  %v10407_v50 = vld [vmem:[%s13831_s16 + $0x160] ss:$8 sps:$4 sm:$0xff]  }
 0xa7f   :  { %9614 = vmatpush3.bf16.msra.mxu1 %v12893_v27 }
 0xa80   :  { %9616 = vmatprep.subr.bf16.mxu1 %v9583_v58 }
 0xa83   :  { %9618 = vmatpush3.bf16.msra.mxu1 %v9585_v45 }
 0xa84   :  { %9620 = vmatprep.subr.bf16.mxu1 %v9587_v49  ;;  %v5131_v49 = vld [vmem:[#allocation12] sm:$0x1] }
 0xa87   :  { %9622 = vmatpush3.bf16.msra.mxu1 %v9589_v60 }
 0xa88   :  { %9624 = vmatprep.subr.bf16.mxu1 %v9623_v52 }
 0xa8a   :  { %5123 = vmatmul.mubr.f32.vlgmr.msra.gmra.mrb[82].mxu1 %v4946_v36  ;;  %v10394_v36 = vld [vmem:[%s13831_s16 + $0x114] ss:$8 sps:$4 sm:$0xff]  }
 0xa8b   :  { %5213 = vmatprep.mubr.f32.mxu1 %v10872_v0  ;;  %9626 = vmatpush1.bf16.msra.mxu1 %v9625_v62 }
 0xa8c   :  { %9628 = vmatprep.subr.bf16.mxu1 %v9627_v3 }
 0xa8f   :  { %9630 = vmatpush1.bf16.msra.mxu1 %v9629_v59 }
 0xa90   :  { %9632 = vmatprep.subr.bf16.mxu1 %v9623_v52  ;;  %v10400_v52 = vld [vmem:[%s13831_s16 + $0x134] ss:$8 sps:$4 sm:$0xff]  }
 0xb3d   :  { %v9067_v9 = vpop.f32.mrb[80].mxu1 }
 0xb3e   :  { %v9068_v27 = vpop.f32.mrb[81].mxu1 }
 0xb3f   :  { %v9069_v8 = vadd.f32 %v9068_v27, %v9067_v9  ;;  %v10410_v9 = vld [vmem:[%s13831_s16 + $0x170] ss:$8 sps:$4 sm:$0xff]   ;;  %v10415_v27 = vld [vmem:[%s13831_s16 + $0x184] ss:$8 sps:$4 sm:$0xff]  }
 0xb41   :  { %v5057_v20 = vmul.f32 0.0078125, %v9069_v8  ;;  %v10413_v8 = vld [vmem:[%s13831_s16 + $0x180] ss:$8 sps:$4 sm:$0xff]  }
 0xb43   :  { %v5129_v45 = vmul.f32 %v5057_v20, %v5057_v20 }
 0xb5d   :  { %v9102_v58 = vpop.f32.mrb[82].mxu1 }
 0xb5e   :  { %v9103_v18 = vpop.f32.mrb[83].mxu1 }
 0xb5f   :  { %v9104_v39 = vadd.f32 %v9103_v18, %v9102_v58  ;;  %v10416_v58 = vld [vmem:[%s13831_s16 + $0x190] ss:$8 sps:$4 sm:$0xff]   ;;  %v10421_v18 = vld [vmem:[%s13831_s16 + $0x1a4] ss:$8 sps:$4 sm:$0xff]  }
 0xb61   :  { %v5128_v14 = vmul.f32 0.0078125, %v9104_v39  ;;  %v10419_v39 = vld [vmem:[%s13831_s16 + $0x1a0] ss:$8 sps:$4 sm:$0xff]  }
 0xb63   :  { %v5130_v5 = vsub.f32 %v5128_v14, %v5129_v45  ;;  %v10424_v45 = vld [vmem:[%s13831_s16 + $0x1b4] ss:$8 sps:$4 sm:$0xff]   ;;  %v10422_v14 = vld [vmem:[%s13831_s16 + $0x1b0] ss:$8 sps:$4 sm:$0xff]  }
 0xb65   :  { %v5132_v21 = vadd.f32 1e-05, %v5130_v5  ;;  %v10427_v5 = vld [vmem:[%s13831_s16 + $0x1c4] ss:$8 sps:$4 sm:$0xff]  }
 0xb67   :  { %10647 = vrsqrt.f32 %v5132_v21  ;;  %v10425_v21 = vld [vmem:[%s13831_s16 + $0x1c0] ss:$8 sps:$4 sm:$0xff]  }
 0xb71   :  { %v10648_v2 = vpop.eup %10647 }
 0xb72   :  { %v5134_v60 = vmul.f32 %v10648_v2, %v5131_v49  ;;  %v10430_v49 = vld [vmem:[%s13831_s16 + $0x1d4] ss:$8 sps:$4 sm:$0xff]   ;;  %v10428_v2 = vld [vmem:[%s13831_s16 + $0x1d0] ss:$8 sps:$4 sm:$0xff]  }
 0xb74   :  { %8566 = vmatmul.mubr.msk.f32.vlgmr.msra.gmra.mrb[84].mxu1 %vm3621_vm11, %v5134_v60  ;;  %v5136_v38 = vmul.f32 %v5134_v60, %v5057_v20  ;;  %v10418_v20 = vld [vmem:[%s13831_s16 + $0x194] ss:$8 sps:$4 sm:$0xff]   ;;  %v10433_v60 = vld [vmem:[%s13831_s16 + $0x1e4] ss:$8 sps:$4 sm:$0xff]  }
 0xb75   :  { %9634 = vmatpush1.bf16.msra.mxu1 %v9625_v62  ;;  %5287 = vmatprep.mubr.f32.mxu1 %v10872_v0  ;;  %v10406_v62 = vld [vmem:[%s13831_s16 + $0x154] ss:$8 sps:$4 sm:$0xff]  }
 0xb76   :  { %9636 = vmatprep.subr.bf16.mxu1 %v9627_v3  ;;  %v5137_v34 = vsub.f32 %v5135_v25, %v5136_v38  ;;  %v10404_v3 = vld [vmem:[%s13831_s16 + $0x150] ss:$8 sps:$4 sm:$0xff]   ;;  %v10431_v38 = vld [vmem:[%s13831_s16 + $0x1e0] ss:$8 sps:$4 sm:$0xff]   ;;  %v10436_v25 = vld [vmem:[%s13831_s16 + $0x1f4] ss:$8 sps:$4 sm:$0xff]  }
 0xb79   :  { %9638 = vmatpush1.bf16.msra.mxu1 %v9629_v59  ;;  %v10412_v59 = vld [vmem:[%s13831_s16 + $0x174] ss:$8 sps:$4 sm:$0xff]  }
 0xb7c   :  { %8567 = vmatmul.mubr.msk.f32.vlgmr.msra.gmra.mrb[86].mxu1 %vm3621_vm11, %v5137_v34  ;;  %v10434_v34 = vld [vmem:[%s13831_s16 + $0x1f0] ss:$8 sps:$4 sm:$0xff]  }
 0xb7d   :  { %5398 = vmatprep.mubr.f32.mxu1 %v10872_v0 }
 0xc47   :  { %v5215_v4 = vpop.f32.mrb[84].mxu1 }
 0xc48   :  { %v5297_v28 = vrot.slane %v5215_v4, %v12331_v55  ;;  %v5217_v17 = vpop.f32.mrb[85].mxu1  ;;  %v10439_v4 = vld [vmem:[%s13831_s16 + $0x4] ss:$8 sps:$4 sm:$0xff]  }
 0xc49   :  { %v5301_v61 = vrot.slane %v5217_v17, %v12331_v55 }
 0xc4a   :  { %v5302_v56 = vmul.f32 %v5297_v28, %v12922_v15  ;;  %v5304_v1 = vmul.f32 %v5297_v28, %v12926_v44 }
 0xc4b   :  { %v5303_v35 = vmul.f32 %v5301_v61, %v12924_v6  ;;  %v5305_v31 = vmul.f32 %v5301_v61, %v12934_v54 }
 0xc4f   :  { %v5289_v37 = vpop.f32.mrb[86].mxu1 }
 0xc50   :  { %v5309_v42 = vrot.slane %v5289_v37, %v12331_v55  ;;  %v5291_v30 = vpop.f32.mrb[87].mxu1  ;;  %v10437_v37 = vld [vmem:[%s13831_s16] ss:$8 sps:$4 sm:$0xff]  }
 0xc51   :  { %v5313_v46 = vrot.slane %v5291_v30, %v12331_v55  ;;  %v10442_v30 = vld [vmem:[%s13831_s16 + $0x14] ss:$8 sps:$4 sm:$0xff]  }
 0xc52   :  { %v5314_v12 = vadd.f32 %v5309_v42, %v5302_v56  ;;  %v5316_v32 = vadd.f32 %v5309_v42, %v5304_v1 }
 0xc53   :  { %v5315_v23 = vadd.f32 %v5313_v46, %v5303_v35  ;;  %v5317_v33 = vadd.f32 %v5313_v46, %v5305_v31 }
 0xc54   :  { %vm5318_vm12 = vcmp.ge.f32.partialorder %v5314_v12, 0.0  ;;  %vm5320_vm13 = vcmp.ge.f32.partialorder %v5316_v32, 0.0  ;;  %v5322_v7 = vmul.f32 0.2, %v5314_v12  ;;  %v5324_v15 = vmul.f32 0.2, %v5316_v32 }
 0xc55   :  { %vm5319_vm14 = vcmp.ge.f32.partialorder %v5315_v23, 0.0  ;;  %vm5321_vm15 = vcmp.ge.f32.partialorder %v5317_v33, 0.0  ;;  %v5323_v44 = vmul.f32 0.2, %v5315_v23  ;;  %v5325_v6 = vmul.f32 0.2, %v5317_v33 }
 0xc56   :  { %v5326_v11 = vsel %vm5318_vm12, %v5314_v12, %v5322_v7  ;;  %v5328_v54 = vsel %vm5320_vm13, %v5316_v32, %v5324_v15  ;;  %v10440_v12 = vld [vmem:[%s13831_s16 + $0x10] ss:$8 sps:$4 sm:$0xff]   ;;  %v10445_v32 = vld [vmem:[%s13831_s16 + $0x24] ss:$8 sps:$4 sm:$0xff]  }
 0xc57   :  { %v5327_v22 = vsel %vm5319_vm14, %v5315_v23, %v5323_v44  ;;  %v5329_v13 = vsel %vm5321_vm15, %v5317_v33, %v5325_v6  ;;  %v9641_v48 = vpack.c.bf16 %v5328_v54, %v5326_v11  ;;  %v10443_v23 = vld [vmem:[%s13831_s16 + $0x20] ss:$8 sps:$4 sm:$0xff]   ;;  %v10448_v33 = vld [vmem:[%s13831_s16 + $0x34] ss:$8 sps:$4 sm:$0xff]   ;;  %v10446_v7 = vld [vmem:[%s13831_s16 + $0x30] ss:$8 sps:$4 sm:$0xff]  }
 0xc58   :  { %v9639_v41 = vpack.c.bf16 %v5329_v13, %v5327_v22  ;;  %v10451_v15 = vld [vmem:[%s13831_s16 + $0x44] ss:$8 sps:$4 sm:$0xff]   ;;  %v10449_v44 = vld [vmem:[%s13831_s16 + $0x40] ss:$8 sps:$4 sm:$0xff]   ;;  %v10454_v6 = vld [vmem:[%s13831_s16 + $0x54] ss:$8 sps:$4 sm:$0xff]  }
 0xc59   :  { %v10452_v11 = vld [vmem:[%s13831_s16 + $0x50] ss:$8 sps:$4 sm:$0xff]   ;;  %v10457_v54 = vld [vmem:[%s13831_s16 + $0x64] ss:$8 sps:$4 sm:$0xff]   ;;  %v10455_v22 = vld [vmem:[%s13831_s16 + $0x60] ss:$8 sps:$4 sm:$0xff]  }
 0xc5a   :  { %9640 = vmatprep.subr.bf16.mxu1 %v9639_v41  ;;  %9648 = vmatprep.subr.bf16.mxu0 %v9639_v41  ;;  %v10460_v13 = vld [vmem:[%s13831_s16 + $0x74] ss:$8 sps:$4 sm:$0xff]  }
 0xc5b   :  { %9642 = vmatpush1.bf16.msra.mxu1 %v9641_v48  ;;  %9650 = vmatpush1.bf16.msra.mxu0 %v9641_v48 }
 0xc5c   :  { %9644 = vmatprep.subr.bf16.mxu1 %v9639_v41  ;;  %9652 = vmatprep.subr.bf16.mxu0 %v9639_v41  ;;  %v10463_v41 = vld [vmem:[%s13831_s16 + $0x84] ss:$8 sps:$4 sm:$0xff]  }
 0xc5e   :  { %8568 = vmatmul.mubr.msk.f32.vlgmr.msra.gmra.mrb[88].mxu1 %vm3414_vm2, %v5330_v57  ;;  %8666 = vmatmul.mubr.msk.f32.vlgmr.msra.gmra.mrb[68].mxu0 %vm3414_vm2, %v5953_v63  ;;  %v10461_v57 = vld [vmem:[%s13831_s16 + $0x80] ss:$8 sps:$4 sm:$0xff]   ;;  %v10466_v63 = vld [vmem:[%s13831_s16 + $0x94] ss:$8 sps:$4 sm:$0xff]  }
 0xc5f   :  { %9646 = vmatpush1.bf16.msra.mxu1 %v9641_v48  ;;  %9654 = vmatpush1.bf16.msra.mxu0 %v9641_v48  ;;  %v10458_v48 = vld [vmem:[%s13831_s16 + $0x70] ss:$8 sps:$4 sm:$0xff]  }
 0xc60   :  { %5508 = vmatprep.mubr.f32.mxu1 %v10872_v0  ;;  %5710 = vmatprep.subr.bf16.mxu1 %v10391_v53  ;;  %v10464_v53 = vld [vmem:[%s13831_s16 + $0x90] ss:$8 sps:$4 sm:$0xff]  }
 0xc61   :  { %6335 = vmatprep.mubr.f32.mxu0 %v10872_v0 }
 0xc62   :  { %8569 = vmatmul.mubr.msk.f32.vlgmr.msra.gmra.mrb[90].mxu1 %vm3414_vm2, %v5440_v47  ;;  %8731 = vmatmul.mubr.msk.f32.vlgmr.msra.gmra.mrb[70].mxu0 %vm3414_vm2, %v6267_v26  ;;  %v10469_v47 = vld [vmem:[%s13831_s16 + $0xa4] ss:$8 sps:$4 sm:$0xff]   ;;  %v10472_v26 = vld [vmem:[%s13831_s16 + $0xb4] ss:$8 sps:$4 sm:$0xff]   ;;  %vm6981_vm2 = vcmask 64512  }
 0xc63   :  { %5711 = vmatpush1.bf16.msra.mxu1 %v10389_v19  ;;  %v10467_v19 = vld [vmem:[%s13831_s16 + $0xa0] ss:$8 sps:$4 sm:$0xff]  }
 0xc64   :  { %5712 = vmatprep.subr.bf16.mxu1 %v10394_v36  ;;  %v10470_v36 = vld [vmem:[%s13831_s16 + $0xb0] ss:$8 sps:$4 sm:$0xff]  }
 0xc67   :  { %5713 = vmatpush1.bf16.msra.mxu1 %v10392_v16  ;;  %v10475_v16 = vld [vmem:[%s13831_s16 + $0xc4] ss:$8 sps:$4 sm:$0xff]  }
 0xc68   :  { %5714 = vmatprep.subr.bf16.mxu1 %v10397_v51  ;;  %v10473_v51 = vld [vmem:[%s13831_s16 + $0xc0] ss:$8 sps:$4 sm:$0xff]  }
 0xc6b   :  { %5715 = vmatpush1.bf16.msra.mxu1 %v10395_v24  ;;  %v10478_v24 = vld [vmem:[%s13831_s16 + $0xd4] ss:$8 sps:$4 sm:$0xff]  }
 0xc6c   :  { %5716 = vmatprep.subr.bf16.mxu1 %v10400_v52  ;;  %v10476_v52 = vld [vmem:[%s13831_s16 + $0xd0] ss:$8 sps:$4 sm:$0xff]  }
 0xc6f   :  { %5717 = vmatpush1.bf16.msra.mxu1 %v10398_v10  ;;  %v10481_v10 = vld [vmem:[%s13831_s16 + $0xe4] ss:$8 sps:$4 sm:$0xff]  }
 0xc70   :  { %5718 = vmatprep.subr.bf16.mxu1 %v10403_v29  ;;  %v10479_v29 = vld [vmem:[%s13831_s16 + $0xe0] ss:$8 sps:$4 sm:$0xff]  }
 0xc73   :  { %5719 = vmatpush1.bf16.msra.mxu1 %v10401_v43  ;;  %v10484_v43 = vld [vmem:[%s13831_s16 + $0xf4] ss:$8 sps:$4 sm:$0xff]  }
 0xc74   :  { %5720 = vmatprep.subr.bf16.mxu1 %v10406_v62  ;;  %v10482_v62 = vld [vmem:[%s13831_s16 + $0xf0] ss:$8 sps:$4 sm:$0xff]  }
 0xc77   :  { %5721 = vmatpush1.bf16.msra.mxu1 %v10404_v3 }
 0xc78   :  { %5722 = vmatprep.subr.bf16.mxu1 %v10409_v40  ;;  %v10487_v40 = vld [vmem:[%s13831_s16 + $0x204] ss:$8 sps:$4 sm:$0xff]  }
 0xc7b   :  { %5723 = vmatpush1.bf16.msra.mxu1 %v10407_v50 }
 0xc7c   :  { %5724 = vmatprep.subr.bf16.mxu1 %v10412_v59  ;;  %v10485_v59 = vld [vmem:[%s13831_s16 + $0x200] ss:$8 sps:$4 sm:$0xff]  }
 0xc7f   :  { %5725 = vmatpush1.bf16.msra.mxu1 %v10410_v9 }
 0xc80   :  { %5726 = vmatprep.subr.bf16.mxu1 %v10415_v27 }
 0xc83   :  { %5727 = vmatpush1.bf16.msra.mxu1 %v10413_v8  ;;  %v10490_v8 = vld [vmem:[%s13831_s16 + $0x214] ss:$8 sps:$4 sm:$0xff]  }
 0xc84   :  { %5728 = vmatprep.subr.bf16.mxu1 %v10418_v20  ;;  %v10488_v20 = vld [vmem:[%s13831_s16 + $0x210] ss:$8 sps:$4 sm:$0xff]  }
 0xc87   :  { %5729 = vmatpush1.bf16.msra.mxu1 %v10416_v58  ;;  %v10493_v58 = vld [vmem:[%s13831_s16 + $0x224] ss:$8 sps:$4 sm:$0xff]  }
 0xc88   :  { %5730 = vmatprep.subr.bf16.mxu1 %v10421_v18  ;;  %v6622_v18 = vld [vmem:[%s13832_s17 + $0x80] sm:$0xff] }
 0xc8b   :  { %5731 = vmatpush1.bf16.msra.mxu1 %v10419_v39  ;;  %v6623_v39 = vld [vmem:[%s13832_s17 + $0x88] sm:$0xff] }
 0xc8c   :  { %5732 = vmatprep.subr.bf16.mxu1 %v10424_v45  ;;  %v6606_v45 = vld [vmem:[%s13832_s17] sm:$0xff] }
 0xc8f   :  { %5733 = vmatpush1.bf16.msra.mxu1 %v10422_v14  ;;  %v13202_v14 = vpack.c.bf16 %v6623_v39, %v6622_v18  ;;  %v10533_v18 = vld [vmem:[%s13831_s16 + $0x300] ss:$8 sps:$4 sm:$0xff]  }
 0xc90   :  { %5734 = vmatprep.subr.bf16.mxu1 %v10427_v5  ;;  %v6607_v5 = vld [vmem:[%s13832_s17 + $0x8] sm:$0xff] }
 0xc91   :  { %9656 = vmatprep.subr.bf16.mxu0 %v13202_v14 }
 0xc93   :  { %5735 = vmatpush1.bf16.msra.mxu1 %v10425_v21  ;;  %v6624_v21 = vld [vmem:[%s13832_s17 + $0x90] sm:$0xff] }
 0xc94   :  { %5736 = vmatprep.subr.bf16.mxu1 %v10430_v49  ;;  %v6625_v49 = vld [vmem:[%s13832_s17 + $0x98] sm:$0xff] }
 0xc97   :  { %5737 = vmatpush1.bf16.msra.mxu1 %v10428_v2  ;;  %v13213_v2 = vpack.c.bf16 %v6607_v5, %v6606_v45  ;;  %v10538_v45 = vld [vmem:[%s13831_s16 + $0x314] ss:$8 sps:$4 sm:$0xff]   ;;  %v10536_v5 = vld [vmem:[%s13831_s16 + $0x310] ss:$8 sps:$4 sm:$0xff]  }
 0xc98   :  { %5738 = vmatprep.subr.bf16.mxu1 %v10433_v60  ;;  %v13215_v60 = vpack.c.bf16 %v6625_v49, %v6624_v21  ;;  %v10544_v21 = vld [vmem:[%s13831_s16 + $0x334] ss:$8 sps:$4 sm:$0xff]   ;;  %v10542_v49 = vld [vmem:[%s13831_s16 + $0x330] ss:$8 sps:$4 sm:$0xff]  }
 0xc99   :  { %9658 = vmatpush3.bf16.msra.mxu0 %v13213_v2 }
 0xc9a   :  { %9660 = vmatprep.subr.bf16.mxu0 %v13215_v60 }
 0xc9b   :  { %5739 = vmatpush1.bf16.msra.mxu1 %v10431_v38  ;;  %v6608_v38 = vld [vmem:[%s13832_s17 + $0x10] sm:$0xff] }
 0xc9c   :  { %5740 = vmatprep.subr.bf16.mxu1 %v10436_v25  ;;  %v6609_v25 = vld [vmem:[%s13832_s17 + $0x18] sm:$0xff] }
 0xc9f   :  { %5741 = vmatpush1.bf16.msra.mxu1 %v10434_v34  ;;  %v6626_v34 = vld [vmem:[%s13832_s17 + $0xa0] sm:$0xff] }
 0xca0   :  { %5911 = vmatprep.subr.bf16.mxu1 %v10439_v4  ;;  %v6627_v4 = vld [vmem:[%s13832_s17 + $0xa8] sm:$0xff] }
 0xd31   :  { %v13071_v28 = vpop.f32.mrb[88].mxu1  ;;  %v13073_v61 = vpop.f32.mrb[68].mxu0 }
 0xd32   :  { %v5402_v17 = vpop.f32.mrb[89].mxu1  ;;  %v13075_v56 = vpop.f32.mrb[69].mxu0  ;;  %v5405_v27 = vpack.c.bf16 %v13071_v28, %v13071_v28  ;;  %v13231_v28 = vpack.c.bf16 %v6609_v25, %v6608_v38  ;;  %v10547_v38 = vld [vmem:[%s13831_s16 + $0x344] ss:$8 sps:$4 sm:$0xff]   ;;  %v10545_v25 = vld [vmem:[%s13831_s16 + $0x340] ss:$8 sps:$4 sm:$0xff]  }
 0xd33   :  { %v5406_v46 = vpack.c.bf16 %v5402_v17, %v5402_v17  ;;  %v6029_v9 = vpack.c.bf16 %v13075_v56, %v13075_v56  ;;  %v10491_v17 = vld [vmem:[%s13831_s16 + $0x220] ss:$8 sps:$4 sm:$0xff]   ;;  %v13237_v56 = vpack.c.bf16 %v6627_v4, %v6626_v34  ;;  %v10550_v34 = vld [vmem:[%s13831_s16 + $0x354] ss:$8 sps:$4 sm:$0xff]   ;;  %v10548_v4 = vld [vmem:[%s13831_s16 + $0x350] ss:$8 sps:$4 sm:$0xff]  }
 0xd34   :  { %9662 = vmatpush3.bf16.msra.mxu0 %v13231_v28 }
 0xd35   :  { %v5510_v1 = vpop.f32.mrb[90].mxu1  ;;  %v13170_v3 = vpop.f32.mrb[70].mxu0  ;;  %9664 = vmatprep.subr.bf16.mxu0 %v13237_v56 }
 0xd36   :  { %v5512_v35 = vpop.f32.mrb[91].mxu1  ;;  %v5515_v42 = vpack.c.bf16 %v5510_v1, %v5510_v1  ;;  %v13175_v50 = vpop.f32.mrb[71].mxu0  ;;  %v6610_v1 = vld [vmem:[%s13832_s17 + $0x20] sm:$0xff] }
 0xd37   :  { %v5516_v31 = vpack.c.bf16 %v5512_v35, %v5512_v35  ;;  %v6611_v35 = vld [vmem:[%s13832_s17 + $0x28] sm:$0xff]  ;;  %v6343_v39 = vpack.c.bf16 %v13175_v50, %v13175_v50 }
 0xd38   :  { %v10539_v50 = vld [vmem:[%s13831_s16 + $0x320] ss:$8 sps:$4 sm:$0xff]  }
 0xd39   :  { %5742 = vmatprep.mubr.bf16.mxu1 %v5516_v31  ;;  %v10496_v31 = vld [vmem:[%s13831_s16 + $0x234] ss:$8 sps:$4 sm:$0xff]  }
 0xd3a   :  { %5743 = vmatmul.mubr.bf16.vlgmr.msra.gmra.mrb[92].mxu1 %v5515_v42  ;;  %v6629_v42 = vld [vmem:[%s13832_s17 + $0xb8] sm:$0xff] }
 0xd3b   :  { %5912 = vmatpush1.bf16.msra.mxu1 %v10437_v37  ;;  %5943 = vmatprep.mubr.bf16.mxu1 %v5406_v46  ;;  %v6628_v37 = vld [vmem:[%s13832_s17 + $0xb0] sm:$0xff] }
 0xd3c   :  { %5913 = vmatprep.subr.bf16.mxu1 %v10442_v30  ;;  %v13255_v30 = vpack.c.bf16 %v6611_v35, %v6610_v1  ;;  %v10494_v46 = vld [vmem:[%s13831_s16 + $0x230] ss:$8 sps:$4 sm:$0xff]   ;;  %v10551_v1 = vld [vmem:[%s13831_s16 + $0x360] ss:$8 sps:$4 sm:$0xff]   ;;  %v10556_v35 = vld [vmem:[%s13831_s16 + $0x374] ss:$8 sps:$4 sm:$0xff]  }
 0xd3e   :  { %9666 = vmatpush3.bf16.msra.mxu0 %v13255_v30 }
 0xd3f   :  { %5914 = vmatpush1.bf16.msra.mxu1 %v10440_v12  ;;  %v13261_v12 = vpack.c.bf16 %v6629_v42, %v6628_v37  ;;  %v10559_v37 = vld [vmem:[%s13831_s16 + $0x384] ss:$8 sps:$4 sm:$0xff]   ;;  %v10557_v42 = vld [vmem:[%s13831_s16 + $0x380] ss:$8 sps:$4 sm:$0xff]  }
 0xd40   :  { %5915 = vmatprep.subr.bf16.mxu1 %v10445_v32  ;;  %v6612_v32 = vld [vmem:[%s13832_s17 + $0x30] sm:$0xff] }
 0xd41   :  { %9668 = vmatprep.subr.bf16.mxu0 %v13261_v12 }
 0xd43   :  { %5916 = vmatpush1.bf16.msra.mxu1 %v10443_v23  ;;  %v6613_v23 = vld [vmem:[%s13832_s17 + $0x38] sm:$0xff] }
 0xd44   :  { %5917 = vmatprep.subr.bf16.mxu1 %v10448_v33  ;;  %v10499_v33 = vld [vmem:[%s13831_s16 + $0x244] ss:$8 sps:$4 sm:$0xff]  }
 0xd47   :  { %5918 = vmatpush1.bf16.msra.mxu1 %v10446_v7  ;;  %v6630_v7 = vld [vmem:[%s13832_s17 + $0xc0] sm:$0xff] }
 0xd48   :  { %5919 = vmatprep.subr.bf16.mxu1 %v10451_v15  ;;  %v6631_v15 = vld [vmem:[%s13832_s17 + $0xc8] sm:$0xff] }
 0xd4b   :  { %5920 = vmatpush1.bf16.msra.mxu1 %v10449_v44  ;;  %v13279_v44 = vpack.c.bf16 %v6613_v23, %v6612_v32  ;;  %v10560_v32 = vld [vmem:[%s13831_s16 + $0x390] ss:$8 sps:$4 sm:$0xff]   ;;  %v10565_v23 = vld [vmem:[%s13831_s16 + $0x3a4] ss:$8 sps:$4 sm:$0xff]  }
 0xd4c   :  { %5921 = vmatprep.subr.bf16.mxu1 %v10454_v6  ;;  %v10497_v6 = vld [vmem:[%s13831_s16 + $0x240] ss:$8 sps:$4 sm:$0xff]  }
 0xd4d   :  { %9670 = vmatpush3.bf16.msra.mxu0 %v13279_v44 }
 0xd4f   :  { %5922 = vmatpush1.bf16.msra.mxu1 %v10452_v11  ;;  %v13285_v11 = vpack.c.bf16 %v6631_v15, %v6630_v7  ;;  %v10568_v7 = vld [vmem:[%s13831_s16 + $0x3b4] ss:$8 sps:$4 sm:$0xff]   ;;  %v10566_v15 = vld [vmem:[%s13831_s16 + $0x3b0] ss:$8 sps:$4 sm:$0xff]  }
 0xd50   :  { %5923 = vmatprep.subr.bf16.mxu1 %v10457_v54  ;;  %v6614_v54 = vld [vmem:[%s13832_s17 + $0x40] sm:$0xff] }
 0xd51   :  { %9672 = vmatprep.subr.bf16.mxu0 %v13285_v11 }
 0xd53   :  { %5924 = vmatpush1.bf16.msra.mxu1 %v10455_v22  ;;  %v6615_v22 = vld [vmem:[%s13832_s17 + $0x48] sm:$0xff] }
 0xd54   :  { %5925 = vmatprep.subr.bf16.mxu1 %v10460_v13  ;;  %v10502_v13 = vld [vmem:[%s13831_s16 + $0x254] ss:$8 sps:$4 sm:$0xff]  }
 0xd57   :  { %5926 = vmatpush1.bf16.msra.mxu1 %v10458_v48  ;;  %v13297_v48 = vpack.c.bf16 %v6615_v22, %v6614_v54  ;;  %v10569_v54 = vld [vmem:[%s13831_s16 + $0x3c0] ss:$8 sps:$4 sm:$0xff]   ;;  %v10574_v22 = vld [vmem:[%s13831_s16 + $0x3d4] ss:$8 sps:$4 sm:$0xff]  }
 0xd58   :  { %5927 = vmatprep.subr.bf16.mxu1 %v10463_v41  ;;  %v10500_v41 = vld [vmem:[%s13831_s16 + $0x250] ss:$8 sps:$4 sm:$0xff]  }
 0xd59   :  { %9674 = vmatpush3.bf16.msra.mxu0 %v13297_v48 }
 0xd5b   :  { %5928 = vmatpush1.bf16.msra.mxu1 %v10461_v57  ;;  %v10505_v57 = vld [vmem:[%s13831_s16 + $0x264] ss:$8 sps:$4 sm:$0xff]  }
 0xd5c   :  { %5929 = vmatprep.subr.bf16.mxu1 %v10466_v63  ;;  %v10503_v63 = vld [vmem:[%s13831_s16 + $0x260] ss:$8 sps:$4 sm:$0xff]  }
 0xd5f   :  { %5930 = vmatpush1.bf16.msra.mxu1 %v10464_v53  ;;  %v10508_v53 = vld [vmem:[%s13831_s16 + $0x274] ss:$8 sps:$4 sm:$0xff]  }
 0xd60   :  { %5931 = vmatprep.subr.bf16.mxu1 %v10469_v47  ;;  %v10506_v47 = vld [vmem:[%s13831_s16 + $0x270] ss:$8 sps:$4 sm:$0xff]  }
 0xd63   :  { %5932 = vmatpush1.bf16.msra.mxu1 %v10467_v19  ;;  %v10511_v19 = vld [vmem:[%s13831_s16 + $0x284] ss:$8 sps:$4 sm:$0xff]  }
 0xd64   :  { %5933 = vmatprep.subr.bf16.mxu1 %v10472_v26  ;;  %v10509_v26 = vld [vmem:[%s13831_s16 + $0x280] ss:$8 sps:$4 sm:$0xff]  }
 0xd67   :  { %5934 = vmatpush1.bf16.msra.mxu1 %v10470_v36  ;;  %v10514_v36 = vld [vmem:[%s13831_s16 + $0x294] ss:$8 sps:$4 sm:$0xff]  }
 0xd68   :  { %5935 = vmatprep.subr.bf16.mxu1 %v10475_v16  ;;  %v10512_v16 = vld [vmem:[%s13831_s16 + $0x290] ss:$8 sps:$4 sm:$0xff]  }
 0xd6b   :  { %5936 = vmatpush1.bf16.msra.mxu1 %v10473_v51  ;;  %v10517_v51 = vld [vmem:[%s13831_s16 + $0x2a4] ss:$8 sps:$4 sm:$0xff]  }
 0xd6c   :  { %5937 = vmatprep.subr.bf16.mxu1 %v10478_v24  ;;  %v10515_v24 = vld [vmem:[%s13831_s16 + $0x2a0] ss:$8 sps:$4 sm:$0xff]  }
 0xd6f   :  { %5938 = vmatpush1.bf16.msra.mxu1 %v10476_v52  ;;  %v10520_v52 = vld [vmem:[%s13831_s16 + $0x2b4] ss:$8 sps:$4 sm:$0xff]  }
 0xd70   :  { %5939 = vmatprep.subr.bf16.mxu1 %v10481_v10  ;;  %v10518_v10 = vld [vmem:[%s13831_s16 + $0x2b0] ss:$8 sps:$4 sm:$0xff]  }
 0xd73   :  { %5940 = vmatpush1.bf16.msra.mxu1 %v10479_v29  ;;  %v10523_v29 = vld [vmem:[%s13831_s16 + $0x2c4] ss:$8 sps:$4 sm:$0xff]  }
 0xd74   :  { %5941 = vmatprep.subr.bf16.mxu1 %v10484_v43  ;;  %v10521_v43 = vld [vmem:[%s13831_s16 + $0x2c0] ss:$8 sps:$4 sm:$0xff]  }
 0xd77   :  { %5942 = vmatpush1.bf16.msra.mxu1 %v10482_v62  ;;  %v10526_v62 = vld [vmem:[%s13831_s16 + $0x2d4] ss:$8 sps:$4 sm:$0xff]  }
 0xd78   :  { %6223 = vmatprep.subr.bf16.mxu1 %v10487_v40  ;;  %v10524_v40 = vld [vmem:[%s13831_s16 + $0x2d0] ss:$8 sps:$4 sm:$0xff]  }
 0xd7a   :  { %5944 = vmatmul.mubr.bf16.vlgmr.msra.gmra.mrb[92].mxu1 %v5405_v27  ;;  %v10532_v27 = vld [vmem:[%s13831_s16 + $0x2f4] ss:$8 sps:$4 sm:$0xff]  }
 0xd7b   :  { %6224 = vmatpush1.bf16.msra.mxu1 %v10485_v59  ;;  %6255 = vmatprep.mubr.bf16.mxu1 %v6029_v9  ;;  %v10529_v59 = vld [vmem:[%s13831_s16 + $0x2e4] ss:$8 sps:$4 sm:$0xff]   ;;  %v10527_v9 = vld [vmem:[%s13831_s16 + $0x2e0] ss:$8 sps:$4 sm:$0xff]  }
 0xd7c   :  { %6225 = vmatprep.subr.bf16.mxu1 %v10490_v8  ;;  %v10530_v8 = vld [vmem:[%s13831_s16 + $0x2f0] ss:$8 sps:$4 sm:$0xff]  }
 0xd7f   :  { %6226 = vmatpush1.bf16.msra.mxu1 %v10488_v20  ;;  %v10535_v20 = vld [vmem:[%s13831_s16 + $0x304] ss:$8 sps:$4 sm:$0xff]  }
 0xd80   :  { %6227 = vmatprep.subr.bf16.mxu1 %v10493_v58  ;;  %v6028_v58 = vpack.c.bf16 %v13073_v61, %v13073_v61  ;;  %v10541_v61 = vld [vmem:[%s13831_s16 + $0x324] ss:$8 sps:$4 sm:$0xff]  }
 0xd83   :  { %6228 = vmatpush1.bf16.msra.mxu1 %v10491_v17  ;;  %v10553_v17 = vld [vmem:[%s13831_s16 + $0x364] ss:$8 sps:$4 sm:$0xff]  }
 0xd84   :  { %6229 = vmatprep.subr.bf16.mxu1 %v10496_v31  ;;  %v10554_v31 = vld [vmem:[%s13831_s16 + $0x370] ss:$8 sps:$4 sm:$0xff]  }
 0xd87   :  { %6230 = vmatpush1.bf16.msra.mxu1 %v10494_v46  ;;  %v10562_v46 = vld [vmem:[%s13831_s16 + $0x394] ss:$8 sps:$4 sm:$0xff]  }
 0xd88   :  { %6231 = vmatprep.subr.bf16.mxu1 %v10499_v33  ;;  %v10563_v33 = vld [vmem:[%s13831_s16 + $0x3a0] ss:$8 sps:$4 sm:$0xff]  }
 0xd8b   :  { %6232 = vmatpush1.bf16.msra.mxu1 %v10497_v6  ;;  %v10571_v6 = vld [vmem:[%s13831_s16 + $0x3c4] ss:$8 sps:$4 sm:$0xff]  }
 0xd8c   :  { %6233 = vmatprep.subr.bf16.mxu1 %v10502_v13  ;;  %v10572_v13 = vld [vmem:[%s13831_s16 + $0x3d0] ss:$8 sps:$4 sm:$0xff]  }
 0xd8f   :  { %6234 = vmatpush1.bf16.msra.mxu1 %v10500_v41  ;;  %v10577_v41 = vld [vmem:[%s13831_s16 + $0x3e4] ss:$8 sps:$4 sm:$0xff]  }
 0xd90   :  { %6235 = vmatprep.subr.bf16.mxu1 %v10505_v57  ;;  %v10575_v57 = vld [vmem:[%s13831_s16 + $0x3e0] ss:$8 sps:$4 sm:$0xff]  }
 0xd93   :  { %6236 = vmatpush1.bf16.msra.mxu1 %v10503_v63  ;;  %v10580_v63 = vld [vmem:[%s13831_s16 + $0x3f4] ss:$8 sps:$4 sm:$0xff]  }
 0xd94   :  { %6237 = vmatprep.subr.bf16.mxu1 %v10508_v53  ;;  %v10578_v53 = vld [vmem:[%s13831_s16 + $0x3f0] ss:$8 sps:$4 sm:$0xff]  }
 0xd97   :  { %6238 = vmatpush1.bf16.msra.mxu1 %v10506_v47  ;;  %v6342_v47 = vpack.c.bf16 %v13170_v3, %v13170_v3  ;;  %v6617_v3 = vld [vmem:[%s13832_s17 + $0x58] sm:$0xff] }
 0xd98   :  { %6239 = vmatprep.subr.bf16.mxu1 %v10511_v19  ;;  %v6632_v19 = vld [vmem:[%s13832_s17 + $0xd0] sm:$0xff] }
 0xd9b   :  { %6240 = vmatpush1.bf16.msra.mxu1 %v10509_v26  ;;  %v6633_v26 = vld [vmem:[%s13832_s17 + $0xd8] sm:$0xff] }
 0xd9c   :  { %6241 = vmatprep.subr.bf16.mxu1 %v10514_v36  ;;  %v9675_v36 = vpack.c.bf16 %v6633_v26, %v6632_v19  ;;  %v6798_v19 = vld [vmem:[%s13833_s18 + $0x40] sm:$0xff] }
 0xd9e   :  { %9676 = vmatprep.subr.bf16.mxu0 %v9675_v36 }
 0xd9f   :  { %6242 = vmatpush1.bf16.msra.mxu1 %v10512_v16  ;;  %v6616_v16 = vld [vmem:[%s13832_s17 + $0x50] sm:$0xff] }
 0xda0   :  { %6243 = vmatprep.subr.bf16.mxu1 %v10517_v51  ;;  %v9677_v51 = vpack.c.bf16 %v6617_v3, %v6616_v16  ;;  %v6803_v16 = vld [vmem:[%s13833_s18 + $0x68] sm:$0xff]  ;;  %v6805_v3 = vld [vmem:[%s13833_s18 + $0x78] sm:$0xff] }
 0xda2   :  { %9678 = vmatpush3.bf16.msra.mxu0 %v9677_v51 }
 0xda3   :  { %6244 = vmatpush1.bf16.msra.mxu1 %v10515_v24  ;;  %v6634_v24 = vld [vmem:[%s13832_s17 + $0xe0] sm:$0xff] }
 0xda4   :  { %6245 = vmatprep.subr.bf16.mxu1 %v10520_v52  ;;  %v6635_v52 = vld [vmem:[%s13832_s17 + $0xe8] sm:$0xff] }
 0xda7   :  { %6246 = vmatpush1.bf16.msra.mxu1 %v10518_v10  ;;  %v9679_v10 = vpack.c.bf16 %v6635_v52, %v6634_v24  ;;  %v9731_v24 = vpack.c.bf16 %v6805_v3, %v6803_v16  ;;  %v6802_v52 = vld [vmem:[%s13833_s18 + $0x60] sm:$0xff]  ;;  %v10604_v16 = vld [vmem:[%s13871_s26 + $0x108] sm:$0xff]   ;;  %v10607_v3 = vld [vmem:[%s13871_s26 + $0x150] sm:$0xff]  }
 0xda8   :  { %6247 = vmatprep.subr.bf16.mxu1 %v10523_v29  ;;  %v6618_v29 = vld [vmem:[%s13832_s17 + $0x60] sm:$0xff] }
 0xda9   :  { %9680 = vmatprep.subr.bf16.mxu0 %v9679_v10 }
 0xdab   :  { %6248 = vmatpush1.bf16.msra.mxu1 %v10521_v43  ;;  %v6619_v43 = vld [vmem:[%s13832_s17 + $0x68] sm:$0xff] }
 0xdac   :  { %6249 = vmatprep.subr.bf16.mxu1 %v10526_v62  ;;  %v9681_v62 = vpack.c.bf16 %v6619_v43, %v6618_v29 }
 0xdae   :  { %9682 = vmatpush3.bf16.msra.mxu0 %v9681_v62 }
 0xdaf   :  { %6250 = vmatpush1.bf16.msra.mxu1 %v10524_v40  ;;  %v6636_v40 = vld [vmem:[%s13832_s17 + $0xf0] sm:$0xff] }
 0xdb0   :  { %6251 = vmatprep.subr.bf16.mxu1 %v10529_v59  ;;  %v6637_v59 = vld [vmem:[%s13832_s17 + $0xf8] sm:$0xff] }
 0xdb3   :  { %6252 = vmatpush1.bf16.msra.mxu1 %v10527_v9  ;;  %v6620_v9 = vld [vmem:[%s13832_s17 + $0x70] sm:$0xff] }
 0xdb4   :  { %6253 = vmatprep.subr.bf16.mxu1 %v10532_v27  ;;  %v9683_v27 = vpack.c.bf16 %v6637_v59, %v6636_v40 }
 0xdb6   :  { %9684 = vmatprep.subr.bf16.mxu0 %v9683_v27 }
 0xdb7   :  { %6254 = vmatpush1.bf16.msra.mxu1 %v10530_v8  ;;  %v6621_v8 = vld [vmem:[%s13832_s17 + $0x78] sm:$0xff]  ;;  %s13872_s17 = sld [smem:[#allocation30_spill]] }
 0xdb8   :  { %6537 = vmatprep.subr.bf16.mxu1 %v10535_v20  ;;  %v9685_v20 = vpack.c.bf16 %v6621_v8, %v6620_v9 }
 0xdba   :  { %6256 = vmatmul.mubr.bf16.vlgmr.msra.gmra.mrb[92].mxu1 %v6028_v58  ;;  %9686 = vmatpush3.bf16.msra.mxu0 %v9685_v20 }
 0xdbb   :  { %6538 = vmatpush1.bf16.msra.mxu1 %v10533_v18  ;;  %6569 = vmatprep.mubr.bf16.mxu1 %v6343_v39 }
 0xdbc   :  { %6539 = vmatprep.subr.bf16.mxu1 %v10538_v45  ;;  %9688 = vmatprep.subr.bf16.mxu0 %v13202_v14 }
 0xdbf   :  { %6540 = vmatpush1.bf16.msra.mxu1 %v10536_v5 }
 0xdc0   :  { %6541 = vmatprep.subr.bf16.mxu1 %v10541_v61 }
 0xdc3   :  { %6542 = vmatpush1.bf16.msra.mxu1 %v10539_v50 }
 0xdc4   :  { %6543 = vmatprep.subr.bf16.mxu1 %v10544_v21 }
 0xdc7   :  { %6544 = vmatpush1.bf16.msra.mxu1 %v10542_v49 }
 0xdc8   :  { %6545 = vmatprep.subr.bf16.mxu1 %v10547_v38 }
 0xdcb   :  { %6546 = vmatpush1.bf16.msra.mxu1 %v10545_v25 }
 0xdcc   :  { %6547 = vmatprep.subr.bf16.mxu1 %v10550_v34 }
 0xdcf   :  { %6548 = vmatpush1.bf16.msra.mxu1 %v10548_v4 }
 0xdd0   :  { %6549 = vmatprep.subr.bf16.mxu1 %v10553_v17 }
 0xdd3   :  { %6550 = vmatpush1.bf16.msra.mxu1 %v10551_v1 }
 0xdd4   :  { %6551 = vmatprep.subr.bf16.mxu1 %v10556_v35 }
 0xdd7   :  { %6552 = vmatpush1.bf16.msra.mxu1 %v10554_v31 }
 0xdd8   :  { %6553 = vmatprep.subr.bf16.mxu1 %v10559_v37 }
 0xddb   :  { %6554 = vmatpush1.bf16.msra.mxu1 %v10557_v42 }
 0xddc   :  { %6555 = vmatprep.subr.bf16.mxu1 %v10562_v46 }
 0xddf   :  { %6556 = vmatpush1.bf16.msra.mxu1 %v10560_v32 }
 0xde0   :  { %6557 = vmatprep.subr.bf16.mxu1 %v10565_v23 }
 0xde3   :  { %6558 = vmatpush1.bf16.msra.mxu1 %v10563_v33 }
 0xde4   :  { %6559 = vmatprep.subr.bf16.mxu1 %v10568_v7 }
 0xde7   :  { %6560 = vmatpush1.bf16.msra.mxu1 %v10566_v15 }
 0xde8   :  { %6561 = vmatprep.subr.bf16.mxu1 %v10571_v6 }
 0xdeb   :  { %6562 = vmatpush1.bf16.msra.mxu1 %v10569_v54  ;;  %v6795_v54 = vld [vmem:[%s13833_s18 + $0x28] sm:$0xff] }
 0xdec   :  { %6563 = vmatprep.subr.bf16.mxu1 %v10574_v22  ;;  %v6797_v22 = vld [vmem:[%s13833_s18 + $0x38] sm:$0xff] }
 0xdef   :  { %6564 = vmatpush1.bf16.msra.mxu1 %v10572_v13  ;;  %v9723_v13 = vpack.c.bf16 %v6797_v22, %v6795_v54  ;;  %v10590_v54 = vld [vmem:[%s13871_s26 + $0xa0] sm:$0xff]   ;;  %v10591_v22 = vld [vmem:[%s13871_s26 + $0xe8] sm:$0xff]  }
 0xdf0   :  { %6565 = vmatprep.subr.bf16.mxu1 %v10577_v41  ;;  %v6794_v41 = vld [vmem:[%s13833_s18 + $0x20] sm:$0xff] }
 0xdf3   :  { %6566 = vmatpush1.bf16.msra.mxu1 %v10575_v57  ;;  %v6796_v57 = vld [vmem:[%s13833_s18 + $0x30] sm:$0xff] }
 0xdf4   :  { %6567 = vmatprep.subr.bf16.mxu1 %v10580_v63  ;;  %v9725_v63 = vpack.c.bf16 %v6796_v57, %v6794_v41  ;;  %v10593_v41 = vld [vmem:[%s13871_s26 + $0xf0] sm:$0xff]  }
 0xdf5   :  { %v10594_v57 = vld [vmem:[%s13871_s26 + $0xb0] sm:$0xff]  }
 0xdf7   :  { %6568 = vmatpush1.bf16.msra.mxu1 %v10578_v53  ;;  %v6799_v53 = vld [vmem:[%s13833_s18 + $0x48] sm:$0xff] }
 0xdfa   :  { %6570 = vmatmul.mubr.bf16.vlgmr.msra.gmra.mrb[92].mxu1 %v6342_v47  ;;  %v6801_v47 = vld [vmem:[%s13833_s18 + $0x58] sm:$0xff] }
 0xdfb   :  { %6873 = vmatprep.mubr.f32.mxu1 %v10872_v0  ;;  %v9727_v26 = vpack.c.bf16 %v6801_v47, %v6799_v53  ;;  %v10596_v53 = vld [vmem:[%s13871_s26 + $0xb8] sm:$0xff]   ;;  %v10597_v47 = vld [vmem:[%s13871_s26 + $0x40] sm:$0xff]  }
 0xecd   :  { %v13504_v58 = vpop.f32.mrb[92].mxu1 }
 0xece   :  { %v6580_v18 = vrot.slane %v13504_v58, 4  ;;  %v13507_v39 = vpop.f32.mrb[93].mxu1  ;;  %v6592_v33 = vmul.f32 %v13504_v58, %v13504_v58 }
 0xecf   :  { %v6586_v45 = vrot.slane %v13507_v39, 4  ;;  %v6593_v5 = vmul.f32 %v13507_v39, %v13507_v39  ;;  %v6575_v61 = vpop.f32.mrb[94].mxu1 }
 0xed0   :  { %v6581_v50 = vadd.f32 %v6580_v18, %v13504_v58  ;;  %v6576_v21 = vpop.f32.mrb[95].mxu1  ;;  %v6594_v7 = vrot.slane %v6592_v33, 4  ;;  %v6783_v61 = vld [vmem:[%s13834_s19] sm:$0x1] }
 0xed1   :  { %v6587_v49 = vadd.f32 %v6586_v45, %v13507_v39  ;;  %v6600_v38 = vrot.slane %v6593_v5, 4 }
 0xed2   :  { %v6582_v25 = vrot.slane %v6581_v50, 2  ;;  %v6595_v15 = vadd.f32 %v6594_v7, %v6592_v33 }
 0xed3   :  { %v6588_v14 = vrot.slane %v6587_v49, 2  ;;  %v6601_v34 = vadd.f32 %v6600_v38, %v6593_v5 }
 0xed4   :  { %v6583_v4 = vadd.f32 %v6582_v25, %v6581_v50 }
 0xed5   :  { %v6589_v17 = vadd.f32 %v6588_v14, %v6587_v49  ;;  %v6602_v1 = vrot.slane %v6601_v34, 2  ;;  %v6787_v49 = vld [vmem:[%s13835_s20] sm:$0x1] }
 0xed6   :  { %v6584_v35 = vrot.slane %v6583_v4, 1 }
 0xed7   :  { %v6590_v31 = vrot.slane %v6589_v17, 1  ;;  %v6603_v37 = vadd.f32 %v6602_v1, %v6601_v34 }
 0xed8   :  { %v6585_v32 = vadd.f32 %v6584_v35, %v6583_v4 }
 0xed9   :  { %v6591_v42 = vadd.f32 %v6590_v31, %v6589_v17  ;;  %v6604_v46 = vrot.slane %v6603_v37, 1 }
 0xedb   :  { %6702 = vmatprep.mubr.f32.mxu0 %v6591_v42  ;;  %v6605_v23 = vadd.f32 %v6604_v46, %v6603_v37 }
 0xedc   :  { %6703 = vmatmul.mubr.f32.vlgmr.msra.gmra.mrb[72].mxu0 %v6585_v32 }
 0xedd   :  { %9690 = vmatpush3.bf16.msra.mxu0 %v13213_v2  ;;  %6774 = vmatprep.mubr.f32.mxu0 %v6605_v23  ;;  %v6596_v2 = vrot.slane %v6595_v15, 2 }
 0xede   :  { %9692 = vmatprep.subr.bf16.mxu0 %v13215_v60 }
 0xedf   :  { %v6597_v60 = vadd.f32 %v6596_v2, %v6595_v15  ;;  %v8865_v2 = vld [vmem:[%s13836_s21 + $0x4] sm:$0x3] }
 0xee1   :  { %9694 = vmatpush3.bf16.msra.mxu0 %v13231_v28  ;;  %v6598_v28 = vrot.slane %v6597_v60, 1 }
 0xee2   :  { %9696 = vmatprep.subr.bf16.mxu0 %v13237_v56 }
 0xee3   :  { %v6599_v56 = vadd.f32 %v6598_v28, %v6597_v60  ;;  %v8799_v60 = vld [vmem:[%s13836_s21 + $0x2] sm:$0x3] }
 0xee4   :  { %v10582_v28 = vld [vmem:[%s13871_s26 + $0x80] sm:$0xff]  }
 0xee5   :  { %9698 = vmatpush3.bf16.msra.mxu0 %v13255_v30  ;;  %v6791_v30 = vld [vmem:[%s13833_s18 + $0x8] sm:$0xff] }
 0xee6   :  { %9700 = vmatprep.subr.bf16.mxu0 %v13261_v12  ;;  %v6793_v12 = vld [vmem:[%s13833_s18 + $0x18] sm:$0xff] }
 0xee9   :  { %9702 = vmatpush3.bf16.msra.mxu0 %v13279_v44  ;;  %v9719_v44 = vpack.c.bf16 %v6793_v12, %v6791_v30  ;;  %v10584_v30 = vld [vmem:[%s13871_s26 + $0x88] sm:$0xff]   ;;  %v10585_v12 = vld [vmem:[%s13871_s26 + $0xd0] sm:$0xff]  }
 0xeea   :  { %9704 = vmatprep.subr.bf16.mxu0 %v13285_v11  ;;  %v6790_v11 = vld [vmem:[%s13833_s18] sm:$0xff] }
 0xeeb   :  { %9720 = vmatprep.subr.bf16.mxu1 %v9719_v44 }
 0xeed   :  { %9706 = vmatpush3.bf16.msra.mxu0 %v13297_v48  ;;  %v6792_v48 = vld [vmem:[%s13833_s18 + $0x10] sm:$0xff] }
 0xeee   :  { %9708 = vmatprep.subr.bf16.mxu0 %v9675_v36  ;;  %v9721_v6 = vpack.c.bf16 %v6792_v48, %v6790_v11  ;;  %v6800_v36 = vld [vmem:[%s13833_s18 + $0x50] sm:$0xff]  ;;  %v10587_v11 = vld [vmem:[%s13871_s26 + $0xd8] sm:$0xff]  }
 0xeef   :  { %v10588_v48 = vld [vmem:[%s13871_s26 + $0x98] sm:$0xff]  }
 0xef0   :  { %9722 = vmatpush1.bf16.msra.mxu1 %v9721_v6 }
 0xef1   :  { %9710 = vmatpush3.bf16.msra.mxu0 %v9677_v51  ;;  %9724 = vmatprep.subr.bf16.mxu1 %v9723_v13  ;;  %v9729_v51 = vpack.c.bf16 %v6800_v36, %v6798_v19  ;;  %v10599_v19 = vld [vmem:[%s13871_s26 + $0x140] sm:$0xff]   ;;  %v10603_v36 = vld [vmem:[%s13871_s26 + $0x148] sm:$0xff]  }
 0xef2   :  { %9712 = vmatprep.subr.bf16.mxu0 %v9679_v10  ;;  %v6804_v10 = vld [vmem:[%s13833_s18 + $0x70] sm:$0xff] }
 0xef3   :  { %v9733_v29 = vpack.c.bf16 %v6804_v10, %v6802_v52  ;;  %v10612_v52 = vld [vmem:[%s13871_s26 + $0x118] sm:$0xff]   ;;  %v10615_v10 = vld [vmem:[%s13871_s26 + $0x160] sm:$0xff]  }
 0xef4   :  { %9726 = vmatpush1.bf16.msra.mxu1 %v9725_v63 }
 0xef5   :  { %9714 = vmatpush3.bf16.msra.mxu0 %v9681_v62  ;;  %9728 = vmatprep.subr.bf16.mxu1 %v9727_v26 }
 0xef6   :  { %9716 = vmatprep.subr.bf16.mxu0 %v9683_v27 }
 0xef8   :  { %9730 = vmatpush1.bf16.msra.mxu1 %v9729_v51 }
 0xef9   :  { %9718 = vmatpush3.bf16.msra.mxu0 %v9685_v20  ;;  %9732 = vmatprep.subr.bf16.mxu1 %v9731_v24 }
 0xefa   :  { %9736 = vmatprep.subr.bf16.mxu0 %v9719_v44  ;;  %v10586_v44 = vld [vmem:[%s13871_s26 + $0x90] sm:$0xff]  }
 0xefc   :  { %6775 = vmatmul.mubr.f32.vlgmr.msra.gmra.mrb[74].mxu0 %v6599_v56  ;;  %9734 = vmatpush1.bf16.msra.mxu1 %v9733_v29  ;;  %v10583_v56 = vld [vmem:[%s13871_s26 + $0xc8] sm:$0xff]  }
 0xefd   :  { %6947 = vmatprep.mubr.f32.mxu0 %v10872_v0  ;;  %9738 = vmatpush1.bf16.msra.mxu0 %v9721_v6  ;;  %v10589_v6 = vld [vmem:[%s13871_s26 + $0xe0] sm:$0xff]  }
 0xefe   :  { %9740 = vmatprep.subr.bf16.mxu0 %v9723_v13  ;;  %v10592_v13 = vld [vmem:[%s13871_s26 + $0xa8] sm:$0xff]  }
 0xf01   :  { %9742 = vmatpush1.bf16.msra.mxu0 %v9725_v63  ;;  %v10595_v63 = vld [vmem:[%s13871_s26 + $0xf8] sm:$0xff]  }
 0xf02   :  { %9744 = vmatprep.subr.bf16.mxu0 %v9727_v26  ;;  %v10600_v26 = vld [vmem:[%s13871_s26 + $0x100] sm:$0xff]  }
 0xf05   :  { %9746 = vmatpush1.bf16.msra.mxu0 %v9729_v51  ;;  %v10608_v51 = vld [vmem:[%s13871_s26 + $0x110] sm:$0xff]  }
 0xf06   :  { %9748 = vmatprep.subr.bf16.mxu0 %v9731_v24  ;;  %v10611_v24 = vld [vmem:[%s13871_s26 + $0x158] sm:$0xff]  }
 0xf09   :  { %9750 = vmatpush1.bf16.msra.mxu0 %v9733_v29  ;;  %v10616_v29 = vld [vmem:[%s13871_s26 + $0x120] sm:$0xff]  }
 0xfaf   :  { %v9137_v43 = vpop.f32.mrb[72].mxu0 }
 0xfb0   :  { %v9138_v62 = vpop.f32.mrb[73].mxu0 }
 0xfb1   :  { %v9139_v40 = vadd.f32 %v9138_v62, %v9137_v43  ;;  %v10619_v43 = vld [vmem:[%s13871_s26 + $0x168] sm:$0xff]  }
 0xfb2   :  { %v10620_v62 = vld [vmem:[%s13871_s26 + $0x128] sm:$0xff]  }
 0xfb3   :  { %v6709_v59 = vmul.f32 0.03125, %v9139_v40  ;;  %v10623_v40 = vld [vmem:[%s13871_s26 + $0x170] sm:$0xff]  }
 0xfb5   :  { %v6781_v20 = vmul.f32 %v6709_v59, %v6709_v59 }
 0xfcf   :  { %v9172_v9 = vpop.f32.mrb[74].mxu0 }
 0xfd0   :  { %v9173_v27 = vpop.f32.mrb[75].mxu0 }
 0xfd1   :  { %v9174_v8 = vadd.f32 %v9173_v27, %v9172_v9  ;;  %v10627_v9 = vld [vmem:[%s13871_s26 + $0x178] sm:$0xff]  }
 0xfd2   :  { %v10628_v27 = vld [vmem:[%s13871_s26 + $0x138] sm:$0xff]  }
 0xfd3   :  { %v6780_v18 = vmul.f32 0.03125, %v9174_v8 }
 0xfd5   :  { %v6782_v45 = vsub.f32 %v6780_v18, %v6781_v20 }
 0xfd7   :  { %v6784_v5 = vadd.f32 1e-05, %v6782_v45 }
 0xfd9   :  { %10649 = vrsqrt.f32 %v6784_v5 }
 0xfe3   :  { %v10650_v50 = vpop.eup %10649 }
 0xfe4   :  { %v6786_v21 = vmul.f32 %v10650_v50, %v6783_v61 }
 0xfe6   :  { %8796 = vmatmul.mubr.msk.f32.vlgmr.msra.gmra.mrb[96].mxu1 %vm653_vm0, %v6786_v21  ;;  %v6788_v38 = vmul.f32 %v6786_v21, %v6709_v59  ;;  %v10624_v59 = vld [vmem:[%s13871_s26 + $0x130] sm:$0xff]  }
 0xfe7   :  { %7542 = vmatprep.mubr.f32.mxu1 %v10872_v0 }
 0xfe8   :  { %v6789_v25 = vsub.f32 %v6787_v49, %v6788_v38  ;;  %v10598_v38 = vld [vmem:[%s13871_s26] sm:$0xff]  }
 0xfea   :  { %8797 = vmatmul.mubr.msk.f32.vlgmr.msra.gmra.mrb[76].mxu0 %vm653_vm0, %v6789_v25 }
 0xfeb   :  { %7049 = vmatprep.mubr.f32.mxu0 %v10872_v0 }
0x10b9   :  { %v6875_v14 = vpop.f32.mrb[96].mxu1 }
0x10ba   :  { %v6957_v34 = vrot.slane %v6875_v14, %v12331_v55  ;;  %v6877_v4 = vpop.f32.mrb[97].mxu1  ;;  %v10601_v14 = vld [vmem:[%s13871_s26 + $0x48] sm:$0xff]  }
0x10bb   :  { %v6961_v17 = vrot.slane %v6877_v4, %v12331_v55  ;;  %v10602_v4 = vld [vmem:[%s13871_s26 + $0x8] sm:$0xff]  }
0x10bc   :  { %v6962_v1 = vmul.f32 %v6957_v34, %v13504_v58  ;;  %v6980_v58 = vld [vmem:[%s13836_s21] sm:$0x3] }
0x10bd   :  { %v6963_v35 = vmul.f32 %v6961_v17, %v13507_v39  ;;  %v6949_v31 = vpop.f32.mrb[76].mxu0  ;;  %v10605_v17 = vld [vmem:[%s13871_s26 + $0x50] sm:$0xff]  }
0x10be   :  { %v6967_v37 = vrot.slane %v6949_v31, %v12331_v55  ;;  %v6951_v42 = vpop.f32.mrb[77].mxu0  ;;  %v10610_v31 = vld [vmem:[%s13871_s26 + $0x18] sm:$0xff]  }
0x10bf   :  { %v6971_v46 = vrot.slane %v6951_v42, %v12331_v55  ;;  %v10581_v55 = vld [vmem:[%s13871_s26 + $0xc0] sm:$0xff]  }
0x10c0   :  { %v6972_v32 = vadd.f32 %v6967_v37, %v6962_v1  ;;  %v10606_v1 = vld [vmem:[%s13871_s26 + $0x10] sm:$0xff]   ;;  %v10613_v37 = vld [vmem:[%s13871_s26 + $0x60] sm:$0xff]  }
0x10c1   :  { %v6973_v23 = vadd.f32 %v6971_v46, %v6963_v35  ;;  %v10609_v35 = vld [vmem:[%s13871_s26 + $0x58] sm:$0xff]   ;;  %v10614_v42 = vld [vmem:[%s13871_s26 + $0x20] sm:$0xff]   ;;  %v10617_v46 = vld [vmem:[%s13871_s26 + $0x68] sm:$0xff]  }
0x10c2   :  { %v6976_v33 = vmul.f32 0.2, %v6972_v32  ;;  %vm6974_vm1 = vcmp.ge.f32.partialorder %v6972_v32, 0.0 }
0x10c3   :  { %v6977_v7 = vmul.f32 0.2, %v6973_v23  ;;  %vm6975_vm0 = vcmp.ge.f32.partialorder %v6973_v23, 0.0 }
0x10c4   :  { %v13597_v39 = vsel %vm6974_vm1, %v6972_v32, %v6976_v33  ;;  %v10618_v32 = vld [vmem:[%s13871_s26 + $0x28] sm:$0xff]   ;;  %v10622_v33 = vld [vmem:[%s13871_s26 + $0x30] sm:$0xff]  }
0x10c5   :  { %v13590_v15 = vsel %vm6975_vm0, %v6973_v23, %v6977_v7  ;;  %v10621_v23 = vld [vmem:[%s13871_s26 + $0x70] sm:$0xff]   ;;  %v10625_v7 = vld [vmem:[%s13871_s26 + $0x78] sm:$0xff]  }
0x10c6   :  { %6985 = vmatprep.subr.mxu0 %v13590_v15  ;;  %7478 = vmatprep.subr.mxu1 %v13590_v15 }
0x10c7   :  { %6986 = vmatpush1.msra.mxu0 %v13597_v39  ;;  %7479 = vmatpush1.msra.mxu1 %v13597_v39 }
0x10c8   :  { %8798 = vmatmul.mubr.msk.f32.vlgmr.msra.gmra.mrb[78].mxu0 %vm6981_vm2, %v6980_v58  ;;  %7095 = vmatprep.subr.mxu0 %v13590_v15  ;;  %v10626_v58 = vld [vmem:[%s13871_s26 + $0x38] sm:$0xff]  }
0x10c9   :  { %7096 = vmatpush1.msra.mxu0 %v13597_v39  ;;  %7159 = vmatprep.mubr.f32.mxu0 %v10872_v0 }
0x10ca   :  { %8866 = vmatmul.mubr.msk.f32.vlgmr.msra.gmra.mrb[98].mxu1 %vm6981_vm2, %v8865_v2  ;;  %9175 = vmatprep.subr.bf16.mxu0 %v10581_v55  ;;  %v8915_v2 = vld [vmem:[%s13836_s21 + $0x6] sm:$0x3] }
0x10cb   :  { %9219 = vmatprep.subr.bf16.mxu1 %v10599_v19 }
0x10cc   :  { %8800 = vmatmul.mubr.msk.f32.vlgmr.msra.gmra.mrb[80].mxu0 %vm6981_vm2, %v8799_v60  ;;  %9220 = vmatpush3.bf16.msra.mxu1 %v10600_v26  ;;  %v10629_v60 = vld [vmem:[%s13871_s26 + $0x1c0] sm:$0xff]  }
0x10cd   :  { %9176 = vmatpush3.bf16.msra.mxu0 %v10582_v28  ;;  %9221 = vmatprep.subr.bf16.mxu1 %v10603_v36  ;;  %v10630_v28 = vld [vmem:[%s13871_s26 + $0x180] sm:$0xff]  }
0x10ce   :  { %9177 = vmatprep.subr.bf16.mxu0 %v10583_v56  ;;  %v10634_v56 = vld [vmem:[%s13871_s26 + $0x190] sm:$0xff]  }
0x10d0   :  { %9222 = vmatpush3.bf16.msra.mxu1 %v10604_v16 }
0x10d1   :  { %9178 = vmatpush3.bf16.msra.mxu0 %v10584_v30  ;;  %9223 = vmatprep.subr.bf16.mxu1 %v10607_v3  ;;  %v10635_v30 = vld [vmem:[%s13871_s26 + $0x1d8] sm:$0xff]  }
0x10d2   :  { %9179 = vmatprep.subr.bf16.mxu0 %v10585_v12  ;;  %v10636_v12 = vld [vmem:[%s13871_s26 + $0x198] sm:$0xff]  }
0x10d4   :  { %9224 = vmatpush3.bf16.msra.mxu1 %v10608_v51 }
0x10d5   :  { %9180 = vmatpush3.bf16.msra.mxu0 %v10586_v44  ;;  %9225 = vmatprep.subr.bf16.mxu1 %v10611_v24  ;;  %v10637_v44 = vld [vmem:[%s13871_s26 + $0x1e0] sm:$0xff]  }
0x10d6   :  { %9181 = vmatprep.subr.bf16.mxu0 %v10587_v11  ;;  %v10638_v11 = vld [vmem:[%s13871_s26 + $0x1a0] sm:$0xff]  }
0x10d8   :  { %9226 = vmatpush3.bf16.msra.mxu1 %v10612_v52 }
0x10d9   :  { %9182 = vmatpush3.bf16.msra.mxu0 %v10588_v48  ;;  %9227 = vmatprep.subr.bf16.mxu1 %v10615_v10  ;;  %v10639_v48 = vld [vmem:[%s13871_s26 + $0x1e8] sm:$0xff]  }
0x10da   :  { %9183 = vmatprep.subr.bf16.mxu0 %v10589_v6  ;;  %v10640_v6 = vld [vmem:[%s13871_s26 + $0x1a8] sm:$0xff]  }
0x10dc   :  { %9228 = vmatpush3.bf16.msra.mxu1 %v10616_v29 }
0x10dd   :  { %9184 = vmatpush3.bf16.msra.mxu0 %v10590_v54  ;;  %9229 = vmatprep.subr.bf16.mxu1 %v10619_v43  ;;  %v10641_v54 = vld [vmem:[%s13871_s26 + $0x1f0] sm:$0xff]  }
0x10de   :  { %9185 = vmatprep.subr.bf16.mxu0 %v10591_v22  ;;  %v10642_v22 = vld [vmem:[%s13871_s26 + $0x1b0] sm:$0xff]  }
0x10e0   :  { %9230 = vmatpush3.bf16.msra.mxu1 %v10620_v62 }
0x10e1   :  { %9186 = vmatpush3.bf16.msra.mxu0 %v10592_v13  ;;  %9231 = vmatprep.subr.bf16.mxu1 %v10623_v40  ;;  %v10643_v13 = vld [vmem:[%s13871_s26 + $0x1f8] sm:$0xff]  }
0x10e2   :  { %9187 = vmatprep.subr.bf16.mxu0 %v10593_v41  ;;  %v10644_v41 = vld [vmem:[%s13871_s26 + $0x1b8] sm:$0xff]  }
0x10e4   :  { %9232 = vmatpush3.bf16.msra.mxu1 %v10624_v59 }
0x10e5   :  { %9188 = vmatpush3.bf16.msra.mxu0 %v10594_v57  ;;  %9233 = vmatprep.subr.bf16.mxu1 %v10627_v9 }
0x10e6   :  { %9189 = vmatprep.subr.bf16.mxu0 %v10595_v63 }
0x10e8   :  { %9234 = vmatpush3.bf16.msra.mxu1 %v10628_v27 }
0x10e9   :  { %9190 = vmatpush3.bf16.msra.mxu0 %v10596_v53 }
0x10ea   :  { %9197 = vmatprep.subr.bf16.mxu0 %v10597_v47 }
0x119b   :  { %v7051_v8 = vpop.f32.mrb[78].mxu0 }
0x119c   :  { %v7053_v20 = vpop.f32.mrb[79].mxu0  ;;  %v7056_v55 = vpack.c.bf16 %v7051_v8, %v7051_v8 }
0x119d   :  { %v7544_v18 = vpop.f32.mrb[98].mxu1  ;;  %v7057_v34 = vpack.c.bf16 %v7053_v20, %v7053_v20 }
0x119e   :  { %v7549_v45 = vpack.c.bf16 %v7544_v18, %v7544_v18  ;;  %v7546_v5 = vpop.f32.mrb[99].mxu1 }
0x119f   :  { %v7161_v61 = vpop.f32.mrb[80].mxu0  ;;  %v7550_v50 = vpack.c.bf16 %v7546_v5, %v7546_v5 }
0x11a0   :  { %v7163_v21 = vpop.f32.mrb[81].mxu0  ;;  %v7166_v25 = vpack.c.bf16 %v7161_v61, %v7161_v61 }
0x11a1   :  { %v7167_v49 = vpack.c.bf16 %v7163_v21, %v7163_v21  ;;  %7712 = vmatprep.mubr.bf16.mxu1 %v7550_v50 }
0x11a2   :  { %7713 = vmatmul.mubr.bf16.vlgmr.msra.gmra.mrb[100].mxu1 %v7549_v45 }
0x11a3   :  { %7329 = vmatprep.mubr.bf16.mxu0 %v7167_v49 }
0x11a4   :  { %7330 = vmatmul.mubr.bf16.vlgmr.msra.gmra.mrb[84].mxu0 %v7166_v25 }
0x11a5   :  { %9198 = vmatpush3.bf16.msra.mxu0 %v10598_v38  ;;  %7465 = vmatprep.mubr.bf16.mxu0 %v7057_v34 }
0x11a6   :  { %9199 = vmatprep.subr.bf16.mxu0 %v10601_v14 }
0x11a9   :  { %9200 = vmatpush3.bf16.msra.mxu0 %v10602_v4 }
0x11aa   :  { %9201 = vmatprep.subr.bf16.mxu0 %v10605_v17 }
0x11ad   :  { %9202 = vmatpush3.bf16.msra.mxu0 %v10606_v1 }
0x11ae   :  { %9203 = vmatprep.subr.bf16.mxu0 %v10609_v35 }
0x11b1   :  { %9204 = vmatpush3.bf16.msra.mxu0 %v10610_v31 }
0x11b2   :  { %9205 = vmatprep.subr.bf16.mxu0 %v10613_v37 }
0x11b5   :  { %9206 = vmatpush3.bf16.msra.mxu0 %v10614_v42 }
0x11b6   :  { %9207 = vmatprep.subr.bf16.mxu0 %v10617_v46 }
0x11b9   :  { %9208 = vmatpush3.bf16.msra.mxu0 %v10618_v32 }
0x11ba   :  { %9209 = vmatprep.subr.bf16.mxu0 %v10621_v23 }
0x11bd   :  { %9210 = vmatpush3.bf16.msra.mxu0 %v10622_v33 }
0x11be   :  { %9211 = vmatprep.subr.bf16.mxu0 %v10625_v7 }
0x11c1   :  { %9212 = vmatpush3.bf16.msra.mxu0 %v10626_v58 }
0x11c2   :  { %7726 = vmatprep.subr.mxu0 %v13590_v15  ;;  %v10631_v15 = vld [vmem:[%s13871_s26 + $0x1c8] sm:$0xff]  }
0x11c4   :  { %7466 = vmatmul.mubr.bf16.vlgmr.msra.gmra.mrb[88].mxu0 %v7056_v55 }
0x11c5   :  { %7727 = vmatpush1.msra.mxu0 %v13597_v39  ;;  %7790 = vmatprep.mubr.f32.mxu0 %v10872_v0  ;;  %v10632_v0 = vld [vmem:[%s13871_s26 + $0x188] sm:$0xff]   ;;  %v10633_v39 = vld [vmem:[%s13871_s26 + $0x1d0] sm:$0xff]  }
0x11c6   :  { %9241 = vmatprep.subr.bf16.mxu0 %v10629_v60 }
0x11cc   :  { %8916 = vmatmul.mubr.msk.f32.vlgmr.msra.gmra.mrb[82].mxu0 %vm6981_vm2, %v8915_v2 }
0x11cd   :  { %9242 = vmatpush3.bf16.msra.mxu0 %v10630_v28 }
0x11ce   :  { %9243 = vmatprep.subr.bf16.mxu0 %v10631_v15 }
0x11d1   :  { %9244 = vmatpush3.bf16.msra.mxu0 %v10632_v0 }
0x11d2   :  { %9245 = vmatprep.subr.bf16.mxu0 %v10633_v39 }
0x11d5   :  { %9246 = vmatpush3.bf16.msra.mxu0 %v10634_v56 }
0x11d6   :  { %9247 = vmatprep.subr.bf16.mxu0 %v10635_v30 }
0x11d9   :  { %9248 = vmatpush3.bf16.msra.mxu0 %v10636_v12 }
0x11da   :  { %9249 = vmatprep.subr.bf16.mxu0 %v10637_v44 }
0x11dd   :  { %9250 = vmatpush3.bf16.msra.mxu0 %v10638_v11 }
0x11de   :  { %9251 = vmatprep.subr.bf16.mxu0 %v10639_v48 }
0x11e1   :  { %9252 = vmatpush3.bf16.msra.mxu0 %v10640_v6 }
0x11e2   :  { %9253 = vmatprep.subr.bf16.mxu0 %v10641_v54 }
0x11e5   :  { %9254 = vmatpush3.bf16.msra.mxu0 %v10642_v22 }
0x11e6   :  { %9255 = vmatprep.subr.bf16.mxu0 %v10643_v13 }
0x11e9   :  { %9256 = vmatpush3.bf16.msra.mxu0 %v10644_v41 }
0x1275   :  { %v9235_v57 = vpop.f32.mrb[100].mxu1 }
0x1276   :  { %v9236_v63 = vpop.f32.mrb[101].mxu1 }
0x1277   :  { %v9191_v53 = vpop.f32.mrb[84].mxu0  ;;  %v9237_v47 = vadd.f32 %v9236_v63, %v9235_v57  ;;  %v9238_v19 = vpop.f32.mrb[102].mxu1 }
0x1278   :  { %v9192_v26 = vpop.f32.mrb[85].mxu0  ;;  %v9239_v36 = vpop.f32.mrb[103].mxu1 }
0x1279   :  { %v9193_v16 = vadd.f32 %v9192_v26, %v9191_v53  ;;  %v9194_v3 = vpop.f32.mrb[86].mxu0 }
0x127a   :  { %v9195_v51 = vpop.f32.mrb[87].mxu0 }
0x1297   :  { %v9213_v24 = vpop.f32.mrb[88].mxu0 }
0x1298   :  { %v9214_v52 = vpop.f32.mrb[89].mxu0 }
0x1299   :  { %v9215_v10 = vadd.f32 %v9214_v52, %v9213_v24  ;;  %v9216_v29 = vpop.f32.mrb[90].mxu0 }
0x129a   :  { %v9217_v43 = vpop.f32.mrb[91].mxu0 }
0x129b   :  { %v7468_v62 = vadd.f32 %v9215_v10, %v9193_v16 }
0x129d   :  { %v7720_v40 = vadd.f32 %v9237_v47, %v7468_v62 }
0x129f   :  { %v7792_v59 = vpop.f32.mrb[82].mxu0 }
0x12a0   :  { %v7794_v9 = vpop.f32.mrb[83].mxu0  ;;  %v7797_v8 = vpack.c.bf16 %v7792_v59, %v7792_v59 }
0x12a1   :  { %v7798_v27 = vpack.c.bf16 %v7794_v9, %v7794_v9 }
0x12a3   :  { %7960 = vmatprep.mubr.bf16.mxu0 %v7798_v27 }
0x12a4   :  { %7961 = vmatmul.mubr.bf16.vlgmr.msra.gmra.mrb[92].mxu0 %v7797_v8 }
0x1377   :  { %v9257_v20 = vpop.f32.mrb[92].mxu0 }
0x1378   :  { %v9258_v18 = vpop.f32.mrb[93].mxu0 }
0x1379   :  { %v9259_v45 = vadd.f32 %v9258_v18, %v9257_v20  ;;  %v9260_v5 = vpop.f32.mrb[94].mxu0 }
0x137a   :  { %v9261_v61 = vpop.f32.mrb[95].mxu0 }
0x137b   :  { %v7968_v50 = vadd.f32 %v9259_v45, %v7720_v40 }
0x137d   :  { %7970 = vst.msk [vmem:[%s13872_s17] sm:$0x3] %vm7969_vm3, %v7968_v50 }
0x137e   :  { %7975 = vsyncpa [#allocation3], 1 }
0x137f   :  { %7976 = vsyncpa [#allocation5], 1 }
0x1380   :  { %7977 = vsyncpa [#allocation8], 1 }
0x1381   :  { %7978 = vsyncpa [#allocation11], 1 }
0x1382   :  { %7979 = vsyncpa [#allocation14], 1 }

</bundles_post_ra>
